<compile_context>
chip_gen: v7x
topology: tpu7x:2x2x1
jax: 0.10.0
libtpu: 0.0.40
codegen_flags: <defaults>
</compile_context>

<pallas_src>
import functools

import jax
import jax.numpy as jnp
from jax import lax
from jax.experimental import pallas as pl
from jax.experimental.pallas import tpu as pltpu


# -------------------- shared conv + pad + 2x2 max-pool body --------------------
def _conv_pool(x_ref, w_ref, b_ref, pool_buf, lhs_buf, *, KH, KW, Cin, pad,
               Hc, Wc, Hout, Wout, RB, nblk):
    """Valid conv (im2col-in-K matmul) + zero pad + 2x2/2 max-pool.

    Returns the pooled (Hout, Wout, Cpad) tile as float32 values.
    """
    Cpad = pool_buf.shape[-1]
    Wc8 = lhs_buf.shape[1]                 # Wc rounded up to a sublane multiple
    K = lhs_buf.shape[2]                   # KH*KW*Cin
    Hp, Wp = 2 * Hout, 2 * Wout
    bias = b_ref[...]                      # (1, Cpad) f32

    # Rows >= Wc of lhs_buf are never written; zero once so their (discarded)
    # matmul rows are deterministic.
    lhs_buf[...] = jnp.zeros_like(lhs_buf)

    # Zero only the padding frame; the interior is fully overwritten below.
    if pad > 0:
        pool_buf[0:pad, :, :] = jnp.zeros((pad, Wp, Cpad), jnp.float32)
        pool_buf[:, 0:pad, :] = jnp.zeros((Hp, pad, Cpad), jnp.float32)
    if pad + Hc < Hp:
        pool_buf[pad + Hc:, :, :] = jnp.zeros((Hp - pad - Hc, Wp, Cpad), jnp.float32)
    if pad + Wc < Wp:
        pool_buf[:, pad + Wc:, :] = jnp.zeros((Hp, Wp - pad - Wc, Cpad), jnp.float32)

    def blk_body(blk, carry):
        # Clamp the last block so it never reads past the input; it just
        # recomputes (and rewrites) a few rows -- idempotent.
        if isinstance(blk, int):
            i0 = min(blk * RB, Hc - RB)
        else:
            i0 = jnp.minimum(blk * RB, Hc - RB)
        # Build the (RB*Wc8, K) im2col LHS: one lane-offset store per tap.
        for kh in range(KH):
            slab = x_ref[pl.ds(i0 + kh, RB)]                    # (RB, W, Cin)
            for kw in range(KW):
                off = (kh * KW + kw) * Cin
                lhs_buf[:, :Wc, off:off + Cin] = slab[:, kw:kw + Wc, :]
        # One MXU matmul per row block: M = RB*Wc8, K = KH*KW*Cin.
        acc = jnp.dot(lhs_buf[...].reshape(RB * Wc8, K), w_ref[...],
                      preferred_element_type=jnp.float32) + bias
        acc = acc.reshape(RB, Wc8, Cpad)
        pool_buf[pl.ds(pad + i0, RB), pl.ds(pad, Wc), :] = acc[:, :Wc, :]
        return carry

    if nblk <= 4:                          # fully static addressing, unrolled
        for blk in range(nblk):
            blk_body(blk, 0)
    else:
        lax.fori_loop(0, nblk, blk_body, 0, unroll=2)

    # 2x2/2 max-pool: column pairs via stride-2 reads, row pairs are a free
    # leading-dim split.
    left = pool_buf[:, pl.ds(0, Wout, stride=2), :]             # (Hp, Wout, Cpad)
    right = pool_buf[:, pl.ds(1, Wout, stride=2), :]
    cmax = jnp.maximum(left, right).reshape(Hout, 2, Wout, Cpad)
    return jnp.maximum(cmax[:, 0], cmax[:, 1])                  # (Hout, Wout, Cpad)


# ------- kernel 1a: conv + pool + partial BN stats (BatchNorm path) ------------
def _conv_pool_stats_kernel(x_ref, w_ref, b_ref, pooled_ref, ssum_ref, ssq_ref,
                            pool_buf, lhs_buf, **kw):
    pooled = _conv_pool(x_ref, w_ref, b_ref, pool_buf, lhs_buf, **kw)
    pooled_ref[...] = pooled.astype(pooled_ref.dtype)
    ssum_ref[...] = jnp.sum(jnp.sum(pooled, axis=0), axis=0, keepdims=True)
    ssq_ref[...] = jnp.sum(jnp.sum(pooled * pooled, axis=0), axis=0, keepdims=True)


# ------- kernel 1b: conv + pool + fused ReLU (no-BN / bottleneck path) ---------
def _conv_pool_relu_kernel(x_ref, w_ref, b_ref, out_ref, pool_buf, lhs_buf, **kw):
    pooled = _conv_pool(x_ref, w_ref, b_ref, pool_buf, lhs_buf, **kw)
    out_ref[...] = jnp.maximum(pooled[..., :out_ref.shape[-1]], 0.0).astype(out_ref.dtype)


# -------------- kernel 2: finalize BN stats + normalize + ReLU -----------------
def _bn_relu_kernel(ssum_ref, ssq_ref, g_ref, bt_ref, x_ref, o_ref, *, inv_count):
    x = x_ref[...].astype(jnp.float32)                          # (tr, Cpad)
    mean = jnp.sum(ssum_ref[...], axis=0) * inv_count           # (1, Cpad)
    var = jnp.sum(ssq_ref[...], axis=0) * inv_count - mean * mean
    # TODO(synk): single-pass E[x^2]-mean^2 can cancel for large-mean
    # activations; switch to centered accumulation if that regime matters.
    var = jnp.maximum(var, 0.0)
    scale = g_ref[...] * lax.rsqrt(var + 1e-5)
    shift = bt_ref[...] - mean * scale
    y = jnp.maximum(x * scale + shift, 0.0)
    o_ref[...] = y[:, :o_ref.shape[-1]]                         # emit real channels only


# ----------------------------------- wrapper -----------------------------------
def _vmem_limit_bytes():
    try:
        cap = int(pltpu.get_tpu_info().vmem_capacity_bytes)
    except Exception:
        cap = 64 * 1024 * 1024
    return int(min(cap * 3 // 4, 100 * 1024 * 1024))            # ~48MiB v7x, ~96MiB v5e/v6e


def downsampling_forward(x_nchw, w_oihw, conv_bias, gamma, beta, *,
                         batchnorm=True, bottleneck=False,
                         compute_dtype=jnp.bfloat16, tile_rows=2048):
    KH, KW = (2, 2) if bottleneck else (4, 4)
    pad = 1 if bottleneck else 2

    N, Cin, H, W = x_nchw.shape
    Cout = w_oihw.shape[0]
    assert w_oihw.shape == (Cout, Cin, KH, KW)

    Ho, Wo = H - KH + 1, W - KW + 1                              # valid conv output
    Hout, Wout = (Ho + 2 * pad) // 2, (Wo + 2 * pad) // 2        # floor-mode pool out
    Hc, Wc = min(Ho, 2 * Hout - pad), min(Wo, 2 * Wout - pad)    # conv rows/cols kept
    Cpad = ((Cout + 127) // 128) * 128                           # lane-dense channels
    K = KH * KW * Cin                                            # folded contraction
    Wc8 = ((Wc + 7) // 8) * 8                                    # sublane-aligned M rows
    RB = max(1, min(Hc, pl.cdiv(256, Wc)))                       # conv rows per matmul
    nblk = pl.cdiv(Hc, RB)
    apply_bn = bool(batchnorm) and (not bottleneck)
    pooled_dtype = compute_dtype                                 # bf16 on the fast path

    # ---- glue: layout + tiny parameter prep ----
    x_nhwc = jnp.transpose(x_nchw, (0, 2, 3, 1)).astype(compute_dtype)
    w_mat = jnp.transpose(w_oihw, (2, 3, 1, 0)).reshape(K, Cout)   # (kh,kw,ci) -> rows
    w_mat = jnp.pad(w_mat, ((0, 0), (0, Cpad - Cout))).astype(compute_dtype)
    pad_c = ((0, 0), (0, Cpad - Cout))
    b_pad = jnp.pad(conv_bias.astype(jnp.float32).reshape(1, Cout), pad_c)
    g_pad = jnp.pad(gamma.astype(jnp.float32).reshape(1, Cout), pad_c)
    bt_pad = jnp.pad(beta.astype(jnp.float32).reshape(1, Cout), pad_c)

    cparams = pltpu.CompilerParams(dimension_semantics=("parallel",),
                                   vmem_limit_bytes=_vmem_limit_bytes())
    scratch = [pltpu.VMEM((2 * Hout, 2 * Wout, Cpad), jnp.float32),   # padded conv buf
               pltpu.VMEM((RB, Wc8, K), compute_dtype)]               # im2col LHS
    statics = dict(KH=KH, KW=KW, Cin=Cin, pad=pad, Hc=Hc, Wc=Wc,
                   Hout=Hout, Wout=Wout, RB=RB, nblk=nblk)
    in_specs = [pl.BlockSpec((None, H, W, Cin), lambda n: (n, 0, 0, 0)),
                pl.BlockSpec((K, Cpad), lambda n: (0, 0)),
                pl.BlockSpec((1, Cpad), lambda n: (0, 0))]

    if not apply_bn:
        # Single fused kernel: conv + pad + pool + ReLU, Cout channels only.
        y_nhwc = pl.pallas_call(
            functools.partial(_conv_pool_relu_kernel, **statics),
            out_shape=jax.ShapeDtypeStruct((N, Hout, Wout, Cout), jnp.float32),
            grid=(N,),
            in_specs=in_specs,
            out_specs=pl.BlockSpec((None, Hout, Wout, Cout), lambda n: (n, 0, 0, 0)),
            scratch_shapes=scratch,
            compiler_params=cparams,
        )(x_nhwc, w_mat, b_pad)
        return jnp.transpose(y_nhwc, (0, 3, 1, 2))

    # ---- kernel 1: fused conv + pad + pool + partial stats, grid over images ----
    pooled, ssum, ssq = pl.pallas_call(
        functools.partial(_conv_pool_stats_kernel, **statics),
        out_shape=(jax.ShapeDtypeStruct((N, Hout, Wout, Cpad), pooled_dtype),
                   jax.ShapeDtypeStruct((N, 1, Cpad), jnp.float32),
                   jax.ShapeDtypeStruct((N, 1, Cpad), jnp.float32)),
        grid=(N,),
        in_specs=in_specs,
        out_specs=(pl.BlockSpec((None, Hout, Wout, Cpad), lambda n: (n, 0, 0, 0)),
                   pl.BlockSpec((None, 1, Cpad), lambda n: (n, 0, 0)),
                   pl.BlockSpec((None, 1, Cpad), lambda n: (n, 0, 0))),
        scratch_shapes=scratch,
        compiler_params=cparams,
    )(x_nhwc, w_mat, b_pad)

    # ---- kernel 2: normalize + ReLU over lane-dense (rows, 128) slabs ----
    rows = N * Hout * Wout
    tr = min(tile_rows, rows)                     # tile_rows is 8-aligned; rows => full dim
    pooled2 = pooled.reshape(rows, Cpad)          # free leading-dim merge
    y2 = pl.pallas_call(
        functools.partial(_bn_relu_kernel, inv_count=1.0 / rows),
        out_shape=jax.ShapeDtypeStruct((rows, Cout), jnp.float32),
        grid=(pl.cdiv(rows, tr),),
        in_specs=[pl.BlockSpec((N, 1, Cpad), lambda i: (0, 0, 0)),
                  pl.BlockSpec((N, 1, Cpad), lambda i: (0, 0, 0)),
                  pl.BlockSpec((1, Cpad), lambda i: (0, 0)),
                  pl.BlockSpec((1, Cpad), lambda i: (0, 0)),
                  pl.BlockSpec((tr, Cpad), lambda i: (i, 0))],
        out_specs=pl.BlockSpec((tr, Cout), lambda i: (i, 0)),
        compiler_params=cparams,
    )(ssum, ssq, g_pad, bt_pad, pooled2)

    y = y2.reshape(N, Hout, Wout, Cout)
    return jnp.transpose(y, (0, 3, 1, 2))                         # back to NCHW


# ------------------------------ pure-JAX reference ------------------------------
def reference(x, w, bias, gamma, beta, *, pad=2, apply_bn=True):
    conv = lax.conv_general_dilated(
        x, w, window_strides=(1, 1), padding="VALID",
        dimension_numbers=("NCHW", "OIHW", "NCHW")) + bias[None, :, None, None]
    conv_p = jnp.pad(conv, ((0, 0), (0, 0), (pad, pad), (pad, pad)))
    N, C, Hp, Wp = conv_p.shape
    Ht, Wt = (Hp // 2) * 2, (Wp // 2) * 2
    cp = conv_p[:, :, :Ht, :Wt].reshape(N, C, Ht // 2, 2, Wt // 2, 2)
    pooled = cp.max(axis=(3, 5))
    y = pooled
    if apply_bn:
        mean = pooled.mean(axis=(0, 2, 3), keepdims=True)
        var = ((pooled - mean) ** 2).mean(axis=(0, 2, 3), keepdims=True)
        y = ((pooled - mean) / jnp.sqrt(var + 1e-5)) * gamma[None, :, None, None] \
            + beta[None, :, None, None]
    return jnp.maximum(y, 0.0)


if __name__ == "__main__":
    key = jax.random.PRNGKey(0)
    k1, k2, k3, k4, k5 = jax.random.split(key, 5)

    N, Cin, H, W, Cout = 2, 4, 16, 16, 8
    x = jax.random.normal(k1, (N, Cin, H, W), jnp.float32)

    # Conv2d(in_channels=4, out_channels=8, kernel_size=(4,4)) parameters
    w = jax.random.normal(k2, (Cout, Cin, 4, 4), jnp.float32) * 0.1
    bias = jax.random.normal(k3, (Cout,), jnp.float32) * 0.1
    # BatchNorm2d default init: weight=1, bias=0
    gamma = jnp.ones((Cout,), jnp.float32)
    beta = jnp.zeros((Cout,), jnp.float32)

    ref = reference(x, w, bias, gamma, beta, pad=2, apply_bn=True)

    # f32 compute path (exact semantics up to matmul accumulation order/precision)
    out_f32 = jax.block_until_ready(downsampling_forward(
        x, w, bias, gamma, beta, batchnorm=True, bottleneck=False,
        compute_dtype=jnp.float32))
    assert out_f32.shape == ref.shape == (N, Cout, 8, 8), (out_f32.shape, ref.shape)
    assert jnp.allclose(out_f32, ref, atol=1e-2, rtol=1e-2), \
        float(jnp.abs(out_f32 - ref).max())

    # default bf16-boundary path (f32 accumulation, bf16 pooled intermediate)
    out_bf16 = jax.block_until_ready(downsampling_forward(
        x, w, bias, gamma, beta, batchnorm=True, bottleneck=False))
    assert out_bf16.shape == ref.shape
    assert jnp.allclose(out_bf16, ref, atol=5e-2, rtol=5e-2), \
        float(jnp.abs(out_bf16 - ref).max())

    # bottleneck path: conv 2x2, pad 1, BN skipped -> kernel 2 skipped entirely
    wb = jax.random.normal(k4, (Cout, Cin, 2, 2), jnp.float32) * 0.1
    bb = jax.random.normal(k5, (Cout,), jnp.float32) * 0.1
    ref_b = reference(x, wb, bb, gamma, beta, pad=1, apply_bn=False)
    out_b = jax.block_until_ready(downsampling_forward(
        x, wb, bb, gamma, beta, batchnorm=True, bottleneck=True))
    assert out_b.shape == ref_b.shape == (N, Cout, 8, 8)
    assert jnp.allclose(out_b, ref_b, atol=5e-2, rtol=5e-2), \
        float(jnp.abs(out_b - ref_b).max())

    print("KERNEL_OK")
</pallas_src>

<mosaic_0001>
module attributes {stable_mosaic.version = 11 : i64} {
  func.func @_conv_pool_stats_kernel(%arg0: i32, %arg1: memref<1x16x16x4xf32, #tpu.memory_space<vmem>>, %arg2: memref<64x128xf32, #tpu.memory_space<vmem>>, %arg3: memref<1x128xf32, #tpu.memory_space<vmem>>, %arg4: memref<1x8x8x128xf32, #tpu.memory_space<vmem>>, %arg5: memref<1x1x128xf32, #tpu.memory_space<vmem>>, %arg6: memref<1x1x128xf32, #tpu.memory_space<vmem>>, %arg7: memref<16x16x128xf32, #tpu.memory_space<vmem>>, %arg8: memref<13x16x64xf32, #tpu.memory_space<vmem>>) attributes {dimension_semantics = [#tpu.dimension_semantics<parallel>], iteration_bounds = array<i64: 2>, scalar_prefetch = 0 : i64, scratch_operands = 2 : i64, tpu.core_type = #tpu.core_type<tc>, window_params = [{transform_indices = @transform_0, window_bounds = array<i64: 1, 16, 16, 4>}, {pipeline_mode = #tpu.pipeline_mode<synchronous>, transform_indices = @transform_1, window_bounds = array<i64: 64, 128>}, {pipeline_mode = #tpu.pipeline_mode<synchronous>, transform_indices = @transform_2, window_bounds = array<i64: 1, 128>}, {transform_indices = @transform_3, window_bounds = array<i64: 1, 8, 8, 128>}, {transform_indices = @transform_4, window_bounds = array<i64: 1, 1, 128>}, {transform_indices = @transform_5, window_bounds = array<i64: 1, 1, 128>}]} {
    %c0 = arith.constant 0 : index
    %c0_0 = arith.constant 0 : index
    %0 = vector.load %arg3[%c0, %c0_0] : memref<1x128xf32, #tpu.memory_space<vmem>>, vector<1x128xf32>
    %cst = arith.constant 0.000000e+00 : f32
    %1 = vector.broadcast %cst : f32 to vector<13x16x64xf32>
    %c0_1 = arith.constant 0 : index
    %c0_2 = arith.constant 0 : index
    %c0_3 = arith.constant 0 : index
    %2 = vector.load %arg8[%c0_1, %c0_2, %c0_3] : memref<13x16x64xf32, #tpu.memory_space<vmem>>, vector<13x16x64xf32>
    tpu.vector_store %arg8[%c0_1, %c0_2, %c0_3], %1 {strides = array<i32>} : memref<13x16x64xf32, #tpu.memory_space<vmem>>, vector<13x16x64xf32>,
    %cst_4 = arith.constant 0.000000e+00 : f32
    %3 = vector.broadcast %cst_4 : f32 to vector<2x16x128xf32>
    %c0_5 = arith.constant 0 : index
    %c0_6 = arith.constant 0 : index
    %c0_7 = arith.constant 0 : index
    %4 = vector.load %arg7[%c0_5, %c0_6, %c0_7] : memref<16x16x128xf32, #tpu.memory_space<vmem>>, vector<2x16x128xf32>
    tpu.vector_store %arg7[%c0_5, %c0_6, %c0_7], %3 {strides = array<i32>} : memref<16x16x128xf32, #tpu.memory_space<vmem>>, vector<2x16x128xf32>,
    %cst_8 = arith.constant 0.000000e+00 : f32
    %5 = vector.broadcast %cst_8 : f32 to vector<16x2x128xf32>
    %c0_9 = arith.constant 0 : index
    %c0_10 = arith.constant 0 : index
    %c0_11 = arith.constant 0 : index
    %6 = vector.load %arg7[%c0_9, %c0_10, %c0_11] : memref<16x16x128xf32, #tpu.memory_space<vmem>>, vector<16x2x128xf32>
    tpu.vector_store %arg7[%c0_9, %c0_10, %c0_11], %5 {strides = array<i32>} : memref<16x16x128xf32, #tpu.memory_space<vmem>>, vector<16x2x128xf32>,
    %cst_12 = arith.constant 0.000000e+00 : f32
    %7 = vector.broadcast %cst_12 : f32 to vector<1x16x128xf32>
    %c15 = arith.constant 15 : index
    %c0_13 = arith.constant 0 : index
    %c0_14 = arith.constant 0 : index
    %8 = vector.load %arg7[%c15, %c0_13, %c0_14] : memref<16x16x128xf32, #tpu.memory_space<vmem>>, vector<1x16x128xf32>
    tpu.vector_store %arg7[%c15, %c0_13, %c0_14], %7 {strides = array<i32>} : memref<16x16x128xf32, #tpu.memory_space<vmem>>, vector<1x16x128xf32>,
    %cst_15 = arith.constant 0.000000e+00 : f32
    %9 = vector.broadcast %cst_15 : f32 to vector<16x1x128xf32>
    %c0_16 = arith.constant 0 : index
    %c15_17 = arith.constant 15 : index
    %c0_18 = arith.constant 0 : index
    %10 = vector.load %arg7[%c0_16, %c15_17, %c0_18] : memref<16x16x128xf32, #tpu.memory_space<vmem>>, vector<16x1x128xf32>
    tpu.vector_store %arg7[%c0_16, %c15_17, %c0_18], %9 {strides = array<i32>} : memref<16x16x128xf32, #tpu.memory_space<vmem>>, vector<16x1x128xf32>,
    %c0_19 = arith.constant 0 : index
    %c0_20 = arith.constant 0 : index
    %c0_21 = arith.constant 0 : index
    %c0_22 = arith.constant 0 : index
    %11 = vector.load %arg1[%c0_19, %c0_20, %c0_21, %c0_22] : memref<1x16x16x4xf32, #tpu.memory_space<vmem>>, vector<1x13x16x4xf32>
    %12 = vector.shape_cast %11 : vector<1x13x16x4xf32> to vector<13x16x4xf32>
    %13 = vector.extract_strided_slice %12 {offsets = [0, 0, 0], sizes = [13, 13, 4], strides = [1, 1, 1]} : vector<13x16x4xf32> to vector<13x13x4xf32>
    %c0_23 = arith.constant 0 : index
    %c0_24 = arith.constant 0 : index
    %c0_25 = arith.constant 0 : index
    %14 = vector.load %arg8[%c0_23, %c0_24, %c0_25] : memref<13x16x64xf32, #tpu.memory_space<vmem>>, vector<13x13x4xf32>
    tpu.vector_store %arg8[%c0_23, %c0_24, %c0_25], %13 {strides = array<i32>} : memref<13x16x64xf32, #tpu.memory_space<vmem>>, vector<13x13x4xf32>,
    %15 = vector.extract_strided_slice %12 {offsets = [0, 1, 0], sizes = [13, 13, 4], strides = [1, 1, 1]} : vector<13x16x4xf32> to vector<13x13x4xf32>
    %c0_26 = arith.constant 0 : index
    %c0_27 = arith.constant 0 : index
    %c4 = arith.constant 4 : index
    %16 = vector.load %arg8[%c0_26, %c0_27, %c4] : memref<13x16x64xf32, #tpu.memory_space<vmem>>, vector<13x13x4xf32>
    tpu.vector_store %arg8[%c0_26, %c0_27, %c4], %15 {strides = array<i32>} : memref<13x16x64xf32, #tpu.memory_space<vmem>>, vector<13x13x4xf32>,
    %17 = vector.extract_strided_slice %12 {offsets = [0, 2, 0], sizes = [13, 13, 4], strides = [1, 1, 1]} : vector<13x16x4xf32> to vector<13x13x4xf32>
    %c0_28 = arith.constant 0 : index
    %c0_29 = arith.constant 0 : index
    %c8 = arith.constant 8 : index
    %18 = vector.load %arg8[%c0_28, %c0_29, %c8] : memref<13x16x64xf32, #tpu.memory_space<vmem>>, vector<13x13x4xf32>
    tpu.vector_store %arg8[%c0_28, %c0_29, %c8], %17 {strides = array<i32>} : memref<13x16x64xf32, #tpu.memory_space<vmem>>, vector<13x13x4xf32>,
    %19 = vector.extract_strided_slice %12 {offsets = [0, 3, 0], sizes = [13, 13, 4], strides = [1, 1, 1]} : vector<13x16x4xf32> to vector<13x13x4xf32>
    %c0_30 = arith.constant 0 : index
    %c0_31 = arith.constant 0 : index
    %c12 = arith.constant 12 : index
    %20 = vector.load %arg8[%c0_30, %c0_31, %c12] : memref<13x16x64xf32, #tpu.memory_space<vmem>>, vector<13x13x4xf32>
    tpu.vector_store %arg8[%c0_30, %c0_31, %c12], %19 {strides = array<i32>} : memref<13x16x64xf32, #tpu.memory_space<vmem>>, vector<13x13x4xf32>,
    %c0_32 = arith.constant 0 : index
    %c1 = arith.constant 1 : index
    %c0_33 = arith.constant 0 : index
    %c0_34 = arith.constant 0 : index
    %21 = vector.load %arg1[%c0_32, %c1, %c0_33, %c0_34] : memref<1x16x16x4xf32, #tpu.memory_space<vmem>>, vector<1x13x16x4xf32>
    %22 = vector.shape_cast %21 : vector<1x13x16x4xf32> to vector<13x16x4xf32>
    %23 = vector.extract_strided_slice %22 {offsets = [0, 0, 0], sizes = [13, 13, 4], strides = [1, 1, 1]} : vector<13x16x4xf32> to vector<13x13x4xf32>
    %c0_35 = arith.constant 0 : index
    %c0_36 = arith.constant 0 : index
    %c16 = arith.constant 16 : index
    %24 = vector.load %arg8[%c0_35, %c0_36, %c16] : memref<13x16x64xf32, #tpu.memory_space<vmem>>, vector<13x13x4xf32>
    tpu.vector_store %arg8[%c0_35, %c0_36, %c16], %23 {strides = array<i32>} : memref<13x16x64xf32, #tpu.memory_space<vmem>>, vector<13x13x4xf32>,
    %25 = vector.extract_strided_slice %22 {offsets = [0, 1, 0], sizes = [13, 13, 4], strides = [1, 1, 1]} : vector<13x16x4xf32> to vector<13x13x4xf32>
    %c0_37 = arith.constant 0 : index
    %c0_38 = arith.constant 0 : index
    %c20 = arith.constant 20 : index
    %26 = vector.load %arg8[%c0_37, %c0_38, %c20] : memref<13x16x64xf32, #tpu.memory_space<vmem>>, vector<13x13x4xf32>
    tpu.vector_store %arg8[%c0_37, %c0_38, %c20], %25 {strides = array<i32>} : memref<13x16x64xf32, #tpu.memory_space<vmem>>, vector<13x13x4xf32>,
    %27 = vector.extract_strided_slice %22 {offsets = [0, 2, 0], sizes = [13, 13, 4], strides = [1, 1, 1]} : vector<13x16x4xf32> to vector<13x13x4xf32>
    %c0_39 = arith.constant 0 : index
    %c0_40 = arith.constant 0 : index
    %c24 = arith.constant 24 : index
    %28 = vector.load %arg8[%c0_39, %c0_40, %c24] : memref<13x16x64xf32, #tpu.memory_space<vmem>>, vector<13x13x4xf32>
    tpu.vector_store %arg8[%c0_39, %c0_40, %c24], %27 {strides = array<i32>} : memref<13x16x64xf32, #tpu.memory_space<vmem>>, vector<13x13x4xf32>,
    %29 = vector.extract_strided_slice %22 {offsets = [0, 3, 0], sizes = [13, 13, 4], strides = [1, 1, 1]} : vector<13x16x4xf32> to vector<13x13x4xf32>
    %c0_41 = arith.constant 0 : index
    %c0_42 = arith.constant 0 : index
    %c28 = arith.constant 28 : index
    %30 = vector.load %arg8[%c0_41, %c0_42, %c28] : memref<13x16x64xf32, #tpu.memory_space<vmem>>, vector<13x13x4xf32>
    tpu.vector_store %arg8[%c0_41, %c0_42, %c28], %29 {strides = array<i32>} : memref<13x16x64xf32, #tpu.memory_space<vmem>>, vector<13x13x4xf32>,
    %c0_43 = arith.constant 0 : index
    %c2 = arith.constant 2 : index
    %c0_44 = arith.constant 0 : index
    %c0_45 = arith.constant 0 : index
    %31 = vector.load %arg1[%c0_43, %c2, %c0_44, %c0_45] : memref<1x16x16x4xf32, #tpu.memory_space<vmem>>, vector<1x13x16x4xf32>
    %32 = vector.shape_cast %31 : vector<1x13x16x4xf32> to vector<13x16x4xf32>
    %33 = vector.extract_strided_slice %32 {offsets = [0, 0, 0], sizes = [13, 13, 4], strides = [1, 1, 1]} : vector<13x16x4xf32> to vector<13x13x4xf32>
    %c0_46 = arith.constant 0 : index
    %c0_47 = arith.constant 0 : index
    %c32 = arith.constant 32 : index
    %34 = vector.load %arg8[%c0_46, %c0_47, %c32] : memref<13x16x64xf32, #tpu.memory_space<vmem>>, vector<13x13x4xf32>
    tpu.vector_store %arg8[%c0_46, %c0_47, %c32], %33 {strides = array<i32>} : memref<13x16x64xf32, #tpu.memory_space<vmem>>, vector<13x13x4xf32>,
    %35 = vector.extract_strided_slice %32 {offsets = [0, 1, 0], sizes = [13, 13, 4], strides = [1, 1, 1]} : vector<13x16x4xf32> to vector<13x13x4xf32>
    %c0_48 = arith.constant 0 : index
    %c0_49 = arith.constant 0 : index
    %c36 = arith.constant 36 : index
    %36 = vector.load %arg8[%c0_48, %c0_49, %c36] : memref<13x16x64xf32, #tpu.memory_space<vmem>>, vector<13x13x4xf32>
    tpu.vector_store %arg8[%c0_48, %c0_49, %c36], %35 {strides = array<i32>} : memref<13x16x64xf32, #tpu.memory_space<vmem>>, vector<13x13x4xf32>,
    %37 = vector.extract_strided_slice %32 {offsets = [0, 2, 0], sizes = [13, 13, 4], strides = [1, 1, 1]} : vector<13x16x4xf32> to vector<13x13x4xf32>
    %c0_50 = arith.constant 0 : index
    %c0_51 = arith.constant 0 : index
    %c40 = arith.constant 40 : index
    %38 = vector.load %arg8[%c0_50, %c0_51, %c40] : memref<13x16x64xf32, #tpu.memory_space<vmem>>, vector<13x13x4xf32>
    tpu.vector_store %arg8[%c0_50, %c0_51, %c40], %37 {strides = array<i32>} : memref<13x16x64xf32, #tpu.memory_space<vmem>>, vector<13x13x4xf32>,
    %39 = vector.extract_strided_slice %32 {offsets = [0, 3, 0], sizes = [13, 13, 4], strides = [1, 1, 1]} : vector<13x16x4xf32> to vector<13x13x4xf32>
    %c0_52 = arith.constant 0 : index
    %c0_53 = arith.constant 0 : index
    %c44 = arith.constant 44 : index
    %40 = vector.load %arg8[%c0_52, %c0_53, %c44] : memref<13x16x64xf32, #tpu.memory_space<vmem>>, vector<13x13x4xf32>
    tpu.vector_store %arg8[%c0_52, %c0_53, %c44], %39 {strides = array<i32>} : memref<13x16x64xf32, #tpu.memory_space<vmem>>, vector<13x13x4xf32>,
    %c0_54 = arith.constant 0 : index
    %c3 = arith.constant 3 : index
    %c0_55 = arith.constant 0 : index
    %c0_56 = arith.constant 0 : index
    %41 = vector.load %arg1[%c0_54, %c3, %c0_55, %c0_56] : memref<1x16x16x4xf32, #tpu.memory_space<vmem>>, vector<1x13x16x4xf32>
    %42 = vector.shape_cast %41 : vector<1x13x16x4xf32> to vector<13x16x4xf32>
    %43 = vector.extract_strided_slice %42 {offsets = [0, 0, 0], sizes = [13, 13, 4], strides = [1, 1, 1]} : vector<13x16x4xf32> to vector<13x13x4xf32>
    %c0_57 = arith.constant 0 : index
    %c0_58 = arith.constant 0 : index
    %c48 = arith.constant 48 : index
    %44 = vector.load %arg8[%c0_57, %c0_58, %c48] : memref<13x16x64xf32, #tpu.memory_space<vmem>>, vector<13x13x4xf32>
    tpu.vector_store %arg8[%c0_57, %c0_58, %c48], %43 {strides = array<i32>} : memref<13x16x64xf32, #tpu.memory_space<vmem>>, vector<13x13x4xf32>,
    %45 = vector.extract_strided_slice %42 {offsets = [0, 1, 0], sizes = [13, 13, 4], strides = [1, 1, 1]} : vector<13x16x4xf32> to vector<13x13x4xf32>
    %c0_59 = arith.constant 0 : index
    %c0_60 = arith.constant 0 : index
    %c52 = arith.constant 52 : index
    %46 = vector.load %arg8[%c0_59, %c0_60, %c52] : memref<13x16x64xf32, #tpu.memory_space<vmem>>, vector<13x13x4xf32>
    tpu.vector_store %arg8[%c0_59, %c0_60, %c52], %45 {strides = array<i32>} : memref<13x16x64xf32, #tpu.memory_space<vmem>>, vector<13x13x4xf32>,
    %47 = vector.extract_strided_slice %42 {offsets = [0, 2, 0], sizes = [13, 13, 4], strides = [1, 1, 1]} : vector<13x16x4xf32> to vector<13x13x4xf32>
    %c0_61 = arith.constant 0 : index
    %c0_62 = arith.constant 0 : index
    %c56 = arith.constant 56 : index
    %48 = vector.load %arg8[%c0_61, %c0_62, %c56] : memref<13x16x64xf32, #tpu.memory_space<vmem>>, vector<13x13x4xf32>
    tpu.vector_store %arg8[%c0_61, %c0_62, %c56], %47 {strides = array<i32>} : memref<13x16x64xf32, #tpu.memory_space<vmem>>, vector<13x13x4xf32>,
    %49 = vector.extract_strided_slice %42 {offsets = [0, 3, 0], sizes = [13, 13, 4], strides = [1, 1, 1]} : vector<13x16x4xf32> to vector<13x13x4xf32>
    %c0_63 = arith.constant 0 : index
    %c0_64 = arith.constant 0 : index
    %c60 = arith.constant 60 : index
    %50 = vector.load %arg8[%c0_63, %c0_64, %c60] : memref<13x16x64xf32, #tpu.memory_space<vmem>>, vector<13x13x4xf32>
    tpu.vector_store %arg8[%c0_63, %c0_64, %c60], %49 {strides = array<i32>} : memref<13x16x64xf32, #tpu.memory_space<vmem>>, vector<13x13x4xf32>,
    %c0_65 = arith.constant 0 : index
    %c0_66 = arith.constant 0 : index
    %c0_67 = arith.constant 0 : index
    %51 = vector.load %arg8[%c0_65, %c0_66, %c0_67] : memref<13x16x64xf32, #tpu.memory_space<vmem>>, vector<13x16x64xf32>
    %52 = vector.shape_cast %51 : vector<13x16x64xf32> to vector<208x64xf32>
    %c0_68 = arith.constant 0 : index
    %c0_69 = arith.constant 0 : index
    %53 = vector.load %arg2[%c0_68, %c0_69] : memref<64x128xf32, #tpu.memory_space<vmem>>, vector<64x128xf32>
    %cst_70 = arith.constant dense<0.000000e+00> : vector<208x128xf32>
    %54 = tpu.matmul %52, %53, %cst_70 {dimension_numbers = #tpu.dot_dimension_numbers<[1], [0], [0], [1], [0, 0, 1, 1], [], []>} : vector<208x64xf32>, vector<64x128xf32>, vector<208x128xf32> -> vector<208x128xf32>
    %55 = vector.broadcast %0 : vector<1x128xf32> to vector<208x128xf32>
    %56 = arith.addf %54, %55 : vector<208x128xf32>
    %57 = vector.shape_cast %56 : vector<208x128xf32> to vector<13x16x128xf32>
    %58 = vector.extract_strided_slice %57 {offsets = [0, 0, 0], sizes = [13, 13, 128], strides = [1, 1, 1]} : vector<13x16x128xf32> to vector<13x13x128xf32>
    %c2_71 = arith.constant 2 : index
    %c2_72 = arith.constant 2 : index
    %c0_73 = arith.constant 0 : index
    %59 = vector.load %arg7[%c2_71, %c2_72, %c0_73] : memref<16x16x128xf32, #tpu.memory_space<vmem>>, vector<13x13x128xf32>
    tpu.vector_store %arg7[%c2_71, %c2_72, %c0_73], %58 {strides = array<i32>} : memref<16x16x128xf32, #tpu.memory_space<vmem>>, vector<13x13x128xf32>,
    %c0_74 = arith.constant 0 : index
    %c0_75 = arith.constant 0 : index
    %c0_76 = arith.constant 0 : index
    %60 = tpu.strided_load %arg7[%c0_74, %c0_75, %c0_76] {strides = array<i32: 1, 2, 1>} : memref<16x16x128xf32, #tpu.memory_space<vmem>>, vector<16x8x128xf32>
    %c0_77 = arith.constant 0 : index
    %c1_78 = arith.constant 1 : index
    %c0_79 = arith.constant 0 : index
    %61 = tpu.strided_load %arg7[%c0_77, %c1_78, %c0_79] {strides = array<i32: 1, 2, 1>} : memref<16x16x128xf32, #tpu.memory_space<vmem>>, vector<16x8x128xf32>
    %62 = arith.maximumf %60, %61 : vector<16x8x128xf32>
    %63 = vector.shape_cast %62 : vector<16x8x128xf32> to vector<8x2x8x128xf32>
    %64 = vector.extract_strided_slice %63 {offsets = [0, 0, 0, 0], sizes = [8, 1, 8, 128], strides = [1, 1, 1, 1]} : vector<8x2x8x128xf32> to vector<8x1x8x128xf32>
    %65 = vector.shape_cast %64 : vector<8x1x8x128xf32> to vector<8x8x128xf32>
    %66 = vector.extract_strided_slice %63 {offsets = [0, 1, 0, 0], sizes = [8, 1, 8, 128], strides = [1, 1, 1, 1]} : vector<8x2x8x128xf32> to vector<8x1x8x128xf32>
    %67 = vector.shape_cast %66 : vector<8x1x8x128xf32> to vector<8x8x128xf32>
    %68 = arith.maximumf %65, %67 : vector<8x8x128xf32>
    %c0_80 = arith.constant 0 : index
    %c0_81 = arith.constant 0 : index
    %c0_82 = arith.constant 0 : index
    %c0_83 = arith.constant 0 : index
    %69 = vector.load %arg4[%c0_80, %c0_81, %c0_82, %c0_83] : memref<1x8x8x128xf32, #tpu.memory_space<vmem>>, vector<1x8x8x128xf32>
    %70 = vector.shape_cast %69 : vector<1x8x8x128xf32> to vector<8x8x128xf32>
    %71 = vector.shape_cast %68 : vector<8x8x128xf32> to vector<1x8x8x128xf32>
    tpu.vector_store %arg4[%c0_80, %c0_81, %c0_82, %c0_83], %71 {strides = array<i32>} : memref<1x8x8x128xf32, #tpu.memory_space<vmem>>, vector<1x8x8x128xf32>,
    %cst_84 = arith.constant dense<0.000000e+00> : vector<8x128xf32>
    %72 = vector.multi_reduction <add>, %68, %cst_84 [0] : vector<8x8x128xf32> to vector<8x128xf32>
    %cst_85 = arith.constant dense<0.000000e+00> : vector<128xf32>
    %73 = vector.multi_reduction <add>, %72, %cst_85 [0] : vector<8x128xf32> to vector<128xf32>
    %74 = vector.shape_cast %73 : vector<128xf32> to vector<1x128xf32>
    %c0_86 = arith.constant 0 : index
    %c0_87 = arith.constant 0 : index
    %c0_88 = arith.constant 0 : index
    %75 = vector.load %arg5[%c0_86, %c0_87, %c0_88] : memref<1x1x128xf32, #tpu.memory_space<vmem>>, vector<1x1x128xf32>
    %76 = vector.shape_cast %75 : vector<1x1x128xf32> to vector<1x128xf32>
    %77 = vector.shape_cast %74 : vector<1x128xf32> to vector<1x1x128xf32>
    tpu.vector_store %arg5[%c0_86, %c0_87, %c0_88], %77 {strides = array<i32>} : memref<1x1x128xf32, #tpu.memory_space<vmem>>, vector<1x1x128xf32>,
    %78 = arith.mulf %68, %68 : vector<8x8x128xf32>
    %cst_89 = arith.constant dense<0.000000e+00> : vector<8x128xf32>
    %79 = vector.multi_reduction <add>, %78, %cst_89 [0] : vector<8x8x128xf32> to vector<8x128xf32>
    %cst_90 = arith.constant dense<0.000000e+00> : vector<128xf32>
    %80 = vector.multi_reduction <add>, %79, %cst_90 [0] : vector<8x128xf32> to vector<128xf32>
    %81 = vector.shape_cast %80 : vector<128xf32> to vector<1x128xf32>
    %c0_91 = arith.constant 0 : index
    %c0_92 = arith.constant 0 : index
    %c0_93 = arith.constant 0 : index
    %82 = vector.load %arg6[%c0_91, %c0_92, %c0_93] : memref<1x1x128xf32, #tpu.memory_space<vmem>>, vector<1x1x128xf32>
    %83 = vector.shape_cast %82 : vector<1x1x128xf32> to vector<1x128xf32>
    %84 = vector.shape_cast %81 : vector<1x128xf32> to vector<1x1x128xf32>
    tpu.vector_store %arg6[%c0_91, %c0_92, %c0_93], %84 {strides = array<i32>} : memref<1x1x128xf32, #tpu.memory_space<vmem>>, vector<1x1x128xf32>,
    return
  }
  func.func @transform_0(%arg0: i32) -> (i32, i32, i32, i32) {
    %c0_i32 = arith.constant 0 : i32
    %c0_i32_0 = arith.constant 0 : i32
    %c0_i32_1 = arith.constant 0 : i32
    %c0_i32_2 = arith.constant 0 : i32
    return %arg0, %c0_i32, %c0_i32_0, %c0_i32_1 : i32, i32, i32, i32
  }
  func.func @transform_1(%arg0: i32) -> (i32, i32) {
    %c0_i32 = arith.constant 0 : i32
    %c0_i32_0 = arith.constant 0 : i32
    %c0_i32_1 = arith.constant 0 : i32
    return %c0_i32, %c0_i32_0 : i32, i32
  }
  func.func @transform_2(%arg0: i32) -> (i32, i32) {
    %c0_i32 = arith.constant 0 : i32
    %c0_i32_0 = arith.constant 0 : i32
    %c0_i32_1 = arith.constant 0 : i32
    return %c0_i32, %c0_i32_0 : i32, i32
  }
  func.func @transform_3(%arg0: i32) -> (i32, i32, i32, i32) {
    %c0_i32 = arith.constant 0 : i32
    %c0_i32_0 = arith.constant 0 : i32
    %c0_i32_1 = arith.constant 0 : i32
    %c0_i32_2 = arith.constant 0 : i32
    return %arg0, %c0_i32, %c0_i32_0, %c0_i32_1 : i32, i32, i32, i32
  }
  func.func @transform_4(%arg0: i32) -> (i32, i32, i32) {
    %c0_i32 = arith.constant 0 : i32
    %c0_i32_0 = arith.constant 0 : i32
    %c0_i32_1 = arith.constant 0 : i32
    return %arg0, %c0_i32, %c0_i32_0 : i32, i32, i32
  }
  func.func @transform_5(%arg0: i32) -> (i32, i32, i32) {
    %c0_i32 = arith.constant 0 : i32
    %c0_i32_0 = arith.constant 0 : i32
    %c0_i32_1 = arith.constant 0 : i32
    return %arg0, %c0_i32, %c0_i32_0 : i32, i32, i32
  }
}

</mosaic_0001>

<bundles_post_ra>
// kernel: tpu_custom_call.1
= control target key start
LH: loop header
LB: loop body
LE: loop exit
PB: predicated region body
PF: predicated region fallthrough
CT: control target
= control target key end

     0   :  { %11 = vsyncpa [#allocation5], 0  ;;  %s4990_s0 = inlined_call_operand.vmem [shape: f32[2,16,16,4], index: 0, kind: input, shape index: {}]   ;;  %s4991_s1 = inlined_call_operand.vmem [shape: f32[64,128], index: 1, kind: input, shape index: {}]   ;;  %s4992_s2 = inlined_call_operand.vmem [shape: f32[1,128], index: 2, kind: input, shape index: {}]   ;;  %s4993_s3 = inlined_call_operand.hbm [shape: f32[2,8,8,128], index: 3, kind: output, shape index: {0}]   ;;  %s4994_s4 = inlined_call_operand.hbm [shape: f32[2,1,128], index: 4, kind: output, shape index: {1}]   ;;  %s4995_s5 = inlined_call_operand.hbm [shape: f32[2,1,128], index: 5, kind: output, shape index: {2}]  }
   0x1   :  { %13 = vsyncpa [#allocation5 + $0x1], 0 }
   0x2   :  { %14 = vsyncpa [#allocation7], 0 }
   0x3   :  { %16 = vsyncpa [#allocation7 + $0x1], 0  ;;  %s3249_s18 = smov 0   ;;  %s3251_s19 = smov 0  }
   0x4   :  { %s3253_s20 = smov 0   ;;  %s3255_s21 = smov 0  }
   0x5 LB: > { %s3270_s22 = sadd.s32 4294967295, %s3197_s21   ;;  %s2769_s23 = sadd.s32 4294967294, %s3197_s21   ;;  %s3197_s21 = sphi %s3255_s21, %s5001_s21   ;;  %s3193_s20 = sphi %s3253_s20, %s5000_s20   ;;  %s3189_s19 = sphi %s3251_s19, %s4999_s19   ;;  %s3185_s18 = sphi %s3249_s18, %s4998_s18  }
   0x6   : > { %s3274_s24 = sadd.s32 1, %s3197_s21   ;;  %s97_s25 = sadd.s32 1, %s3193_s20 }
   0x7   : > { %s94_s26 = ssub.s32 %s3197_s21, %s3274_s24  ;;  %p107_p0 = scmp.ne.s32.totalorder %s3193_s20, %s3189_s19 }
   0x8   : > { %p95_p1 = scmp.eq.s32.totalorder %s94_s26, 0  ;;  %p108_p2 = scmp.eq.s32.totalorder %s3270_s22, 1 }
   0x9   : > { %p113_p3 = scmp.ne.s32.totalorder %s3189_s19, %s3185_s18  ;;  %p114_p4 = scmp.eq.s32.totalorder %s2769_s23, 1 }
   0xa   : > { %s3287_s27 = scalar_select %p95_p1, %s3193_s20, %s97_s25  }
   0xb   : > { %p3289_p5 = por %p108_p2, %p107_p0  ;;  %p3293_p6 = por %p114_p4, %p113_p3 }
   0xc   : > { %p2772_p7 = scmp.ge.s32.totalorder %s3197_s21, 1  ;;  %p198_p8 = scmp.lt.s32.totalorder %s3197_s21, 3 }
   0xe   : > { %p199_p9 = pnand %p2772_p7, %p198_p8 }
   0xf   : > { %p234_p10 = scmp.lt.s32.totalorder (!%p199_p9), %s3270_s22, 1  ;;  %vm240_vm0 = vcmask (!%p199_p9), 523264   ;;  %v3199_v0 = vmov (!%p199_p9), 0.0   ;;  %vm332_vm1 = vcmask (!%p199_p9), 31744   ;;  %vm334_vm2 = vcmask (!%p199_p9), 28672   ;;  %s3200_s10 = smov (!%p199_p9), 4  }
  0x10   : > { %202 = sbr.rel (%p199_p9) target bundleno = 1219 (0x4c3), region = 32  ;;  %243 = vst.msk [vmem:[#allocation3 + $0x10] sm:$0xff] (!%p199_p9), %vm240_vm0, %v3199_v0  ;;  %241 = vst.msk [vmem:[#allocation3] sm:$0xff] (!%p199_p9), %vm240_vm0, %v3199_v0  ;;  %s3201_s11 = smov (!%p199_p9), 8   ;;  %vm464_vm3 = vcmask (!%p199_p9), 64545   ;;  %vm466_vm4 = vcmask (!%p199_p9), 62496  }
  0x11   : > { %242 = vst.msk [vmem:[#allocation3 + $0x8] sm:$0xff] (!%p199_p9), %vm240_vm0, %v3199_v0  ;;  %244 = vst.msk [vmem:[#allocation3 + $0x18] sm:$0xff] (!%p199_p9), %vm240_vm0, %v3199_v0  ;;  %s3202_s12 = smov (!%p199_p9), 12   ;;  %s3203_s13 = smov (!%p199_p9), 16   ;;  %vm572_vm5 = vcmask (!%p199_p9), 96320   ;;  %vm570_vm6 = vcmask (!%p199_p9), 97346  }
  0x12   : > { %245 = vst.msk [vmem:[#allocation3 + $0x20] sm:$0xff] (!%p199_p9), %vm240_vm0, %v3199_v0  ;;  %246 = vst.msk [vmem:[#allocation3 + $0x28] sm:$0xff] (!%p199_p9), %vm240_vm0, %v3199_v0  ;;  %s3204_s14 = smov (!%p199_p9), 20   ;;  %vm678_vm7 = vcmask (!%p199_p9), 130144   ;;  %vm676_vm8 = vcmask (!%p199_p9), 130147   ;;  %s3205_s15 = smov (!%p199_p9), 24  }
  0x13   : > { %247 = vst.msk [vmem:[#allocation3 + $0x30] sm:$0xff] (!%p199_p9), %vm240_vm0, %v3199_v0  ;;  %248 = vst.msk [vmem:[#allocation3 + $0x38] sm:$0xff] (!%p199_p9), %vm240_vm0, %v3199_v0  ;;  %vm837_vm9 = vcmask (!%p199_p9), 159872   ;;  %vm835_vm10 = vcmask (!%p199_p9), 162944   ;;  %s3206_s16 = smov (!%p199_p9), 28   ;;  %vm943_vm11 = vcmask (!%p199_p9), 193696  }
  0x14   : > { %249 = vst.msk [vmem:[#allocation3 + $0x40] sm:$0xff] (!%p199_p9), %vm240_vm0, %v3199_v0  ;;  %250 = vst.msk [vmem:[#allocation3 + $0x48] sm:$0xff] (!%p199_p9), %vm240_vm0, %v3199_v0  ;;  %vm941_vm12 = vcmask (!%p199_p9), 195745   ;;  %s3207_s17 = smov (!%p199_p9), 32   ;;  %vm1049_vm13 = vcmask (!%p199_p9), 227520   ;;  %vm1047_vm14 = vcmask (!%p199_p9), 228546  }
  0x15   : > { %251 = vst.msk [vmem:[#allocation3 + $0x50] sm:$0xff] (!%p199_p9), %vm240_vm0, %v3199_v0  ;;  %252 = vst.msk [vmem:[#allocation3 + $0x58] sm:$0xff] (!%p199_p9), %vm240_vm0, %v3199_v0  ;;  %s3208_s25 = smov (!%p199_p9), 36   ;;  %vm1155_vm15 = vcmask (!%p199_p9), 261344   ;;  %s3209_s26 = smov (!%p199_p9), 40  }
  0x16   : > { %253 = vst.msk [vmem:[#allocation3 + $0x60] sm:$0xff] (!%p199_p9), %vm240_vm0, %v3199_v0  ;;  %254 = vst.msk [vmem:[#allocation3 + $0x68] sm:$0xff] (!%p199_p9), %vm240_vm0, %v3199_v0  ;;  %s3214_s8 = smov (!%p199_p9), 60   ;;  %s3215_s7 = smov (!%p199_p9), [#allocation4]  }
  0x17   : > { %255 = vst.msk [vmem:[#allocation3 + $0x70] sm:$0xff] %vm240_vm0, %v3199_v0  ;;  %256 = vst.msk [vmem:[#allocation3 + $0x78] sm:$0xff] %vm240_vm0, %v3199_v0  ;;  %s235_s30 = scalar_select %p234_p10, %s3270_s22, 1 }
  0x18   : > { %257 = vst.msk [vmem:[#allocation3 + $0x80] sm:$0xff] %vm240_vm0, %v3199_v0  ;;  %258 = vst.msk [vmem:[#allocation3 + $0x88] sm:$0xff] %vm240_vm0, %v3199_v0 }
  0x19   : > { %259 = vst.msk [vmem:[#allocation3 + $0x90] sm:$0xff] %vm240_vm0, %v3199_v0  ;;  %260 = vst.msk [vmem:[#allocation3 + $0x98] sm:$0xff] %vm240_vm0, %v3199_v0  ;;  %s2888_s6 = sshll.u32 %s235_s30, 8  ;;  %s3210_s30 = smov 44  }
  0x1a   : > { %261 = vst.msk [vmem:[#allocation3 + $0xa0] sm:$0xff] %vm240_vm0, %v3199_v0  ;;  %262 = vst.msk [vmem:[#allocation3 + $0xa8] sm:$0xff] %vm240_vm0, %v3199_v0  ;;  %s3396_s9 = scalar_lea.vmem %s4990_s0, %s2888_s6  ;;  %s3211_s6 = smov 48  }
  0x1b   : > { %263 = vst.msk [vmem:[#allocation3 + $0xb0] sm:$0xff] %vm240_vm0, %v3199_v0  ;;  %264 = vst.msk [vmem:[#allocation3 + $0xb8] sm:$0xff] %vm240_vm0, %v3199_v0  ;;  %v3399_v1 = vld [vmem:[%s3396_s9 + $0x10] sm:$0xff]  ;;  %v3402_v2 = vld [vmem:[%s3396_s9] sm:$0xff] }
  0x1c   : > { %265 = vst.msk [vmem:[#allocation3 + $0xc0] sm:$0xff] %vm240_vm0, %v3199_v0  ;;  %266 = vst.msk [vmem:[#allocation3 + $0xc8] sm:$0xff] %vm240_vm0, %v3199_v0  ;;  %v3405_v3 = vld [vmem:[%s3396_s9 + $0x18] sm:$0xff]  ;;  %390 = vrot.lane.b32.xlu1 %v3399_v1, %s3200_s10  ;;  %386 = vrot.lane.b32.xlu0 %v3402_v2, %s3200_s10  ;;  %v3412_v4 = vld [vmem:[%s3396_s9 + $0x8] sm:$0xff] }
  0x1d   : > { %267 = vst [vmem:[#allocation2] sm:$0xff] %v3199_v0  ;;  %268 = vst [vmem:[#allocation2 + $0x8] sm:$0xff] %v3199_v0  ;;  %v3415_v5 = vld [vmem:[%s3396_s9 + $0x28] sm:$0xff]  ;;  %v3424_v6 = vld [vmem:[%s3396_s9 + $0x20] sm:$0xff] }
  0x1e   : > { %269 = vst [vmem:[#allocation2 + $0x10] sm:$0xff] %v3199_v0  ;;  %270 = vst [vmem:[#allocation2 + $0x18] sm:$0xff] %v3199_v0  ;;  %v3427_v7 = vld [vmem:[%s3396_s9 + $0x38] sm:$0xff]  ;;  %v3430_v8 = vld [vmem:[%s3396_s9 + $0x30] sm:$0xff] }
  0x1f   : > { %273 = vst [vmem:[#allocation2 + $0x20] sm:$0x3] %v3199_v0  ;;  %274 = vst [vmem:[#allocation2 + $0x30] sm:$0x3] %v3199_v0  ;;  %v3437_v9 = vld [vmem:[%s3396_s9 + $0x48] sm:$0xff]  ;;  %v3440_v10 = vld [vmem:[%s3396_s9 + $0x40] sm:$0xff] }
  0x20   : > { %275 = vst [vmem:[#allocation2 + $0x40] sm:$0x3] %v3199_v0  ;;  %276 = vst [vmem:[#allocation2 + $0x50] sm:$0x3] %v3199_v0  ;;  %v3443_v11 = vld [vmem:[%s3396_s9 + $0x58] sm:$0xff]  ;;  %v3452_v12 = vld [vmem:[%s3396_s9 + $0x50] sm:$0xff]  ;;  %392 = vrot.lane.b32.xlu1 %v3405_v3, %s3200_s10  ;;  %388 = vrot.lane.b32.xlu0 %v3412_v4, %s3200_s10 }
  0x21   : > { %277 = vst [vmem:[#allocation2 + $0x60] sm:$0x3] %v3199_v0  ;;  %278 = vst [vmem:[#allocation2 + $0x70] sm:$0x3] %v3199_v0  ;;  %v3455_v13 = vld [vmem:[%s3396_s9 + $0x68] sm:$0xff]  ;;  %v3458_v14 = vld [vmem:[%s3396_s9 + $0x60] sm:$0xff] }
  0x22   : > { %279 = vst [vmem:[#allocation2 + $0x80] sm:$0x3] %v3199_v0  ;;  %280 = vst [vmem:[#allocation2 + $0x90] sm:$0x3] %v3199_v0  ;;  %v3471_v15 = vld [vmem:[%s3396_s9 + $0x78] sm:$0xff]  ;;  %v3474_v16 = vld [vmem:[%s3396_s9 + $0x70] sm:$0xff] }
  0x23   : > { %281 = vst [vmem:[#allocation2 + $0xa0] sm:$0x3] %v3199_v0  ;;  %282 = vst [vmem:[#allocation2 + $0xb0] sm:$0x3] %v3199_v0  ;;  %v3483_v17 = vld [vmem:[%s3396_s9 + $0x88] sm:$0xff]  ;;  %v3486_v18 = vld [vmem:[%s3396_s9 + $0x80] sm:$0xff] }
  0x24   : > { %283 = vst [vmem:[#allocation2 + $0xc0] sm:$0x3] %v3199_v0  ;;  %284 = vst [vmem:[#allocation2 + $0xd0] sm:$0x3] %v3199_v0  ;;  %v3489_v19 = vld [vmem:[%s3396_s9 + $0x98] sm:$0xff]  ;;  %v3496_v20 = vld [vmem:[%s3396_s9 + $0x90] sm:$0xff]  ;;  %396 = vrot.lane.b32.xlu1 %v3415_v5, %s3200_s10  ;;  %394 = vrot.lane.b32.xlu0 %v3424_v6, %s3200_s10 }
  0x25   : > { %285 = vst [vmem:[#allocation2 + $0xe0] sm:$0x3] %v3199_v0  ;;  %286 = vst [vmem:[#allocation2 + $0xf0] sm:$0x3] %v3199_v0  ;;  %v3499_v21 = vld [vmem:[%s3396_s9 + $0xa8] sm:$0xff]  ;;  %v3502_v22 = vld [vmem:[%s3396_s9 + $0xa0] sm:$0xff] }
  0x26   : > { %289 = vst [vmem:[#allocation2 + $0xf8] sm:$0xff] %v3199_v0  ;;  %292 = vst [vmem:[#allocation2 + $0x2f] sm:$0x1] %v3199_v0  ;;  %v3511_v23 = vld [vmem:[%s3396_s9 + $0xb8] sm:$0xff]  ;;  %v3514_v24 = vld [vmem:[%s3396_s9 + $0xb0] sm:$0xff] }
  0x27   : > { %293 = vst [vmem:[#allocation2 + $0x3f] sm:$0x1] %v3199_v0  ;;  %294 = vst [vmem:[#allocation2 + $0x4f] sm:$0x1] %v3199_v0  ;;  %v3517_v25 = vld [vmem:[%s3396_s9 + $0xc8] sm:$0xff]  ;;  %v3530_v26 = vld [vmem:[%s3396_s9 + $0xc0] sm:$0xff] }
  0x28   : > { %295 = vst [vmem:[#allocation2 + $0x5f] sm:$0x1] %v3199_v0  ;;  %296 = vst [vmem:[#allocation2 + $0x6f] sm:$0x1] %v3199_v0  ;;  %400 = vrot.lane.b32.xlu1 %v3427_v7, %s3200_s10  ;;  %398 = vrot.lane.b32.xlu0 %v3430_v8, %s3200_s10 }
  0x29   : > { %297 = vst [vmem:[#allocation2 + $0x7f] sm:$0x1] %v3199_v0  ;;  %298 = vst [vmem:[#allocation2 + $0x8f] sm:$0x1] %v3199_v0 }
  0x2a   : > { %299 = vst [vmem:[#allocation2 + $0x9f] sm:$0x1] %v3199_v0  ;;  %300 = vst [vmem:[#allocation2 + $0xaf] sm:$0x1] %v3199_v0 }
  0x2b   : > { %301 = vst [vmem:[#allocation2 + $0xbf] sm:$0x1] %v3199_v0  ;;  %302 = vst [vmem:[#allocation2 + $0xcf] sm:$0x1] %v3199_v0 }
  0x2c   : > { %303 = vst [vmem:[#allocation2 + $0xdf] sm:$0x1] %v3199_v0  ;;  %304 = vst [vmem:[#allocation2 + $0xef] sm:$0x1] %v3199_v0  ;;  %404 = vrot.lane.b32.xlu1 %v3437_v9, %s3200_s10  ;;  %402 = vrot.lane.b32.xlu0 %v3440_v10, %s3200_s10 }
  0x2d   : > { %271 = vst [vmem:[#allocation2] sm:$0x3] %v3199_v0  ;;  %272 = vst [vmem:[#allocation2 + $0x10] sm:$0x3] %v3199_v0 }
  0x2e   : > { %288 = vst [vmem:[#allocation2 + $0xf0] sm:$0xff] %v3199_v0  ;;  %290 = vst [vmem:[#allocation2 + $0xf] sm:$0x1] %v3199_v0 }
  0x2f   : > { %291 = vst [vmem:[#allocation2 + $0x1f] sm:$0x1] %v3199_v0  ;;  %305 = vst [vmem:[#allocation2 + $0xff] sm:$0x1] %v3199_v0 }
  0x30   : > { %336 = vst.msk [vmem:[#allocation3 + $0x10] sm:$0xff] %vm332_vm1, %v3399_v1  ;;  %333 = vst.msk [vmem:[#allocation3] sm:$0xff] %vm332_vm1, %v3402_v2  ;;  %408 = vrot.lane.b32.xlu1 %v3443_v11, %s3200_s10  ;;  %406 = vrot.lane.b32.xlu0 %v3452_v12, %s3200_s10 }
  0x31   : > { %337 = vst.msk [vmem:[#allocation3 + $0x18] sm:$0x1f] %vm334_vm2, %v3405_v3  ;;  %335 = vst.msk [vmem:[#allocation3 + $0x8] sm:$0x1f] %vm334_vm2, %v3412_v4 }
  0x32   : > { %339 = vst.msk [vmem:[#allocation3 + $0x28] sm:$0x1f] %vm334_vm2, %v3415_v5  ;;  %341 = vst.msk [vmem:[#allocation3 + $0x38] sm:$0x1f] %vm334_vm2, %v3427_v7 }
  0x33   : > { %338 = vst.msk [vmem:[#allocation3 + $0x20] sm:$0xff] %vm332_vm1, %v3424_v6  ;;  %340 = vst.msk [vmem:[#allocation3 + $0x30] sm:$0xff] %vm332_vm1, %v3430_v8 }
  0x34   : > { %342 = vst.msk [vmem:[#allocation3 + $0x40] sm:$0xff] %vm332_vm1, %v3440_v10  ;;  %344 = vst.msk [vmem:[#allocation3 + $0x50] sm:$0xff] %vm332_vm1, %v3452_v12  ;;  %412 = vrot.lane.b32.xlu1 %v3455_v13, %s3200_s10  ;;  %410 = vrot.lane.b32.xlu0 %v3458_v14, %s3200_s10 }
  0x35   : > { %343 = vst.msk [vmem:[#allocation3 + $0x48] sm:$0x1f] %vm334_vm2, %v3437_v9  ;;  %345 = vst.msk [vmem:[#allocation3 + $0x58] sm:$0x1f] %vm334_vm2, %v3443_v11 }
  0x36   : > { %346 = vst.msk [vmem:[#allocation3 + $0x60] sm:$0xff] %vm332_vm1, %v3458_v14  ;;  %348 = vst.msk [vmem:[#allocation3 + $0x70] sm:$0xff] %vm332_vm1, %v3474_v16 }
  0x37   : > { %347 = vst.msk [vmem:[#allocation3 + $0x68] sm:$0x1f] %vm334_vm2, %v3455_v13  ;;  %349 = vst.msk [vmem:[#allocation3 + $0x78] sm:$0x1f] %vm334_vm2, %v3471_v15 }
  0x38   : > { %350 = vst.msk [vmem:[#allocation3 + $0x80] sm:$0xff] %vm332_vm1, %v3486_v18  ;;  %352 = vst.msk [vmem:[#allocation3 + $0x90] sm:$0xff] %vm332_vm1, %v3496_v20  ;;  %416 = vrot.lane.b32.xlu1 %v3471_v15, %s3200_s10  ;;  %414 = vrot.lane.b32.xlu0 %v3474_v16, %s3200_s10 }
  0x39   : > { %351 = vst.msk [vmem:[#allocation3 + $0x88] sm:$0x1f] %vm334_vm2, %v3483_v17  ;;  %353 = vst.msk [vmem:[#allocation3 + $0x98] sm:$0x1f] %vm334_vm2, %v3489_v19 }
  0x3a   : > { %354 = vst.msk [vmem:[#allocation3 + $0xa0] sm:$0xff] %vm332_vm1, %v3502_v22  ;;  %356 = vst.msk [vmem:[#allocation3 + $0xb0] sm:$0xff] %vm332_vm1, %v3514_v24 }
  0x3b   : > { %355 = vst.msk [vmem:[#allocation3 + $0xa8] sm:$0x1f] %vm334_vm2, %v3499_v21  ;;  %357 = vst.msk [vmem:[#allocation3 + $0xb8] sm:$0x1f] %vm334_vm2, %v3511_v23 }
  0x3c   : > { %359 = vst.msk [vmem:[#allocation3 + $0xc8] sm:$0x1f] %vm334_vm2, %v3517_v25  ;;  %420 = vrot.lane.b32.xlu1 %v3483_v17, %s3200_s10  ;;  %418 = vrot.lane.b32.xlu0 %v3486_v18, %s3200_s10  ;;  %vm1314_vm2 = vcmask 291072  }
  0x3d   : > { %358 = vst.msk [vmem:[#allocation3 + $0xc0] sm:$0xff] %vm332_vm1, %v3530_v26  ;;  %vm1153_vm1 = vcmask 261347  }
  0x40   : > { %424 = vrot.lane.b32.xlu1 %v3489_v19, %s3200_s10  ;;  %422 = vrot.lane.b32.xlu0 %v3496_v20, %s3200_s10 }
  0x44   : > { %428 = vrot.lane.b32.xlu1 %v3499_v21, %s3200_s10  ;;  %426 = vrot.lane.b32.xlu0 %v3502_v22, %s3200_s10 }
  0x48   : > { %432 = vrot.lane.b32.xlu1 %v3511_v23, %s3200_s10  ;;  %430 = vrot.lane.b32.xlu0 %v3514_v24, %s3200_s10 }
  0x4c   : > { %436 = vrot.lane.b32.xlu1 %v3517_v25, %s3200_s10  ;;  %434 = vrot.lane.b32.xlu0 %v3530_v26, %s3200_s10  ;;  %s4655_s10 = sand.u32 1, %s3189_s19  }
  0x50   : > { %494 = vrot.lane.b32.xlu1 %v3412_v4, %s3201_s11  ;;  %492 = vrot.lane.b32.xlu0 %v3402_v2, %s3201_s11 }
  0x54   : > { %498 = vrot.lane.b32.xlu1 %v3405_v3, %s3201_s11  ;;  %496 = vrot.lane.b32.xlu0 %v3399_v1, %s3201_s11 }
  0x58   : > { %502 = vrot.lane.b32.xlu1 %v3415_v5, %s3201_s11  ;;  %500 = vrot.lane.b32.xlu0 %v3424_v6, %s3201_s11 }
  0x5c   : > { %506 = vrot.lane.b32.xlu1 %v3427_v7, %s3201_s11  ;;  %504 = vrot.lane.b32.xlu0 %v3430_v8, %s3201_s11 }
  0x60   : > { %510 = vrot.lane.b32.xlu1 %v3437_v9, %s3201_s11  ;;  %508 = vrot.lane.b32.xlu0 %v3440_v10, %s3201_s11 }
  0x64   : > { %514 = vrot.lane.b32.xlu1 %v3443_v11, %s3201_s11  ;;  %512 = vrot.lane.b32.xlu0 %v3452_v12, %s3201_s11 }
  0x68   : > { %518 = vrot.lane.b32.xlu1 %v3455_v13, %s3201_s11  ;;  %516 = vrot.lane.b32.xlu0 %v3458_v14, %s3201_s11 }
  0x6c   : > { %522 = vrot.lane.b32.xlu1 %v3471_v15, %s3201_s11  ;;  %520 = vrot.lane.b32.xlu0 %v3474_v16, %s3201_s11 }
  0x70   : > { %526 = vrot.lane.b32.xlu1 %v3483_v17, %s3201_s11  ;;  %524 = vrot.lane.b32.xlu0 %v3486_v18, %s3201_s11 }
  0x74   : > { %530 = vrot.lane.b32.xlu1 %v3489_v19, %s3201_s11  ;;  %528 = vrot.lane.b32.xlu0 %v3496_v20, %s3201_s11 }
  0x78   : > { %534 = vrot.lane.b32.xlu1 %v3499_v21, %s3201_s11  ;;  %532 = vrot.lane.b32.xlu0 %v3502_v22, %s3201_s11 }
  0x7c   : > { %538 = vrot.lane.b32.xlu1 %v3511_v23, %s3201_s11  ;;  %536 = vrot.lane.b32.xlu0 %v3514_v24, %s3201_s11 }
  0x80   : > { %542 = vrot.lane.b32.xlu1 %v3517_v25, %s3201_s11  ;;  %540 = vrot.lane.b32.xlu0 %v3530_v26, %s3201_s11 }
  0x84   : > { %600 = vrot.lane.b32.xlu1 %v3412_v4, %s3202_s12  ;;  %598 = vrot.lane.b32.xlu0 %v3402_v2, %s3202_s12 }
  0x88   : > { %604 = vrot.lane.b32.xlu1 %v3405_v3, %s3202_s12  ;;  %602 = vrot.lane.b32.xlu0 %v3399_v1, %s3202_s12 }
  0x8c   : > { %608 = vrot.lane.b32.xlu1 %v3415_v5, %s3202_s12  ;;  %606 = vrot.lane.b32.xlu0 %v3424_v6, %s3202_s12 }
  0x8e   : > { %v391_v27 = vpop.permute.xlu1 %390  ;;  %v387_v28 = vpop.permute.xlu0 %386 }
  0x8f   : > { %468 = vst.msk [vmem:[#allocation3 + $0xf] sm:$0xfe] %vm464_vm3, %v391_v27  ;;  %465 = vst.msk [vmem:[#allocation3 - $0x1] sm:$0xfe] %vm464_vm3, %v387_v28 }
  0x90   : > { %612 = vrot.lane.b32.xlu1 %v3427_v7, %s3202_s12  ;;  %610 = vrot.lane.b32.xlu0 %v3430_v8, %s3202_s12 }
  0x92   : > { %v393_v29 = vpop.permute.xlu1 %392  ;;  %v389_v30 = vpop.permute.xlu0 %388 }
  0x93   : > { %469 = vst.msk [vmem:[#allocation3 + $0x17] sm:$0x3f] %vm466_vm4, %v393_v29  ;;  %467 = vst.msk [vmem:[#allocation3 + $0x7] sm:$0x3f] %vm466_vm4, %v389_v30 }
  0x94   : > { %616 = vrot.lane.b32.xlu1 %v3437_v9, %s3202_s12  ;;  %614 = vrot.lane.b32.xlu0 %v3440_v10, %s3202_s12 }
  0x96   : > { %v397_v31 = vpop.permute.xlu1 %396  ;;  %v395_v32 = vpop.permute.xlu0 %394 }
  0x97   : > { %471 = vst.msk [vmem:[#allocation3 + $0x27] sm:$0x3f] %vm466_vm4, %v397_v31  ;;  %v3777_v31 = vld [vmem:[%s3396_s9 + $0xd8] sm:$0xff] }
  0x98   : > { %470 = vst.msk [vmem:[#allocation3 + $0x1f] sm:$0xfe] %vm464_vm3, %v395_v32  ;;  %620 = vrot.lane.b32.xlu1 %v3443_v11, %s3202_s12  ;;  %618 = vrot.lane.b32.xlu0 %v3452_v12, %s3202_s12  ;;  %v3780_v32 = vld [vmem:[%s3396_s9 + $0xd0] sm:$0xff] }
  0x9a   : > { %v401_v33 = vpop.permute.xlu1 %400  ;;  %v399_v34 = vpop.permute.xlu0 %398 }
  0x9b   : > { %473 = vst.msk [vmem:[#allocation3 + $0x37] sm:$0x3f] %vm466_vm4, %v401_v33 }
  0x9c   : > { %472 = vst.msk [vmem:[#allocation3 + $0x2f] sm:$0xfe] %vm464_vm3, %v399_v34  ;;  %624 = vrot.lane.b32.xlu1 %v3455_v13, %s3202_s12  ;;  %622 = vrot.lane.b32.xlu0 %v3458_v14, %s3202_s12 }
  0x9e   : > { %v405_v35 = vpop.permute.xlu1 %404  ;;  %v403_v36 = vpop.permute.xlu0 %402 }
  0x9f   : > { %475 = vst.msk [vmem:[#allocation3 + $0x47] sm:$0x3f] %vm466_vm4, %v405_v35 }
  0xa0   : > { %474 = vst.msk [vmem:[#allocation3 + $0x3f] sm:$0xfe] %vm464_vm3, %v403_v36  ;;  %628 = vrot.lane.b32.xlu1 %v3471_v15, %s3202_s12  ;;  %626 = vrot.lane.b32.xlu0 %v3474_v16, %s3202_s12 }
  0xa2   : > { %v409_v37 = vpop.permute.xlu1 %408  ;;  %v407_v38 = vpop.permute.xlu0 %406 }
  0xa3   : > { %477 = vst.msk [vmem:[#allocation3 + $0x57] sm:$0x3f] %vm466_vm4, %v409_v37 }
  0xa4   : > { %476 = vst.msk [vmem:[#allocation3 + $0x4f] sm:$0xfe] %vm464_vm3, %v407_v38  ;;  %632 = vrot.lane.b32.xlu1 %v3483_v17, %s3202_s12  ;;  %630 = vrot.lane.b32.xlu0 %v3486_v18, %s3202_s12 }
  0xa6   : > { %v413_v39 = vpop.permute.xlu1 %412  ;;  %v411_v40 = vpop.permute.xlu0 %410 }
  0xa7   : > { %479 = vst.msk [vmem:[#allocation3 + $0x67] sm:$0x3f] %vm466_vm4, %v413_v39 }
  0xa8   : > { %478 = vst.msk [vmem:[#allocation3 + $0x5f] sm:$0xfe] %vm464_vm3, %v411_v40  ;;  %636 = vrot.lane.b32.xlu1 %v3489_v19, %s3202_s12  ;;  %634 = vrot.lane.b32.xlu0 %v3496_v20, %s3202_s12 }
  0xaa   : > { %v417_v41 = vpop.permute.xlu1 %416  ;;  %v415_v42 = vpop.permute.xlu0 %414 }
  0xab   : > { %481 = vst.msk [vmem:[#allocation3 + $0x77] sm:$0x3f] %vm466_vm4, %v417_v41 }
  0xac   : > { %480 = vst.msk [vmem:[#allocation3 + $0x6f] sm:$0xfe] %vm464_vm3, %v415_v42  ;;  %640 = vrot.lane.b32.xlu1 %v3499_v21, %s3202_s12  ;;  %638 = vrot.lane.b32.xlu0 %v3502_v22, %s3202_s12 }
  0xae   : > { %v421_v43 = vpop.permute.xlu1 %420  ;;  %v419_v44 = vpop.permute.xlu0 %418 }
  0xaf   : > { %483 = vst.msk [vmem:[#allocation3 + $0x87] sm:$0x3f] %vm466_vm4, %v421_v43 }
  0xb0   : > { %482 = vst.msk [vmem:[#allocation3 + $0x7f] sm:$0xfe] %vm464_vm3, %v419_v44  ;;  %644 = vrot.lane.b32.xlu1 %v3511_v23, %s3202_s12  ;;  %642 = vrot.lane.b32.xlu0 %v3514_v24, %s3202_s12 }
  0xb2   : > { %v425_v45 = vpop.permute.xlu1 %424  ;;  %v423_v46 = vpop.permute.xlu0 %422 }
  0xb3   : > { %485 = vst.msk [vmem:[#allocation3 + $0x97] sm:$0x3f] %vm466_vm4, %v425_v45 }
  0xb4   : > { %484 = vst.msk [vmem:[#allocation3 + $0x8f] sm:$0xfe] %vm464_vm3, %v423_v46  ;;  %648 = vrot.lane.b32.xlu1 %v3517_v25, %s3202_s12  ;;  %646 = vrot.lane.b32.xlu0 %v3530_v26, %s3202_s12  ;;  %s2773_s12 = sshll.u32 %s4655_s10, 6 }
  0xb6   : > { %v429_v47 = vpop.permute.xlu1 %428  ;;  %v427_v48 = vpop.permute.xlu0 %426 }
  0xb7   : > { %487 = vst.msk [vmem:[#allocation3 + $0xa7] sm:$0x3f] %vm466_vm4, %v429_v47 }
  0xb8   : > { %486 = vst.msk [vmem:[#allocation3 + $0x9f] sm:$0xfe] %vm464_vm3, %v427_v48  ;;  %759 = vrot.lane.b32.xlu1 %v3405_v3, %s3203_s13  ;;  %757 = vrot.lane.b32.xlu0 %v3399_v1, %s3203_s13 }
  0xba   : > { %v433_v49 = vpop.permute.xlu1 %432  ;;  %v431_v50 = vpop.permute.xlu0 %430 }
  0xbb   : > { %489 = vst.msk [vmem:[#allocation3 + $0xb7] sm:$0x3f] %vm466_vm4, %v433_v49 }
  0xbc   : > { %488 = vst.msk [vmem:[#allocation3 + $0xaf] sm:$0xfe] %vm464_vm3, %v431_v50  ;;  %763 = vrot.lane.b32.xlu1 %v3415_v5, %s3203_s13  ;;  %761 = vrot.lane.b32.xlu0 %v3424_v6, %s3203_s13 }
  0xbe   : > { %v437_v51 = vpop.permute.xlu1 %436  ;;  %v435_v52 = vpop.permute.xlu0 %434 }
  0xbf   : > { %491 = vst.msk [vmem:[#allocation3 + $0xc7] sm:$0x3f] %vm466_vm4, %v437_v51  ;;  %vm1420_vm4 = vcmask 324896  }
  0xc0   : > { %490 = vst.msk [vmem:[#allocation3 + $0xbf] sm:$0xfe] %vm464_vm3, %v435_v52  ;;  %767 = vrot.lane.b32.xlu1 %v3427_v7, %s3203_s13  ;;  %765 = vrot.lane.b32.xlu0 %v3430_v8, %s3203_s13  ;;  %vm1312_vm3 = vcmask 294144  }
  0xc2   : > { %v495_v53 = vpop.permute.xlu1 %494  ;;  %v493_v54 = vpop.permute.xlu0 %492 }
  0xc3   : > { %573 = vst.msk [vmem:[#allocation3 + $0x6] sm:$0x7f] %vm572_vm5, %v495_v53 }
  0xc4   : > { %571 = vst.msk [vmem:[#allocation3 - $0x2] sm:$0xfc] %vm570_vm6, %v493_v54  ;;  %771 = vrot.lane.b32.xlu1 %v3437_v9, %s3203_s13  ;;  %769 = vrot.lane.b32.xlu0 %v3440_v10, %s3203_s13 }
  0xc6   : > { %v499_v55 = vpop.permute.xlu1 %498  ;;  %v497_v56 = vpop.permute.xlu0 %496 }
  0xc7   : > { %575 = vst.msk [vmem:[#allocation3 + $0x16] sm:$0x7f] %vm572_vm5, %v499_v55 }
  0xc8   : > { %574 = vst.msk [vmem:[#allocation3 + $0xe] sm:$0xfc] %vm570_vm6, %v497_v56  ;;  %775 = vrot.lane.b32.xlu1 %v3443_v11, %s3203_s13  ;;  %773 = vrot.lane.b32.xlu0 %v3452_v12, %s3203_s13 }
  0xca   : > { %v503_v57 = vpop.permute.xlu1 %502  ;;  %v501_v58 = vpop.permute.xlu0 %500 }
  0xcb   : > { %577 = vst.msk [vmem:[#allocation3 + $0x26] sm:$0x7f] %vm572_vm5, %v503_v57 }
  0xcc   : > { %576 = vst.msk [vmem:[#allocation3 + $0x1e] sm:$0xfc] %vm570_vm6, %v501_v58  ;;  %779 = vrot.lane.b32.xlu1 %v3455_v13, %s3203_s13  ;;  %777 = vrot.lane.b32.xlu0 %v3458_v14, %s3203_s13 }
  0xce   : > { %v507_v59 = vpop.permute.xlu1 %506  ;;  %v505_v60 = vpop.permute.xlu0 %504 }
  0xcf   : > { %579 = vst.msk [vmem:[#allocation3 + $0x36] sm:$0x7f] %vm572_vm5, %v507_v59 }
  0xd0   : > { %578 = vst.msk [vmem:[#allocation3 + $0x2e] sm:$0xfc] %vm570_vm6, %v505_v60  ;;  %783 = vrot.lane.b32.xlu1 %v3471_v15, %s3203_s13  ;;  %781 = vrot.lane.b32.xlu0 %v3474_v16, %s3203_s13 }
  0xd2   : > { %v511_v61 = vpop.permute.xlu1 %510  ;;  %v509_v62 = vpop.permute.xlu0 %508 }
  0xd3   : > { %581 = vst.msk [vmem:[#allocation3 + $0x46] sm:$0x7f] %vm572_vm5, %v511_v61 }
  0xd4   : > { %580 = vst.msk [vmem:[#allocation3 + $0x3e] sm:$0xfc] %vm570_vm6, %v509_v62  ;;  %787 = vrot.lane.b32.xlu1 %v3483_v17, %s3203_s13  ;;  %785 = vrot.lane.b32.xlu0 %v3486_v18, %s3203_s13 }
  0xd6   : > { %v515_v63 = vpop.permute.xlu1 %514  ;;  %v513_v0 = vpop.permute.xlu0 %512 }
  0xd7   : > { %583 = vst.msk [vmem:[#allocation3 + $0x56] sm:$0x7f] %vm572_vm5, %v515_v63 }
  0xd8   : > { %582 = vst.msk [vmem:[#allocation3 + $0x4e] sm:$0xfc] %vm570_vm6, %v513_v0  ;;  %791 = vrot.lane.b32.xlu1 %v3489_v19, %s3203_s13  ;;  %789 = vrot.lane.b32.xlu0 %v3496_v20, %s3203_s13 }
  0xda   : > { %v519_v2 = vpop.permute.xlu1 %518  ;;  %v517_v4 = vpop.permute.xlu0 %516 }
  0xdb   : > { %585 = vst.msk [vmem:[#allocation3 + $0x66] sm:$0x7f] %vm572_vm5, %v519_v2 }
  0xdc   : > { %584 = vst.msk [vmem:[#allocation3 + $0x5e] sm:$0xfc] %vm570_vm6, %v517_v4  ;;  %795 = vrot.lane.b32.xlu1 %v3499_v21, %s3203_s13  ;;  %793 = vrot.lane.b32.xlu0 %v3502_v22, %s3203_s13 }
  0xde   : > { %v523_v27 = vpop.permute.xlu1 %522  ;;  %v521_v28 = vpop.permute.xlu0 %520 }
  0xdf   : > { %587 = vst.msk [vmem:[#allocation3 + $0x76] sm:$0x7f] %vm572_vm5, %v523_v27 }
  0xe0   : > { %586 = vst.msk [vmem:[#allocation3 + $0x6e] sm:$0xfc] %vm570_vm6, %v521_v28  ;;  %799 = vrot.lane.b32.xlu1 %v3511_v23, %s3203_s13  ;;  %797 = vrot.lane.b32.xlu0 %v3514_v24, %s3203_s13 }
  0xe2   : > { %v527_v29 = vpop.permute.xlu1 %526  ;;  %v525_v30 = vpop.permute.xlu0 %524 }
  0xe3   : > { %589 = vst.msk [vmem:[#allocation3 + $0x86] sm:$0x7f] %vm572_vm5, %v527_v29 }
  0xe4   : > { %588 = vst.msk [vmem:[#allocation3 + $0x7e] sm:$0xfc] %vm570_vm6, %v525_v30  ;;  %803 = vrot.lane.b32.xlu1 %v3517_v25, %s3203_s13  ;;  %801 = vrot.lane.b32.xlu0 %v3530_v26, %s3203_s13 }
  0xe6   : > { %v531_v33 = vpop.permute.xlu1 %530  ;;  %v529_v34 = vpop.permute.xlu0 %528 }
  0xe7   : > { %591 = vst.msk [vmem:[#allocation3 + $0x96] sm:$0x7f] %vm572_vm5, %v531_v33 }
  0xe8   : > { %590 = vst.msk [vmem:[#allocation3 + $0x8e] sm:$0xfc] %vm570_vm6, %v529_v34  ;;  %807 = vrot.lane.b32.xlu1 %v3777_v31, %s3203_s13  ;;  %805 = vrot.lane.b32.xlu0 %v3780_v32, %s3203_s13  ;;  %s3212_s13 = smov 52  }
  0xea   : > { %v535_v35 = vpop.permute.xlu1 %534  ;;  %v533_v36 = vpop.permute.xlu0 %532 }
  0xeb   : > { %593 = vst.msk [vmem:[#allocation3 + $0xa6] sm:$0x7f] %vm572_vm5, %v535_v35 }
  0xec   : > { %592 = vst.msk [vmem:[#allocation3 + $0x9e] sm:$0xfc] %vm570_vm6, %v533_v36  ;;  %865 = vrot.lane.b32.xlu1 %v3405_v3, %s3204_s14  ;;  %863 = vrot.lane.b32.xlu0 %v3399_v1, %s3204_s14 }
  0xee   : > { %v539_v37 = vpop.permute.xlu1 %538  ;;  %v537_v38 = vpop.permute.xlu0 %536 }
  0xef   : > { %595 = vst.msk [vmem:[#allocation3 + $0xb6] sm:$0x7f] %vm572_vm5, %v539_v37 }
  0xf0   : > { %594 = vst.msk [vmem:[#allocation3 + $0xae] sm:$0xfc] %vm570_vm6, %v537_v38  ;;  %869 = vrot.lane.b32.xlu1 %v3415_v5, %s3204_s14  ;;  %867 = vrot.lane.b32.xlu0 %v3424_v6, %s3204_s14 }
  0xf2   : > { %v543_v39 = vpop.permute.xlu1 %542  ;;  %v541_v40 = vpop.permute.xlu0 %540 }
  0xf3   : > { %597 = vst.msk [vmem:[#allocation3 + $0xc6] sm:$0x7f] %vm572_vm5, %v543_v39  ;;  %vm1418_vm5 = vcmask 326945  }
  0xf4   : > { %596 = vst.msk [vmem:[#allocation3 + $0xbe] sm:$0xfc] %vm570_vm6, %v541_v40  ;;  %873 = vrot.lane.b32.xlu1 %v3427_v7, %s3204_s14  ;;  %871 = vrot.lane.b32.xlu0 %v3430_v8, %s3204_s14  ;;  %vm1524_vm6 = vcmask 359746  }
  0xf6   : > { %v601_v41 = vpop.permute.xlu1 %600  ;;  %v599_v42 = vpop.permute.xlu0 %598 }
  0xf7   : > { %679 = vst.msk [vmem:[#allocation3 + $0x5] sm:$0xff] %vm678_vm7, %v601_v41 }
  0xf8   : > { %677 = vst.msk [vmem:[#allocation3 - $0x3] sm:$0xf8] %vm676_vm8, %v599_v42  ;;  %877 = vrot.lane.b32.xlu1 %v3437_v9, %s3204_s14  ;;  %875 = vrot.lane.b32.xlu0 %v3440_v10, %s3204_s14 }
  0xfa   : > { %v605_v43 = vpop.permute.xlu1 %604  ;;  %v603_v44 = vpop.permute.xlu0 %602 }
  0xfb   : > { %681 = vst.msk [vmem:[#allocation3 + $0x15] sm:$0xff] %vm678_vm7, %v605_v43 }
  0xfc   : > { %680 = vst.msk [vmem:[#allocation3 + $0xd] sm:$0xf8] %vm676_vm8, %v603_v44  ;;  %881 = vrot.lane.b32.xlu1 %v3443_v11, %s3204_s14  ;;  %879 = vrot.lane.b32.xlu0 %v3452_v12, %s3204_s14 }
  0xfe   : > { %v609_v45 = vpop.permute.xlu1 %608  ;;  %v607_v46 = vpop.permute.xlu0 %606 }
  0xff   : > { %683 = vst.msk [vmem:[#allocation3 + $0x25] sm:$0xff] %vm678_vm7, %v609_v45 }
 0x100   : > { %682 = vst.msk [vmem:[#allocation3 + $0x1d] sm:$0xf8] %vm676_vm8, %v607_v46  ;;  %885 = vrot.lane.b32.xlu1 %v3455_v13, %s3204_s14  ;;  %883 = vrot.lane.b32.xlu0 %v3458_v14, %s3204_s14 }
 0x102   : > { %v613_v47 = vpop.permute.xlu1 %612  ;;  %v611_v48 = vpop.permute.xlu0 %610 }
 0x103   : > { %685 = vst.msk [vmem:[#allocation3 + $0x35] sm:$0xff] %vm678_vm7, %v613_v47 }
 0x104   : > { %684 = vst.msk [vmem:[#allocation3 + $0x2d] sm:$0xf8] %vm676_vm8, %v611_v48  ;;  %889 = vrot.lane.b32.xlu1 %v3471_v15, %s3204_s14  ;;  %887 = vrot.lane.b32.xlu0 %v3474_v16, %s3204_s14 }
 0x106   : > { %v617_v49 = vpop.permute.xlu1 %616  ;;  %v615_v50 = vpop.permute.xlu0 %614 }
 0x107   : > { %687 = vst.msk [vmem:[#allocation3 + $0x45] sm:$0xff] %vm678_vm7, %v617_v49 }
 0x108   : > { %686 = vst.msk [vmem:[#allocation3 + $0x3d] sm:$0xf8] %vm676_vm8, %v615_v50  ;;  %893 = vrot.lane.b32.xlu1 %v3483_v17, %s3204_s14  ;;  %891 = vrot.lane.b32.xlu0 %v3486_v18, %s3204_s14 }
 0x10a   : > { %v621_v51 = vpop.permute.xlu1 %620  ;;  %v619_v52 = vpop.permute.xlu0 %618 }
 0x10b   : > { %689 = vst.msk [vmem:[#allocation3 + $0x55] sm:$0xff] %vm678_vm7, %v621_v51 }
 0x10c   : > { %688 = vst.msk [vmem:[#allocation3 + $0x4d] sm:$0xf8] %vm676_vm8, %v619_v52  ;;  %897 = vrot.lane.b32.xlu1 %v3489_v19, %s3204_s14  ;;  %895 = vrot.lane.b32.xlu0 %v3496_v20, %s3204_s14 }
 0x10e   : > { %v625_v53 = vpop.permute.xlu1 %624  ;;  %v623_v54 = vpop.permute.xlu0 %622 }
 0x10f   : > { %691 = vst.msk [vmem:[#allocation3 + $0x65] sm:$0xff] %vm678_vm7, %v625_v53 }
 0x110   : > { %690 = vst.msk [vmem:[#allocation3 + $0x5d] sm:$0xf8] %vm676_vm8, %v623_v54  ;;  %901 = vrot.lane.b32.xlu1 %v3499_v21, %s3204_s14  ;;  %899 = vrot.lane.b32.xlu0 %v3502_v22, %s3204_s14 }
 0x112   : > { %v629_v55 = vpop.permute.xlu1 %628  ;;  %v627_v56 = vpop.permute.xlu0 %626 }
 0x113   : > { %693 = vst.msk [vmem:[#allocation3 + $0x75] sm:$0xff] %vm678_vm7, %v629_v55  ;;  %v4035_v55 = vld [vmem:[%s3396_s9 + $0x38] sm:$0xff] }
 0x114   : > { %692 = vst.msk [vmem:[#allocation3 + $0x6d] sm:$0xf8] %vm676_vm8, %v627_v56  ;;  %905 = vrot.lane.b32.xlu1 %v3511_v23, %s3204_s14  ;;  %903 = vrot.lane.b32.xlu0 %v3514_v24, %s3204_s14  ;;  %v4038_v56 = vld [vmem:[%s3396_s9 + $0x30] sm:$0xff] }
 0x116   : > { %v633_v57 = vpop.permute.xlu1 %632  ;;  %v631_v58 = vpop.permute.xlu0 %630 }
 0x117   : > { %695 = vst.msk [vmem:[#allocation3 + $0x85] sm:$0xff] %vm678_vm7, %v633_v57 }
 0x118   : > { %694 = vst.msk [vmem:[#allocation3 + $0x7d] sm:$0xf8] %vm676_vm8, %v631_v58  ;;  %909 = vrot.lane.b32.xlu1 %v3517_v25, %s3204_s14  ;;  %907 = vrot.lane.b32.xlu0 %v3530_v26, %s3204_s14 }
 0x11a   : > { %v637_v59 = vpop.permute.xlu1 %636  ;;  %v635_v60 = vpop.permute.xlu0 %634 }
 0x11b   : > { %697 = vst.msk [vmem:[#allocation3 + $0x95] sm:$0xff] %vm678_vm7, %v637_v59  ;;  %v4047_v59 = vld [vmem:[%s3396_s9 + $0x48] sm:$0xff] }
 0x11c   : > { %696 = vst.msk [vmem:[#allocation3 + $0x8d] sm:$0xf8] %vm676_vm8, %v635_v60  ;;  %913 = vrot.lane.b32.xlu1 %v3777_v31, %s3204_s14  ;;  %911 = vrot.lane.b32.xlu0 %v3780_v32, %s3204_s14  ;;  %v4050_v60 = vld [vmem:[%s3396_s9 + $0x40] sm:$0xff]  ;;  %s3213_s14 = smov 56  }
 0x11e   : > { %v641_v61 = vpop.permute.xlu1 %640  ;;  %v639_v62 = vpop.permute.xlu0 %638 }
 0x11f   : > { %699 = vst.msk [vmem:[#allocation3 + $0xa5] sm:$0xff] %vm678_vm7, %v641_v61 }
 0x120   : > { %698 = vst.msk [vmem:[#allocation3 + $0x9d] sm:$0xf8] %vm676_vm8, %v639_v62  ;;  %971 = vrot.lane.b32.xlu1 %v3405_v3, %s3205_s15  ;;  %969 = vrot.lane.b32.xlu0 %v3399_v1, %s3205_s15 }
 0x122   : > { %v645_v63 = vpop.permute.xlu1 %644  ;;  %v643_v0 = vpop.permute.xlu0 %642 }
 0x123   : > { %701 = vst.msk [vmem:[#allocation3 + $0xb5] sm:$0xff] %vm678_vm7, %v645_v63  ;;  %v4059_v63 = vld [vmem:[%s3396_s9 + $0x58] sm:$0xff] }
 0x124   : > { %700 = vst.msk [vmem:[#allocation3 + $0xad] sm:$0xf8] %vm676_vm8, %v643_v0  ;;  %975 = vrot.lane.b32.xlu1 %v3415_v5, %s3205_s15  ;;  %973 = vrot.lane.b32.xlu0 %v3424_v6, %s3205_s15  ;;  %v4062_v0 = vld [vmem:[%s3396_s9 + $0x50] sm:$0xff] }
 0x126   : > { %v649_v2 = vpop.permute.xlu1 %648  ;;  %v647_v4 = vpop.permute.xlu0 %646 }
 0x127   : > { %703 = vst.msk [vmem:[#allocation3 + $0xc5] sm:$0xff] %vm678_vm7, %v649_v2  ;;  %vm1630_vm7 = vcmask 392547  }
 0x128   : > { %702 = vst.msk [vmem:[#allocation3 + $0xbd] sm:$0xf8] %vm676_vm8, %v647_v4  ;;  %979 = vrot.lane.b32.xlu1 %v3427_v7, %s3205_s15  ;;  %977 = vrot.lane.b32.xlu0 %v3430_v8, %s3205_s15  ;;  %vm1526_vm8 = vcmask 358720  }
 0x12a   : > { %v760_v27 = vpop.permute.xlu1 %759  ;;  %v758_v28 = vpop.permute.xlu0 %757 }
 0x12b   : > { %838 = vst.msk [vmem:[#allocation3 + $0x8] sm:$0x1f] %vm837_vm9, %v760_v27  ;;  %v4071_v27 = vld [vmem:[%s3396_s9 + $0x68] sm:$0xff] }
 0x12c   : > { %836 = vst.msk [vmem:[#allocation3] sm:$0xff] %vm835_vm10, %v758_v28  ;;  %983 = vrot.lane.b32.xlu1 %v3437_v9, %s3205_s15  ;;  %981 = vrot.lane.b32.xlu0 %v3440_v10, %s3205_s15  ;;  %v4074_v28 = vld [vmem:[%s3396_s9 + $0x60] sm:$0xff] }
 0x12e   : > { %v764_v29 = vpop.permute.xlu1 %763  ;;  %v762_v30 = vpop.permute.xlu0 %761 }
 0x12f   : > { %840 = vst.msk [vmem:[#allocation3 + $0x18] sm:$0x1f] %vm837_vm9, %v764_v29 }
 0x130   : > { %839 = vst.msk [vmem:[#allocation3 + $0x10] sm:$0xff] %vm835_vm10, %v762_v30  ;;  %987 = vrot.lane.b32.xlu1 %v3443_v11, %s3205_s15  ;;  %985 = vrot.lane.b32.xlu0 %v3452_v12, %s3205_s15 }
 0x132   : > { %v768_v33 = vpop.permute.xlu1 %767  ;;  %v766_v34 = vpop.permute.xlu0 %765 }
 0x133   : > { %842 = vst.msk [vmem:[#allocation3 + $0x28] sm:$0x1f] %vm837_vm9, %v768_v33  ;;  %v4083_v33 = vld [vmem:[%s3396_s9 + $0x78] sm:$0xff] }
 0x134   : > { %841 = vst.msk [vmem:[#allocation3 + $0x20] sm:$0xff] %vm835_vm10, %v766_v34  ;;  %991 = vrot.lane.b32.xlu1 %v3455_v13, %s3205_s15  ;;  %989 = vrot.lane.b32.xlu0 %v3458_v14, %s3205_s15  ;;  %v4086_v34 = vld [vmem:[%s3396_s9 + $0x70] sm:$0xff] }
 0x136   : > { %v772_v35 = vpop.permute.xlu1 %771  ;;  %v770_v36 = vpop.permute.xlu0 %769 }
 0x137   : > { %844 = vst.msk [vmem:[#allocation3 + $0x38] sm:$0x1f] %vm837_vm9, %v772_v35 }
 0x138   : > { %843 = vst.msk [vmem:[#allocation3 + $0x30] sm:$0xff] %vm835_vm10, %v770_v36  ;;  %995 = vrot.lane.b32.xlu1 %v3471_v15, %s3205_s15  ;;  %993 = vrot.lane.b32.xlu0 %v3474_v16, %s3205_s15 }
 0x13a   : > { %v776_v37 = vpop.permute.xlu1 %775  ;;  %v774_v38 = vpop.permute.xlu0 %773 }
 0x13b   : > { %846 = vst.msk [vmem:[#allocation3 + $0x48] sm:$0x1f] %vm837_vm9, %v776_v37  ;;  %v4095_v37 = vld [vmem:[%s3396_s9 + $0x88] sm:$0xff] }
 0x13c   : > { %845 = vst.msk [vmem:[#allocation3 + $0x40] sm:$0xff] %vm835_vm10, %v774_v38  ;;  %999 = vrot.lane.b32.xlu1 %v3483_v17, %s3205_s15  ;;  %997 = vrot.lane.b32.xlu0 %v3486_v18, %s3205_s15  ;;  %v4098_v38 = vld [vmem:[%s3396_s9 + $0x80] sm:$0xff] }
 0x13e   : > { %v780_v39 = vpop.permute.xlu1 %779  ;;  %v778_v40 = vpop.permute.xlu0 %777 }
 0x13f   : > { %848 = vst.msk [vmem:[#allocation3 + $0x58] sm:$0x1f] %vm837_vm9, %v780_v39 }
 0x140   : > { %847 = vst.msk [vmem:[#allocation3 + $0x50] sm:$0xff] %vm835_vm10, %v778_v40  ;;  %1003 = vrot.lane.b32.xlu1 %v3489_v19, %s3205_s15  ;;  %1001 = vrot.lane.b32.xlu0 %v3496_v20, %s3205_s15 }
 0x142   : > { %v784_v41 = vpop.permute.xlu1 %783  ;;  %v782_v42 = vpop.permute.xlu0 %781 }
 0x143   : > { %850 = vst.msk [vmem:[#allocation3 + $0x68] sm:$0x1f] %vm837_vm9, %v784_v41  ;;  %v4107_v41 = vld [vmem:[%s3396_s9 + $0x98] sm:$0xff] }
 0x144   : > { %849 = vst.msk [vmem:[#allocation3 + $0x60] sm:$0xff] %vm835_vm10, %v782_v42  ;;  %1007 = vrot.lane.b32.xlu1 %v3499_v21, %s3205_s15  ;;  %1005 = vrot.lane.b32.xlu0 %v3502_v22, %s3205_s15  ;;  %v4110_v42 = vld [vmem:[%s3396_s9 + $0x90] sm:$0xff] }
 0x146   : > { %v788_v43 = vpop.permute.xlu1 %787  ;;  %v786_v44 = vpop.permute.xlu0 %785 }
 0x147   : > { %852 = vst.msk [vmem:[#allocation3 + $0x78] sm:$0x1f] %vm837_vm9, %v788_v43 }
 0x148   : > { %851 = vst.msk [vmem:[#allocation3 + $0x70] sm:$0xff] %vm835_vm10, %v786_v44  ;;  %1011 = vrot.lane.b32.xlu1 %v3511_v23, %s3205_s15  ;;  %1009 = vrot.lane.b32.xlu0 %v3514_v24, %s3205_s15 }
 0x14a   : > { %v792_v45 = vpop.permute.xlu1 %791  ;;  %v790_v46 = vpop.permute.xlu0 %789 }
 0x14b   : > { %854 = vst.msk [vmem:[#allocation3 + $0x88] sm:$0x1f] %vm837_vm9, %v792_v45  ;;  %v4119_v45 = vld [vmem:[%s3396_s9 + $0xa8] sm:$0xff] }
 0x14c   : > { %853 = vst.msk [vmem:[#allocation3 + $0x80] sm:$0xff] %vm835_vm10, %v790_v46  ;;  %1015 = vrot.lane.b32.xlu1 %v3517_v25, %s3205_s15  ;;  %1013 = vrot.lane.b32.xlu0 %v3530_v26, %s3205_s15  ;;  %v4122_v46 = vld [vmem:[%s3396_s9 + $0xa0] sm:$0xff] }
 0x14e   : > { %v796_v47 = vpop.permute.xlu1 %795  ;;  %v794_v48 = vpop.permute.xlu0 %793 }
 0x14f   : > { %856 = vst.msk [vmem:[#allocation3 + $0x98] sm:$0x1f] %vm837_vm9, %v796_v47 }
 0x150   : > { %855 = vst.msk [vmem:[#allocation3 + $0x90] sm:$0xff] %vm835_vm10, %v794_v48  ;;  %1019 = vrot.lane.b32.xlu1 %v3777_v31, %s3205_s15  ;;  %1017 = vrot.lane.b32.xlu0 %v3780_v32, %s3205_s15  ;;  %s4664_s15 = scalar_lea.vmem [#allocation4], %s2773_s12 }
 0x152   : > { %v800_v49 = vpop.permute.xlu1 %799  ;;  %v798_v50 = vpop.permute.xlu0 %797 }
 0x153   : > { %858 = vst.msk [vmem:[#allocation3 + $0xa8] sm:$0x1f] %vm837_vm9, %v800_v49  ;;  %v4131_v49 = vld [vmem:[%s3396_s9 + $0xb8] sm:$0xff] }
 0x154   : > { %857 = vst.msk [vmem:[#allocation3 + $0xa0] sm:$0xff] %vm835_vm10, %v798_v50  ;;  %1077 = vrot.lane.b32.xlu1 %v3405_v3, %s3206_s16  ;;  %1075 = vrot.lane.b32.xlu0 %v3399_v1, %s3206_s16  ;;  %v4134_v50 = vld [vmem:[%s3396_s9 + $0xb0] sm:$0xff] }
 0x156   : > { %v804_v51 = vpop.permute.xlu1 %803  ;;  %v802_v52 = vpop.permute.xlu0 %801 }
 0x157   : > { %860 = vst.msk [vmem:[#allocation3 + $0xb8] sm:$0x1f] %vm837_vm9, %v804_v51 }
 0x158   : > { %859 = vst.msk [vmem:[#allocation3 + $0xb0] sm:$0xff] %vm835_vm10, %v802_v52  ;;  %1081 = vrot.lane.b32.xlu1 %v3415_v5, %s3206_s16  ;;  %1079 = vrot.lane.b32.xlu0 %v3424_v6, %s3206_s16 }
 0x15a   : > { %v808_v53 = vpop.permute.xlu1 %807  ;;  %v806_v54 = vpop.permute.xlu0 %805 }
 0x15b   : > { %862 = vst.msk [vmem:[#allocation3 + $0xc8] sm:$0x1f] %vm837_vm9, %v808_v53  ;;  %v4143_v53 = vld [vmem:[%s3396_s9 + $0xc8] sm:$0xff]  ;;  %vm1632_vm9 = vcmask 392544  }
 0x15c   : > { %861 = vst.msk [vmem:[#allocation3 + $0xc0] sm:$0xff] %vm835_vm10, %v806_v54  ;;  %1085 = vrot.lane.b32.xlu1 %v3427_v7, %s3206_s16  ;;  %1083 = vrot.lane.b32.xlu0 %v3430_v8, %s3206_s16  ;;  %v4146_v54 = vld [vmem:[%s3396_s9 + $0xc0] sm:$0xff]  ;;  %vm1789_vm10 = vcmask 425344  }
 0x15e   : > { %v866_v1 = vpop.permute.xlu1 %865  ;;  %v864_v3 = vpop.permute.xlu0 %863 }
 0x15f   : > { %944 = vst.msk [vmem:[#allocation3 + $0x7] sm:$0x3f] %vm943_vm11, %v866_v1 }
 0x160   : > { %942 = vst.msk [vmem:[#allocation3 - $0x1] sm:$0xfe] %vm941_vm12, %v864_v3  ;;  %1089 = vrot.lane.b32.xlu1 %v3437_v9, %s3206_s16  ;;  %1087 = vrot.lane.b32.xlu0 %v3440_v10, %s3206_s16 }
 0x162   : > { %v870_v5 = vpop.permute.xlu1 %869  ;;  %v868_v6 = vpop.permute.xlu0 %867 }
 0x163   : > { %946 = vst.msk [vmem:[#allocation3 + $0x17] sm:$0x3f] %vm943_vm11, %v870_v5 }
 0x164   : > { %945 = vst.msk [vmem:[#allocation3 + $0xf] sm:$0xfe] %vm941_vm12, %v868_v6  ;;  %1093 = vrot.lane.b32.xlu1 %v3443_v11, %s3206_s16  ;;  %1091 = vrot.lane.b32.xlu0 %v3452_v12, %s3206_s16 }
 0x166   : > { %v874_v7 = vpop.permute.xlu1 %873  ;;  %v872_v8 = vpop.permute.xlu0 %871 }
 0x167   : > { %948 = vst.msk [vmem:[#allocation3 + $0x27] sm:$0x3f] %vm943_vm11, %v874_v7  ;;  %v2827_v7 = vld [vmem:[%s3396_s9 + $0xe8] sm:$0xff] }
 0x168   : > { %947 = vst.msk [vmem:[#allocation3 + $0x1f] sm:$0xfe] %vm941_vm12, %v872_v8  ;;  %1097 = vrot.lane.b32.xlu1 %v3455_v13, %s3206_s16  ;;  %1095 = vrot.lane.b32.xlu0 %v3458_v14, %s3206_s16  ;;  %v2826_v8 = vld [vmem:[%s3396_s9 + $0xe0] sm:$0xff] }
 0x16a   : > { %v878_v9 = vpop.permute.xlu1 %877  ;;  %v876_v10 = vpop.permute.xlu0 %875 }
 0x16b   : > { %950 = vst.msk [vmem:[#allocation3 + $0x37] sm:$0x3f] %vm943_vm11, %v878_v9 }
 0x16c   : > { %949 = vst.msk [vmem:[#allocation3 + $0x2f] sm:$0xfe] %vm941_vm12, %v876_v10  ;;  %1101 = vrot.lane.b32.xlu1 %v3471_v15, %s3206_s16  ;;  %1099 = vrot.lane.b32.xlu0 %v3474_v16, %s3206_s16 }
 0x16e   : > { %v882_v11 = vpop.permute.xlu1 %881  ;;  %v880_v12 = vpop.permute.xlu0 %879 }
 0x16f   : > { %952 = vst.msk [vmem:[#allocation3 + $0x47] sm:$0x3f] %vm943_vm11, %v882_v11 }
 0x170   : > { %951 = vst.msk [vmem:[#allocation3 + $0x3f] sm:$0xfe] %vm941_vm12, %v880_v12  ;;  %1105 = vrot.lane.b32.xlu1 %v3483_v17, %s3206_s16  ;;  %1103 = vrot.lane.b32.xlu0 %v3486_v18, %s3206_s16 }
 0x172   : > { %v886_v13 = vpop.permute.xlu1 %885  ;;  %v884_v14 = vpop.permute.xlu0 %883 }
 0x173   : > { %954 = vst.msk [vmem:[#allocation3 + $0x57] sm:$0x3f] %vm943_vm11, %v886_v13 }
 0x174   : > { %953 = vst.msk [vmem:[#allocation3 + $0x4f] sm:$0xfe] %vm941_vm12, %v884_v14  ;;  %1109 = vrot.lane.b32.xlu1 %v3489_v19, %s3206_s16  ;;  %1107 = vrot.lane.b32.xlu0 %v3496_v20, %s3206_s16 }
 0x176   : > { %v890_v15 = vpop.permute.xlu1 %889  ;;  %v888_v16 = vpop.permute.xlu0 %887 }
 0x177   : > { %956 = vst.msk [vmem:[#allocation3 + $0x67] sm:$0x3f] %vm943_vm11, %v890_v15 }
 0x178   : > { %955 = vst.msk [vmem:[#allocation3 + $0x5f] sm:$0xfe] %vm941_vm12, %v888_v16  ;;  %1113 = vrot.lane.b32.xlu1 %v3499_v21, %s3206_s16  ;;  %1111 = vrot.lane.b32.xlu0 %v3502_v22, %s3206_s16 }
 0x17a   : > { %v894_v17 = vpop.permute.xlu1 %893  ;;  %v892_v18 = vpop.permute.xlu0 %891 }
 0x17b   : > { %958 = vst.msk [vmem:[#allocation3 + $0x77] sm:$0x3f] %vm943_vm11, %v894_v17 }
 0x17c   : > { %957 = vst.msk [vmem:[#allocation3 + $0x6f] sm:$0xfe] %vm941_vm12, %v892_v18  ;;  %1117 = vrot.lane.b32.xlu1 %v3511_v23, %s3206_s16  ;;  %1115 = vrot.lane.b32.xlu0 %v3514_v24, %s3206_s16  ;;  %v4023_v23 = vld [vmem:[%s3396_s9 + $0x28] sm:$0xff]  ;;  %v4026_v24 = vld [vmem:[%s3396_s9 + $0x20] sm:$0xff] }
 0x17e   : > { %v898_v19 = vpop.permute.xlu1 %897  ;;  %v896_v20 = vpop.permute.xlu0 %895 }
 0x17f   : > { %960 = vst.msk [vmem:[#allocation3 + $0x87] sm:$0x3f] %vm943_vm11, %v898_v19 }
 0x180   : > { %959 = vst.msk [vmem:[#allocation3 + $0x7f] sm:$0xfe] %vm941_vm12, %v896_v20  ;;  %1121 = vrot.lane.b32.xlu1 %v3517_v25, %s3206_s16  ;;  %1119 = vrot.lane.b32.xlu0 %v3530_v26, %s3206_s16 }
 0x182   : > { %v902_v21 = vpop.permute.xlu1 %901  ;;  %v900_v22 = vpop.permute.xlu0 %899 }
 0x183   : > { %962 = vst.msk [vmem:[#allocation3 + $0x97] sm:$0x3f] %vm943_vm11, %v902_v21 }
 0x184   : > { %961 = vst.msk [vmem:[#allocation3 + $0x8f] sm:$0xfe] %vm941_vm12, %v900_v22  ;;  %1125 = vrot.lane.b32.xlu1 %v3777_v31, %s3206_s16  ;;  %1123 = vrot.lane.b32.xlu0 %v3780_v32, %s3206_s16  ;;  %s2607_s16 = scalar_lea.sflag [#allocation5], %s4655_s10 }
 0x186   : > { %v906_v25 = vpop.permute.xlu1 %905  ;;  %v904_v26 = vpop.permute.xlu0 %903 }
 0x187   : > { %964 = vst.msk [vmem:[#allocation3 + $0xa7] sm:$0x3f] %vm943_vm11, %v906_v25  ;;  %v2162_v25 = vld [vmem:[%s4991_s1 + $0x8] sm:$0xff] }
 0x188   : > { %963 = vst.msk [vmem:[#allocation3 + $0x9f] sm:$0xfe] %vm941_vm12, %v904_v26  ;;  %1236 = vrot.lane.b32.xlu1 %v4023_v23, %s3207_s17  ;;  %1234 = vrot.lane.b32.xlu0 %v4026_v24, %s3207_s17 }
 0x18a   : > { %v910_v57 = vpop.permute.xlu1 %909  ;;  %v908_v58 = vpop.permute.xlu0 %907 }
 0x18b   : > { %966 = vst.msk [vmem:[#allocation3 + $0xb7] sm:$0x3f] %vm943_vm11, %v910_v57 }
 0x18c   : > { %965 = vst.msk [vmem:[#allocation3 + $0xaf] sm:$0xfe] %vm941_vm12, %v908_v58  ;;  %1240 = vrot.lane.b32.xlu1 %v4035_v55, %s3207_s17  ;;  %1238 = vrot.lane.b32.xlu0 %v4038_v56, %s3207_s17 }
 0x18e   : > { %v914_v61 = vpop.permute.xlu1 %913  ;;  %v912_v62 = vpop.permute.xlu0 %911 }
 0x18f   : > { %968 = vst.msk [vmem:[#allocation3 + $0xc7] sm:$0x3f] %vm943_vm11, %v914_v61  ;;  %v2164_v61 = vld [vmem:[%s4991_s1 + $0x18] sm:$0xff]  ;;  %vm1895_vm11 = vcmask 458145  }
 0x190   : > { %967 = vst.msk [vmem:[#allocation3 + $0xbf] sm:$0xfe] %vm941_vm12, %v912_v62  ;;  %1244 = vrot.lane.b32.xlu1 %v4047_v59, %s3207_s17  ;;  %1242 = vrot.lane.b32.xlu0 %v4050_v60, %s3207_s17  ;;  %vm1791_vm12 = vcmask 422272  }
 0x192   : > { %v972_v2 = vpop.permute.xlu1 %971  ;;  %v970_v4 = vpop.permute.xlu0 %969 }
 0x193   : > { %1050 = vst.msk [vmem:[#allocation3 + $0x6] sm:$0x7f] %vm1049_vm13, %v972_v2 }
 0x194   : > { %1048 = vst.msk [vmem:[#allocation3 - $0x2] sm:$0xfc] %vm1047_vm14, %v970_v4  ;;  %1248 = vrot.lane.b32.xlu1 %v4059_v63, %s3207_s17  ;;  %1246 = vrot.lane.b32.xlu0 %v4062_v0, %s3207_s17 }
 0x196   : > { %v976_v29 = vpop.permute.xlu1 %975  ;;  %v974_v30 = vpop.permute.xlu0 %973 }
 0x197   : > { %1052 = vst.msk [vmem:[#allocation3 + $0x16] sm:$0x7f] %vm1049_vm13, %v976_v29  ;;  %v2165_v29 = vld [vmem:[%s4991_s1 + $0x20] sm:$0xff] }
 0x198   : > { %1051 = vst.msk [vmem:[#allocation3 + $0xe] sm:$0xfc] %vm1047_vm14, %v974_v30  ;;  %1252 = vrot.lane.b32.xlu1 %v4071_v27, %s3207_s17  ;;  %1250 = vrot.lane.b32.xlu0 %v4074_v28, %s3207_s17  ;;  %v2166_v30 = vld [vmem:[%s4991_s1 + $0x28] sm:$0xff] }
 0x19a   : > { %v980_v35 = vpop.permute.xlu1 %979  ;;  %v978_v36 = vpop.permute.xlu0 %977 }
 0x19b   : > { %1054 = vst.msk [vmem:[#allocation3 + $0x26] sm:$0x7f] %vm1049_vm13, %v980_v35 }
 0x19c   : > { %1053 = vst.msk [vmem:[#allocation3 + $0x1e] sm:$0xfc] %vm1047_vm14, %v978_v36  ;;  %1256 = vrot.lane.b32.xlu1 %v4083_v33, %s3207_s17  ;;  %1254 = vrot.lane.b32.xlu0 %v4086_v34, %s3207_s17 }
 0x19e   : > { %v984_v39 = vpop.permute.xlu1 %983  ;;  %v982_v40 = vpop.permute.xlu0 %981 }
 0x19f   : > { %1056 = vst.msk [vmem:[#allocation3 + $0x36] sm:$0x7f] %vm1049_vm13, %v984_v39  ;;  %v2987_v39 = vpack.c.bf16 %v2166_v30, %v2165_v29 }
 0x1a0   : > { %1055 = vst.msk [vmem:[#allocation3 + $0x2e] sm:$0xfc] %vm1047_vm14, %v982_v40  ;;  %1260 = vrot.lane.b32.xlu1 %v4095_v37, %s3207_s17  ;;  %1258 = vrot.lane.b32.xlu0 %v4098_v38, %s3207_s17  ;;  %v2167_v40 = vld [vmem:[%s4991_s1 + $0x30] sm:$0xff] }
 0x1a2   : > { %v988_v43 = vpop.permute.xlu1 %987  ;;  %v986_v44 = vpop.permute.xlu0 %985 }
 0x1a3   : > { %1058 = vst.msk [vmem:[#allocation3 + $0x46] sm:$0x7f] %vm1049_vm13, %v988_v43  ;;  %v2168_v43 = vld [vmem:[%s4991_s1 + $0x38] sm:$0xff] }
 0x1a4   : > { %1057 = vst.msk [vmem:[#allocation3 + $0x3e] sm:$0xfc] %vm1047_vm14, %v986_v44  ;;  %1264 = vrot.lane.b32.xlu1 %v4107_v41, %s3207_s17  ;;  %1262 = vrot.lane.b32.xlu0 %v4110_v42, %s3207_s17 }
 0x1a6   : > { %v992_v47 = vpop.permute.xlu1 %991  ;;  %v990_v48 = vpop.permute.xlu0 %989 }
 0x1a7   : > { %1060 = vst.msk [vmem:[#allocation3 + $0x56] sm:$0x7f] %vm1049_vm13, %v992_v47 }
 0x1a8   : > { %1059 = vst.msk [vmem:[#allocation3 + $0x4e] sm:$0xfc] %vm1047_vm14, %v990_v48  ;;  %1268 = vrot.lane.b32.xlu1 %v4119_v45, %s3207_s17  ;;  %1266 = vrot.lane.b32.xlu0 %v4122_v46, %s3207_s17  ;;  %v2991_v48 = vpack.c.bf16 %v2168_v43, %v2167_v40 }
 0x1aa   : > { %v996_v51 = vpop.permute.xlu1 %995  ;;  %v994_v52 = vpop.permute.xlu0 %993 }
 0x1ab   : > { %1062 = vst.msk [vmem:[#allocation3 + $0x66] sm:$0x7f] %vm1049_vm13, %v996_v51 }
 0x1ac   : > { %1061 = vst.msk [vmem:[#allocation3 + $0x5e] sm:$0xfc] %vm1047_vm14, %v994_v52  ;;  %1272 = vrot.lane.b32.xlu1 %v4131_v49, %s3207_s17  ;;  %1270 = vrot.lane.b32.xlu0 %v4134_v50, %s3207_s17 }
 0x1ae   : > { %v1000_v1 = vpop.permute.xlu1 %999  ;;  %v998_v3 = vpop.permute.xlu0 %997 }
 0x1af   : > { %1064 = vst.msk [vmem:[#allocation3 + $0x76] sm:$0x7f] %vm1049_vm13, %v1000_v1 }
 0x1b0   : > { %1063 = vst.msk [vmem:[#allocation3 + $0x6e] sm:$0xfc] %vm1047_vm14, %v998_v3  ;;  %1276 = vrot.lane.b32.xlu1 %v4143_v53, %s3207_s17  ;;  %1274 = vrot.lane.b32.xlu0 %v4146_v54, %s3207_s17 }
 0x1b2   : > { %v1004_v5 = vpop.permute.xlu1 %1003  ;;  %v1002_v6 = vpop.permute.xlu0 %1001 }
 0x1b3   : > { %1066 = vst.msk [vmem:[#allocation3 + $0x86] sm:$0x7f] %vm1049_vm13, %v1004_v5 }
 0x1b4   : > { %1065 = vst.msk [vmem:[#allocation3 + $0x7e] sm:$0xfc] %vm1047_vm14, %v1002_v6  ;;  %1280 = vrot.lane.b32.xlu1 %v3777_v31, %s3207_s17  ;;  %1278 = vrot.lane.b32.xlu0 %v3780_v32, %s3207_s17 }
 0x1b6   : > { %v1008_v9 = vpop.permute.xlu1 %1007  ;;  %v1006_v10 = vpop.permute.xlu0 %1005 }
 0x1b7   : > { %1068 = vst.msk [vmem:[#allocation3 + $0x96] sm:$0x7f] %vm1049_vm13, %v1008_v9 }
 0x1b8   : > { %1067 = vst.msk [vmem:[#allocation3 + $0x8e] sm:$0xfc] %vm1047_vm14, %v1006_v10  ;;  %1284 = vrot.lane.b32.xlu1 %v2827_v7, %s3207_s17  ;;  %1282 = vrot.lane.b32.xlu0 %v2826_v8, %s3207_s17 }
 0x1ba   : > { %v1012_v11 = vpop.permute.xlu1 %1011  ;;  %v1010_v12 = vpop.permute.xlu0 %1009 }
 0x1bb   : > { %1070 = vst.msk [vmem:[#allocation3 + $0xa6] sm:$0x7f] %vm1049_vm13, %v1012_v11 }
 0x1bc   : > { %1069 = vst.msk [vmem:[#allocation3 + $0x9e] sm:$0xfc] %vm1047_vm14, %v1010_v12  ;;  %1342 = vrot.lane.b32.xlu1 %v4023_v23, %s3208_s25  ;;  %1340 = vrot.lane.b32.xlu0 %v4026_v24, %s3208_s25 }
 0x1be   : > { %v1016_v31 = vpop.permute.xlu1 %1015  ;;  %v1014_v32 = vpop.permute.xlu0 %1013 }
 0x1bf   : > { %1072 = vst.msk [vmem:[#allocation3 + $0xb6] sm:$0x7f] %vm1049_vm13, %v1016_v31 }
 0x1c0   : > { %1071 = vst.msk [vmem:[#allocation3 + $0xae] sm:$0xfc] %vm1047_vm14, %v1014_v32  ;;  %1346 = vrot.lane.b32.xlu1 %v4035_v55, %s3208_s25  ;;  %1344 = vrot.lane.b32.xlu0 %v4038_v56, %s3208_s25 }
 0x1c2   : > { %v1020_v13 = vpop.permute.xlu1 %1019  ;;  %v1018_v14 = vpop.permute.xlu0 %1017 }
 0x1c3   : > { %1074 = vst.msk [vmem:[#allocation3 + $0xc6] sm:$0x7f] %vm1049_vm13, %v1020_v13  ;;  %vm1897_vm13 = vcmask 456096  }
 0x1c4   : > { %1073 = vst.msk [vmem:[#allocation3 + $0xbe] sm:$0xfc] %vm1047_vm14, %v1018_v14  ;;  %1350 = vrot.lane.b32.xlu1 %v4047_v59, %s3208_s25  ;;  %1348 = vrot.lane.b32.xlu0 %v4050_v60, %s3208_s25  ;;  %vm2001_vm14 = vcmask 490946  }
 0x1c6   : > { %v1078_v15 = vpop.permute.xlu1 %1077  ;;  %v1076_v16 = vpop.permute.xlu0 %1075 }
 0x1c7   : > { %1156 = vst.msk [vmem:[#allocation3 + $0x5] sm:$0xff] %vm1155_vm15, %v1078_v15 }
 0x1c8   : > { %1154 = vst.msk [vmem:[#allocation3 - $0x3] sm:$0xf8] %vm1153_vm1, %v1076_v16  ;;  %1354 = vrot.lane.b32.xlu1 %v4059_v63, %s3208_s25  ;;  %1352 = vrot.lane.b32.xlu0 %v4062_v0, %s3208_s25 }
 0x1ca   : > { %v1082_v17 = vpop.permute.xlu1 %1081  ;;  %v1080_v18 = vpop.permute.xlu0 %1079 }
 0x1cb   : > { %1158 = vst.msk [vmem:[#allocation3 + $0x15] sm:$0xff] %vm1155_vm15, %v1082_v17 }
 0x1cc   : > { %1157 = vst.msk [vmem:[#allocation3 + $0xd] sm:$0xf8] %vm1153_vm1, %v1080_v18  ;;  %1446 = vrot.lane.b32.xlu1 %v4026_v24, %s3209_s26  ;;  %1356 = vrot.lane.b32.xlu0 %v4074_v28, %s3208_s25 }
 0x1ce   : > { %v1086_v19 = vpop.permute.xlu1 %1085  ;;  %v1084_v20 = vpop.permute.xlu0 %1083 }
 0x1cf   : > { %1160 = vst.msk [vmem:[#allocation3 + $0x25] sm:$0xff] %vm1155_vm15, %v1086_v19 }
 0x1d0   : > { %1159 = vst.msk [vmem:[#allocation3 + $0x1d] sm:$0xf8] %vm1153_vm1, %v1084_v20  ;;  %1552 = vrot.lane.b32.xlu1 %v4026_v24, %s3210_s30  ;;  %1448 = vrot.lane.b32.xlu0 %v4023_v23, %s3209_s26  ;;  %v2161_v24 = vld [vmem:[%s4991_s1] sm:$0xff] }
 0x1d1   : > { %v2979_v58 = vpack.c.bf16 %v2162_v25, %v2161_v24 }
 0x1d2   : > { %v1090_v21 = vpop.permute.xlu1 %1089  ;;  %v1088_v22 = vpop.permute.xlu0 %1087 }
 0x1d3   : > { %1162 = vst.msk [vmem:[#allocation3 + $0x35] sm:$0xff] %vm1155_vm15, %v1090_v21  ;;  %2980 = vmatprep.subr.bf16.mxu0 %v2979_v58  ;;  %2995 = vmatprep.subr.bf16.mxu1 %v2979_v58 }
 0x1d4   : > { %1161 = vst.msk [vmem:[#allocation3 + $0x2d] sm:$0xf8] %vm1153_vm1, %v1088_v22  ;;  %1711 = vrot.lane.b32.xlu1 %v4038_v56, %s3211_s6  ;;  %1554 = vrot.lane.b32.xlu0 %v4023_v23, %s3210_s30  ;;  %v2163_v23 = vld [vmem:[%s4991_s1 + $0x10] sm:$0xff] }
 0x1d5   : > { %2982 = vmatpush3.bf16.msra.mxu0 %v2979_v58  ;;  %v2983_v4 = vpack.c.bf16 %v2164_v61, %v2163_v23  ;;  %2999 = vmatpush3.bf16.msra.mxu1 %v2979_v58 }
 0x1d6   : > { %v1094_v26 = vpop.permute.xlu1 %1093  ;;  %v1092_v57 = vpop.permute.xlu0 %1091 }
 0x1d7   : > { %1164 = vst.msk [vmem:[#allocation3 + $0x45] sm:$0xff] %vm1155_vm15, %v1094_v26  ;;  %2984 = vmatprep.subr.bf16.mxu0 %v2983_v4  ;;  %2996 = vmatprep.subr.bf16.mxu1 %v2983_v4 }
 0x1d8   : > { %1163 = vst.msk [vmem:[#allocation3 + $0x3d] sm:$0xf8] %vm1153_vm1, %v1092_v57  ;;  %1817 = vrot.lane.b32.xlu1 %v4038_v56, %s3212_s13  ;;  %1713 = vrot.lane.b32.xlu0 %v4035_v55, %s3211_s6 }
 0x1d9   : > { %2986 = vmatpush3.bf16.msra.mxu0 %v2983_v4  ;;  %3000 = vmatpush3.bf16.msra.mxu1 %v2983_v4 }
 0x1da   : > { %v1098_v62 = vpop.permute.xlu1 %1097  ;;  %v1096_v2 = vpop.permute.xlu0 %1095  ;;  %2988 = vmatprep.subr.bf16.mxu0 %v2987_v39  ;;  %2997 = vmatprep.subr.bf16.mxu1 %v2987_v39 }
 0x1db   : > { %1166 = vst.msk [vmem:[#allocation3 + $0x55] sm:$0xff] %vm1155_vm15, %v1098_v62 }
 0x1dc   : > { %1165 = vst.msk [vmem:[#allocation3 + $0x4d] sm:$0xf8] %vm1153_vm1, %v1096_v2  ;;  %1450 = vrot.lane.b32.xlu1 %v4038_v56, %s3209_s26  ;;  %1819 = vrot.lane.b32.xlu0 %v4035_v55, %s3212_s13 }
 0x1dd   : > { %2990 = vmatpush3.bf16.msra.mxu0 %v2987_v39  ;;  %3001 = vmatpush3.bf16.msra.mxu1 %v2987_v39 }
 0x1de   : > { %v1102_v35 = vpop.permute.xlu1 %1101  ;;  %v1100_v36 = vpop.permute.xlu0 %1099  ;;  %2992 = vmatprep.subr.bf16.mxu0 %v2991_v48  ;;  %2998 = vmatprep.subr.bf16.mxu1 %v2991_v48 }
 0x1df   : > { %1168 = vst.msk [vmem:[#allocation3 + $0x65] sm:$0xff] %vm1155_vm15, %v1102_v35 }
 0x1e0   : > { %1167 = vst.msk [vmem:[#allocation3 + $0x5d] sm:$0xf8] %vm1153_vm1, %v1100_v36  ;;  %1923 = vrot.lane.b32.xlu1 %v4038_v56, %s3213_s14  ;;  %1452 = vrot.lane.b32.xlu0 %v4035_v55, %s3209_s26 }
 0x1e1   : > { %2994 = vmatpush3.bf16.msra.mxu0 %v2991_v48  ;;  %3002 = vmatpush3.bf16.msra.mxu1 %v2991_v48 }
 0x1e2   : > { %v1106_v44 = vpop.permute.xlu1 %1105  ;;  %v1104_v47 = vpop.permute.xlu0 %1103 }
 0x1e3   : > { %1170 = vst.msk [vmem:[#allocation3 + $0x75] sm:$0xff] %vm1155_vm15, %v1106_v44 }
 0x1e4   : > { %1169 = vst.msk [vmem:[#allocation3 + $0x6d] sm:$0xf8] %vm1153_vm1, %v1104_v47  ;;  %1556 = vrot.lane.b32.xlu1 %v4038_v56, %s3210_s30  ;;  %1925 = vrot.lane.b32.xlu0 %v4035_v55, %s3213_s14 }
 0x1e6   : > { %v1110_v51 = vpop.permute.xlu1 %1109  ;;  %v1108_v52 = vpop.permute.xlu0 %1107 }
 0x1e7   : > { %1172 = vst.msk [vmem:[#allocation3 + $0x85] sm:$0xff] %vm1155_vm15, %v1110_v51 }
 0x1e8   : > { %1171 = vst.msk [vmem:[#allocation3 + $0x7d] sm:$0xf8] %vm1153_vm1, %v1108_v52  ;;  %2029 = vrot.lane.b32.xlu1 %v4038_v56, %s3214_s8  ;;  %1558 = vrot.lane.b32.xlu0 %v4035_v55, %s3210_s30 }
 0x1ea   : > { %v1114_v1 = vpop.permute.xlu1 %1113  ;;  %v1112_v3 = vpop.permute.xlu0 %1111 }
 0x1eb   : > { %1174 = vst.msk [vmem:[#allocation3 + $0x95] sm:$0xff] %vm1155_vm15, %v1114_v1 }
 0x1ec   : > { %1173 = vst.msk [vmem:[#allocation3 + $0x8d] sm:$0xf8] %vm1153_vm1, %v1112_v3  ;;  %1715 = vrot.lane.b32.xlu1 %v4050_v60, %s3211_s6  ;;  %2031 = vrot.lane.b32.xlu0 %v4035_v55, %s3214_s8 }
 0x1ee   : > { %v1118_v5 = vpop.permute.xlu1 %1117  ;;  %v1116_v6 = vpop.permute.xlu0 %1115 }
 0x1ef   : > { %1176 = vst.msk [vmem:[#allocation3 + $0xa5] sm:$0xff] %vm1155_vm15, %v1118_v5 }
 0x1f0   : > { %1175 = vst.msk [vmem:[#allocation3 + $0x9d] sm:$0xf8] %vm1153_vm1, %v1116_v6  ;;  %1821 = vrot.lane.b32.xlu1 %v4050_v60, %s3212_s13  ;;  %1717 = vrot.lane.b32.xlu0 %v4047_v59, %s3211_s6 }
 0x1f2   : > { %v1122_v56 = vpop.permute.xlu1 %1121  ;;  %v1120_v7 = vpop.permute.xlu0 %1119 }
 0x1f3   : > { %1178 = vst.msk [vmem:[#allocation3 + $0xb5] sm:$0xff] %vm1155_vm15, %v1122_v56 }
 0x1f4   : > { %1177 = vst.msk [vmem:[#allocation3 + $0xad] sm:$0xf8] %vm1153_vm1, %v1120_v7  ;;  %1454 = vrot.lane.b32.xlu1 %v4050_v60, %s3209_s26  ;;  %1823 = vrot.lane.b32.xlu0 %v4047_v59, %s3212_s13 }
 0x1f6   : > { %v1126_v55 = vpop.permute.xlu1 %1125  ;;  %v1124_v8 = vpop.permute.xlu0 %1123 }
 0x1f7   : > { %1180 = vst.msk [vmem:[#allocation3 + $0xc5] sm:$0xff] %vm1155_vm15, %v1126_v55  ;;  %vm2003_vm15 = vcmask 489920  }
 0x1f8   : > { %1179 = vst.msk [vmem:[#allocation3 + $0xbd] sm:$0xf8] %vm1153_vm1, %v1124_v8  ;;  %1927 = vrot.lane.b32.xlu1 %v4050_v60, %s3213_s14  ;;  %1456 = vrot.lane.b32.xlu0 %v4047_v59, %s3209_s26  ;;  %vm2107_vm1 = vcmask 523747  }
 0x1fa   : > { %v1237_v9 = vpop.permute.xlu1 %1236  ;;  %v1235_v10 = vpop.permute.xlu0 %1234 }
 0x1fb   : > { %1315 = vst.msk [vmem:[#allocation3 + $0x8] sm:$0x1f] %vm1314_vm2, %v1237_v9 }
 0x1fc   : > { %1313 = vst.msk [vmem:[#allocation3] sm:$0xff] %vm1312_vm3, %v1235_v10  ;;  %1368 = vrot.lane.b32.xlu1 %v4110_v42, %s3208_s25  ;;  %1929 = vrot.lane.b32.xlu0 %v4047_v59, %s3213_s14 }
 0x1fe   : > { %v1241_v11 = vpop.permute.xlu1 %1240  ;;  %v1239_v12 = vpop.permute.xlu0 %1238 }
 0x1ff   : > { %1317 = vst.msk [vmem:[#allocation3 + $0x18] sm:$0x1f] %vm1314_vm2, %v1241_v11 }
 0x200   : > { %1316 = vst.msk [vmem:[#allocation3 + $0x10] sm:$0xff] %vm1312_vm3, %v1239_v12  ;;  %1560 = vrot.lane.b32.xlu1 %v4050_v60, %s3210_s30  ;;  %1370 = vrot.lane.b32.xlu0 %v4107_v41, %s3208_s25 }
 0x202   : > { %v1245_v31 = vpop.permute.xlu1 %1244  ;;  %v1243_v32 = vpop.permute.xlu0 %1242 }
 0x203   : > { %1319 = vst.msk [vmem:[#allocation3 + $0x28] sm:$0x1f] %vm1314_vm2, %v1245_v31 }
 0x204   : > { %1318 = vst.msk [vmem:[#allocation3 + $0x20] sm:$0xff] %vm1312_vm3, %v1243_v32  ;;  %2033 = vrot.lane.b32.xlu1 %v4050_v60, %s3214_s8  ;;  %1562 = vrot.lane.b32.xlu0 %v4047_v59, %s3210_s30 }
 0x206   : > { %v1249_v13 = vpop.permute.xlu1 %1248  ;;  %v1247_v14 = vpop.permute.xlu0 %1246 }
 0x207   : > { %1321 = vst.msk [vmem:[#allocation3 + $0x38] sm:$0x1f] %vm1314_vm2, %v1249_v13 }
 0x208   : > { %1320 = vst.msk [vmem:[#allocation3 + $0x30] sm:$0xff] %vm1312_vm3, %v1247_v14  ;;  %1474 = vrot.lane.b32.xlu1 %v4110_v42, %s3209_s26  ;;  %2035 = vrot.lane.b32.xlu0 %v4047_v59, %s3214_s8 }
 0x20a   : > { %v1253_v15 = vpop.permute.xlu1 %1252  ;;  %v1251_v16 = vpop.permute.xlu0 %1250 }
 0x20b   : > { %1323 = vst.msk [vmem:[#allocation3 + $0x48] sm:$0x1f] %vm1314_vm2, %v1253_v15 }
 0x20c   : > { %1322 = vst.msk [vmem:[#allocation3 + $0x40] sm:$0xff] %vm1312_vm3, %v1251_v16  ;;  %1719 = vrot.lane.b32.xlu1 %v4062_v0, %s3211_s6  ;;  %1476 = vrot.lane.b32.xlu0 %v4107_v41, %s3209_s26 }
 0x20e   : > { %v1257_v60 = vpop.permute.xlu1 %1256  ;;  %v1255_v17 = vpop.permute.xlu0 %1254 }
 0x20f   : > { %1325 = vst.msk [vmem:[#allocation3 + $0x58] sm:$0x1f] %vm1314_vm2, %v1257_v60 }
 0x210   : > { %1324 = vst.msk [vmem:[#allocation3 + $0x50] sm:$0xff] %vm1312_vm3, %v1255_v17  ;;  %1580 = vrot.lane.b32.xlu1 %v4110_v42, %s3210_s30  ;;  %1721 = vrot.lane.b32.xlu0 %v4059_v63, %s3211_s6 }
 0x212   : > { %v1261_v59 = vpop.permute.xlu1 %1260  ;;  %v1259_v18 = vpop.permute.xlu0 %1258 }
 0x213   : > { %1327 = vst.msk [vmem:[#allocation3 + $0x68] sm:$0x1f] %vm1314_vm2, %v1261_v59 }
 0x214   : > { %1326 = vst.msk [vmem:[#allocation3 + $0x60] sm:$0xff] %vm1312_vm3, %v1259_v18  ;;  %1825 = vrot.lane.b32.xlu1 %v4062_v0, %s3212_s13  ;;  %1582 = vrot.lane.b32.xlu0 %v4107_v41, %s3210_s30 }
 0x216   : > { %v1265_v19 = vpop.permute.xlu1 %1264  ;;  %v1263_v20 = vpop.permute.xlu0 %1262 }
 0x217   : > { %1329 = vst.msk [vmem:[#allocation3 + $0x78] sm:$0x1f] %vm1314_vm2, %v1265_v19 }
 0x218   : > { %1328 = vst.msk [vmem:[#allocation3 + $0x70] sm:$0xff] %vm1312_vm3, %v1263_v20  ;;  %1458 = vrot.lane.b32.xlu1 %v4062_v0, %s3209_s26  ;;  %1827 = vrot.lane.b32.xlu0 %v4059_v63, %s3212_s13 }
 0x21a   : > { %v1269_v42 = vpop.permute.xlu1 %1268  ;;  %v1267_v21 = vpop.permute.xlu0 %1266 }
 0x21b   : > { %1331 = vst.msk [vmem:[#allocation3 + $0x88] sm:$0x1f] %vm1314_vm2, %v1269_v42 }
 0x21c   : > { %1330 = vst.msk [vmem:[#allocation3 + $0x80] sm:$0xff] %vm1312_vm3, %v1267_v21  ;;  %1739 = vrot.lane.b32.xlu1 %v4122_v46, %s3211_s6  ;;  %1460 = vrot.lane.b32.xlu0 %v4059_v63, %s3209_s26 }
 0x21e   : > { %v1273_v41 = vpop.permute.xlu1 %1272  ;;  %v1271_v22 = vpop.permute.xlu0 %1270 }
 0x21f   : > { %1333 = vst.msk [vmem:[#allocation3 + $0x98] sm:$0x1f] %vm1314_vm2, %v1273_v41 }
 0x220   : > { %1332 = vst.msk [vmem:[#allocation3 + $0x90] sm:$0xff] %vm1312_vm3, %v1271_v22  ;;  %1931 = vrot.lane.b32.xlu1 %v4062_v0, %s3213_s14  ;;  %1741 = vrot.lane.b32.xlu0 %v4119_v45, %s3211_s6 }
 0x222   : > { %v1277_v24 = vpop.permute.xlu1 %1276  ;;  %v1275_v25 = vpop.permute.xlu0 %1274 }
 0x223   : > { %1335 = vst.msk [vmem:[#allocation3 + $0xa8] sm:$0x1f] %vm1314_vm2, %v1277_v24 }
 0x224   : > { %1334 = vst.msk [vmem:[#allocation3 + $0xa0] sm:$0xff] %vm1312_vm3, %v1275_v25  ;;  %1372 = vrot.lane.b32.xlu1 %v4122_v46, %s3208_s25  ;;  %1933 = vrot.lane.b32.xlu0 %v4059_v63, %s3213_s14 }
 0x226   : > { %v1281_v26 = vpop.permute.xlu1 %1280  ;;  %v1279_v57 = vpop.permute.xlu0 %1278 }
 0x227   : > { %1337 = vst.msk [vmem:[#allocation3 + $0xb8] sm:$0x1f] %vm1314_vm2, %v1281_v26 }
 0x228   : > { %1336 = vst.msk [vmem:[#allocation3 + $0xb0] sm:$0xff] %vm1312_vm3, %v1279_v57  ;;  %1564 = vrot.lane.b32.xlu1 %v4062_v0, %s3210_s30  ;;  %1374 = vrot.lane.b32.xlu0 %v4119_v45, %s3208_s25 }
 0x22a   : > { %v1285_v58 = vpop.permute.xlu1 %1284  ;;  %v1283_v23 = vpop.permute.xlu0 %1282 }
 0x22b   : > { %1339 = vst.msk [vmem:[#allocation3 + $0xc8] sm:$0x1f] %vm1314_vm2, %v1285_v58  ;;  %vm2109_vm2 = vcmask 523744  }
 0x22c   : > { %1338 = vst.msk [vmem:[#allocation3 + $0xc0] sm:$0xff] %vm1312_vm3, %v1283_v23  ;;  %1845 = vrot.lane.b32.xlu1 %v4122_v46, %s3212_s13  ;;  %1566 = vrot.lane.b32.xlu0 %v4059_v63, %s3210_s30 }
 0x22e   : > { %v1343_v61 = vpop.permute.xlu1 %1342  ;;  %v1341_v62 = vpop.permute.xlu0 %1340 }
 0x22f   : > { %1421 = vst.msk [vmem:[#allocation3 + $0x7] sm:$0x3f] %vm1420_vm4, %v1343_v61 }
 0x230   : > { %1419 = vst.msk [vmem:[#allocation3 - $0x1] sm:$0xfe] %vm1418_vm5, %v1341_v62  ;;  %2037 = vrot.lane.b32.xlu1 %v4062_v0, %s3214_s8  ;;  %1847 = vrot.lane.b32.xlu0 %v4119_v45, %s3212_s13 }
 0x232   : > { %v1347_v2 = vpop.permute.xlu1 %1346  ;;  %v1345_v4 = vpop.permute.xlu0 %1344 }
 0x233   : > { %1423 = vst.msk [vmem:[#allocation3 + $0x17] sm:$0x3f] %vm1420_vm4, %v1347_v2 }
 0x234   : > { %1422 = vst.msk [vmem:[#allocation3 + $0xf] sm:$0xfe] %vm1418_vm5, %v1345_v4  ;;  %1478 = vrot.lane.b32.xlu1 %v4122_v46, %s3209_s26  ;;  %2039 = vrot.lane.b32.xlu0 %v4059_v63, %s3214_s8 }
 0x236   : > { %v1351_v29 = vpop.permute.xlu1 %1350  ;;  %v1349_v30 = vpop.permute.xlu0 %1348 }
 0x237   : > { %1425 = vst.msk [vmem:[#allocation3 + $0x27] sm:$0x3f] %vm1420_vm4, %v1351_v29 }
 0x238   : > { %1424 = vst.msk [vmem:[#allocation3 + $0x1f] sm:$0xfe] %vm1418_vm5, %v1349_v30  ;;  %1723 = vrot.lane.b32.xlu1 %v4074_v28, %s3211_s6  ;;  %1480 = vrot.lane.b32.xlu0 %v4119_v45, %s3209_s26 }
 0x23a   : > { %v1355_v0 = vpop.permute.xlu1 %1354  ;;  %v1353_v35 = vpop.permute.xlu0 %1352 }
 0x23b   : > { %1427 = vst.msk [vmem:[#allocation3 + $0x37] sm:$0x3f] %vm1420_vm4, %v1355_v0 }
 0x23c   : > { %1426 = vst.msk [vmem:[#allocation3 + $0x2f] sm:$0xfe] %vm1418_vm5, %v1353_v35  ;;  %1951 = vrot.lane.b32.xlu1 %v4122_v46, %s3213_s14  ;;  %1725 = vrot.lane.b32.xlu0 %v4071_v27, %s3211_s6 }
 0x23e   : > { %v1447_v63 = vpop.permute.xlu1 %1446  ;;  %v1357_v36 = vpop.permute.xlu0 %1356 }
 0x23f   : > { %1525 = vst.msk [vmem:[#allocation3 - $0x2] sm:$0xfc] %vm1524_vm6, %v1447_v63 }
 0x240   : > { %1428 = vst.msk [vmem:[#allocation3 + $0x3f] sm:$0xfe] %vm1418_vm5, %v1357_v36  ;;  %1358 = vrot.lane.b32.xlu1 %v4071_v27, %s3208_s25  ;;  %1953 = vrot.lane.b32.xlu0 %v4119_v45, %s3213_s14 }
 0x242   : > { %v1553_v39 = vpop.permute.xlu1 %1552  ;;  %v1449_v40 = vpop.permute.xlu0 %1448 }
 0x243   : > { %1631 = vst.msk [vmem:[#allocation3 - $0x3] sm:$0xf8] %vm1630_vm7, %v1553_v39 }
 0x244   : > { %1527 = vst.msk [vmem:[#allocation3 + $0x6] sm:$0x7f] %vm1526_vm8, %v1449_v40  ;;  %1586 = vrot.lane.b32.xlu1 %v4119_v45, %s3210_s30  ;;  %1584 = vrot.lane.b32.xlu0 %v4122_v46, %s3210_s30 }
 0x246   : > { %v1712_v43 = vpop.permute.xlu1 %1711  ;;  %v1555_v44 = vpop.permute.xlu0 %1554 }
 0x247   : > { %1633 = vst.msk [vmem:[#allocation3 + $0x5] sm:$0xff] %vm1632_vm9, %v1555_v44 }
 0x248   : > { %1831 = vrot.lane.b32.xlu1 %v4071_v27, %s3212_s13  ;;  %1829 = vrot.lane.b32.xlu0 %v4074_v28, %s3212_s13  ;;  %1790 = vst.msk [vmem:[#allocation3] sm:$0xff] %vm1789_vm10, %v1712_v43 }
 0x24a   : > { %v1818_v47 = vpop.permute.xlu1 %1817  ;;  %v1714_v48 = vpop.permute.xlu0 %1713 }
 0x24b   : > { %1896 = vst.msk [vmem:[#allocation3 - $0x1] sm:$0xfe] %vm1895_vm11, %v1818_v47 }
 0x24c   : > { %1792 = vst.msk [vmem:[#allocation3 + $0x8] sm:$0x1f] %vm1791_vm12, %v1714_v48  ;;  %2059 = vrot.lane.b32.xlu1 %v4119_v45, %s3214_s8  ;;  %2057 = vrot.lane.b32.xlu0 %v4122_v46, %s3214_s8 }
 0x24e   : > { %v1451_v51 = vpop.permute.xlu1 %1450  ;;  %v1820_v52 = vpop.permute.xlu0 %1819 }
 0x24f   : > { %1528 = vst.msk [vmem:[#allocation3 + $0xe] sm:$0xfc] %vm1524_vm6, %v1451_v51 }
 0x250   : > { %1898 = vst.msk [vmem:[#allocation3 + $0x7] sm:$0x3f] %vm1897_vm13, %v1820_v52  ;;  %1464 = vrot.lane.b32.xlu1 %v4071_v27, %s3209_s26  ;;  %1462 = vrot.lane.b32.xlu0 %v4074_v28, %s3209_s26 }
 0x252   : > { %v1924_v1 = vpop.permute.xlu1 %1923  ;;  %v1453_v3 = vpop.permute.xlu0 %1452 }
 0x253   : > { %2002 = vst.msk [vmem:[#allocation3 - $0x2] sm:$0xfc] %vm2001_vm14, %v1924_v1 }
 0x254   : > { %1529 = vst.msk [vmem:[#allocation3 + $0x16] sm:$0x7f] %vm1526_vm8, %v1453_v3  ;;  %1745 = vrot.lane.b32.xlu1 %v4131_v49, %s3211_s6  ;;  %1743 = vrot.lane.b32.xlu0 %v4134_v50, %s3211_s6 }
 0x256   : > { %v1557_v45 = vpop.permute.xlu1 %1556  ;;  %v1926_v46 = vpop.permute.xlu0 %1925 }
 0x257   : > { %1634 = vst.msk [vmem:[#allocation3 + $0xd] sm:$0xf8] %vm1630_vm7, %v1557_v45  ;;  %v4593_v45 = vld [vmem:[%s3396_s9 + $0xd8] sm:$0xff] }
 0x258   : > { %2004 = vst.msk [vmem:[#allocation3 + $0x6] sm:$0x7f] %vm2003_vm15, %v1926_v46  ;;  %1937 = vrot.lane.b32.xlu1 %v4071_v27, %s3213_s14  ;;  %1935 = vrot.lane.b32.xlu0 %v4074_v28, %s3213_s14  ;;  %v4596_v46 = vld [vmem:[%s3396_s9 + $0xd0] sm:$0xff] }
 0x25a   : > { %v2030_v5 = vpop.permute.xlu1 %2029  ;;  %v1559_v6 = vpop.permute.xlu0 %1558 }
 0x25b   : > { %2108 = vst.msk [vmem:[#allocation3 - $0x3] sm:$0xf8] %vm2107_vm1, %v2030_v5 }
 0x25c   : > { %1635 = vst.msk [vmem:[#allocation3 + $0x15] sm:$0xff] %vm1632_vm9, %v1559_v6  ;;  %1378 = vrot.lane.b32.xlu1 %v4131_v49, %s3208_s25  ;;  %1376 = vrot.lane.b32.xlu0 %v4134_v50, %s3208_s25 }
 0x25e   : > { %v1716_v56 = vpop.permute.xlu1 %1715  ;;  %v2032_v7 = vpop.permute.xlu0 %2031 }
 0x25f   : > { %1793 = vst.msk [vmem:[#allocation3 + $0x10] sm:$0xff] %vm1789_vm10, %v1716_v56 }
 0x260   : > { %2110 = vst.msk [vmem:[#allocation3 + $0x5] sm:$0xff] %vm2109_vm2, %v2032_v7  ;;  %1570 = vrot.lane.b32.xlu1 %v4071_v27, %s3210_s30  ;;  %1568 = vrot.lane.b32.xlu0 %v4074_v28, %s3210_s30 }
 0x262   : > { %v1822_v55 = vpop.permute.xlu1 %1821  ;;  %v1718_v8 = vpop.permute.xlu0 %1717 }
 0x263   : > { %1899 = vst.msk [vmem:[#allocation3 + $0xf] sm:$0xfe] %vm1895_vm11, %v1822_v55 }
 0x264   : > { %1794 = vst.msk [vmem:[#allocation3 + $0x18] sm:$0x1f] %vm1791_vm12, %v1718_v8  ;;  %1851 = vrot.lane.b32.xlu1 %v4131_v49, %s3212_s13  ;;  %1849 = vrot.lane.b32.xlu0 %v4134_v50, %s3212_s13 }
 0x266   : > { %v1455_v9 = vpop.permute.xlu1 %1454  ;;  %v1824_v10 = vpop.permute.xlu0 %1823 }
 0x267   : > { %v2135_v11 = vld [vmem:[#allocation3] sm:$0xff]  ;;  %v2136_v12 = vld [vmem:[#allocation3 + $0x8] sm:$0xff]  ;;  %1530 = vst.msk [vmem:[#allocation3 + $0x1e] sm:$0xfc] %vm1524_vm6, %v1455_v9  ;;  %v3071_v9 = vld [vmem:[%s3396_s9 + $0xd8] sm:$0xff] }
 0x268   : > { %1900 = vst.msk [vmem:[#allocation3 + $0x17] sm:$0x3f] %vm1897_vm13, %v1824_v10  ;;  %2940 = vmatprep.mubr.msk.f32.mxu0 %vm240_vm0, %v2135_v11  ;;  %2043 = vrot.lane.b32.xlu1 %v4071_v27, %s3214_s8  ;;  %v3072_v10 = vld [vmem:[%s3396_s9 + $0xd0] sm:$0xff] }
 0x269   : > { %2041 = vrot.lane.b32.xlu0 %v4074_v28, %s3214_s8  ;;  %2941 = vmatmul.mubr.msk.f32.vlgmr.msra.gmra.mrb[0].mxu0 %vm240_vm0, %v2136_v12 }
 0x26a   : > { %v1928_v31 = vpop.permute.xlu1 %1927  ;;  %v1457_v32 = vpop.permute.xlu0 %1456 }
 0x26b   : > { %2005 = vst.msk [vmem:[#allocation3 + $0xe] sm:$0xfc] %vm2001_vm14, %v1928_v31 }
 0x26c   : > { %1531 = vst.msk [vmem:[#allocation3 + $0x26] sm:$0x7f] %vm1526_vm8, %v1457_v32  ;;  %1484 = vrot.lane.b32.xlu1 %v4131_v49, %s3209_s26 }
 0x26d   : > { %1482 = vrot.lane.b32.xlu0 %v4134_v50, %s3209_s26 }
 0x26e   : > { %v1369_v13 = vpop.permute.xlu1 %1368  ;;  %v1930_v14 = vpop.permute.xlu0 %1929 }
 0x26f   : > { %1434 = vst.msk [vmem:[#allocation3 + $0x6f] sm:$0xfe] %vm1418_vm5, %v1369_v13 }
 0x270   : > { %2006 = vst.msk [vmem:[#allocation3 + $0x16] sm:$0x7f] %vm2003_vm15, %v1930_v14  ;;  %1729 = vrot.lane.b32.xlu1 %v4083_v33, %s3211_s6 }
 0x271   : > { %1727 = vrot.lane.b32.xlu0 %v4086_v34, %s3211_s6 }
 0x272   : > { %v1561_v27 = vpop.permute.xlu1 %1560  ;;  %v1371_v28 = vpop.permute.xlu0 %1370 }
 0x273   : > { %1636 = vst.msk [vmem:[#allocation3 + $0x1d] sm:$0xf8] %vm1630_vm7, %v1561_v27 }
 0x274   : > { %1435 = vst.msk [vmem:[#allocation3 + $0x77] sm:$0x3f] %vm1420_vm4, %v1371_v28  ;;  %1957 = vrot.lane.b32.xlu1 %v4131_v49, %s3213_s14 }
 0x275   : > { %1955 = vrot.lane.b32.xlu0 %v4134_v50, %s3213_s14 }
 0x276   : > { %v2034_v15 = vpop.permute.xlu1 %2033  ;;  %v1563_v16 = vpop.permute.xlu0 %1562 }
 0x277   : > { %2111 = vst.msk [vmem:[#allocation3 + $0xd] sm:$0xf8] %vm2107_vm1, %v2034_v15  ;;  %v4635_v15 = vld [vmem:[%s3396_s9 + $0x98] sm:$0xff] }
 0x278   : > { %1637 = vst.msk [vmem:[#allocation3 + $0x25] sm:$0xff] %vm1632_vm9, %v1563_v16  ;;  %1362 = vrot.lane.b32.xlu1 %v4083_v33, %s3208_s25  ;;  %v4638_v16 = vld [vmem:[%s3396_s9 + $0x90] sm:$0xff] }
 0x279   : > { %1360 = vrot.lane.b32.xlu0 %v4086_v34, %s3208_s25 }
 0x27a   : > { %v1475_v60 = vpop.permute.xlu1 %1474  ;;  %v2036_v17 = vpop.permute.xlu0 %2035 }
 0x27b   : > { %1540 = vst.msk [vmem:[#allocation3 + $0x6e] sm:$0xfc] %vm1524_vm6, %v1475_v60 }
 0x27c   : > { %2112 = vst.msk [vmem:[#allocation3 + $0x15] sm:$0xff] %vm2109_vm2, %v2036_v17  ;;  %1590 = vrot.lane.b32.xlu1 %v4131_v49, %s3210_s30 }
 0x27d   : > { %1588 = vrot.lane.b32.xlu0 %v4134_v50, %s3210_s30 }
 0x27e   : > { %v1720_v59 = vpop.permute.xlu1 %1719  ;;  %v1477_v18 = vpop.permute.xlu0 %1476 }
 0x27f   : > { %1795 = vst.msk [vmem:[#allocation3 + $0x20] sm:$0xff] %vm1789_vm10, %v1720_v59 }
 0x280   : > { %1541 = vst.msk [vmem:[#allocation3 + $0x76] sm:$0x7f] %vm1526_vm8, %v1477_v18  ;;  %1835 = vrot.lane.b32.xlu1 %v4083_v33, %s3212_s13 }
 0x281   : > { %1833 = vrot.lane.b32.xlu0 %v4086_v34, %s3212_s13 }
 0x282   : > { %v1581_v19 = vpop.permute.xlu1 %1580  ;;  %v1722_v20 = vpop.permute.xlu0 %1721 }
 0x283   : > { %v2137_v42 = vld [vmem:[#allocation3 + $0x10] sm:$0xff]  ;;  %v2138_v21 = vld [vmem:[#allocation3 + $0x18] sm:$0xff]  ;;  %1646 = vst.msk [vmem:[#allocation3 + $0x6d] sm:$0xf8] %vm1630_vm7, %v1581_v19 }
 0x284   : > { %1796 = vst.msk [vmem:[#allocation3 + $0x28] sm:$0x1f] %vm1791_vm12, %v1722_v20  ;;  %2943 = vmatprep.mubr.msk.f32.mxu0 %vm240_vm0, %v2137_v42  ;;  %2063 = vrot.lane.b32.xlu1 %v4131_v49, %s3214_s8  ;;  %v2475_v42 = vld [vmem:[#allocation2] ss:$2 sm:$0xff] }
 0x285   : > { %2061 = vrot.lane.b32.xlu0 %v4134_v50, %s3214_s8  ;;  %2944 = vmatmul.mubr.msk.f32.gmra.mrb[2].mxu0 %vm240_vm0, %v2138_v21  ;;  %v2477_v21 = vld [vmem:[#allocation2 + $0x10] ss:$2 sm:$0xff] }
 0x286   : > { %v1826_v41 = vpop.permute.xlu1 %1825  ;;  %v1583_v22 = vpop.permute.xlu0 %1582 }
 0x287   : > { %1901 = vst.msk [vmem:[#allocation3 + $0x1f] sm:$0xfe] %vm1895_vm11, %v1826_v41  ;;  %v2507_v41 = vld [vmem:[#allocation2 + $0x1] ss:$2 sm:$0xff] }
 0x288   : > { %1647 = vst.msk [vmem:[#allocation3 + $0x75] sm:$0xff] %vm1632_vm9, %v1583_v22  ;;  %1468 = vrot.lane.b32.xlu1 %v4083_v33, %s3209_s26  ;;  %v2509_v22 = vld [vmem:[#allocation2 + $0x11] ss:$2 sm:$0xff] }
 0x289   : > { %1466 = vrot.lane.b32.xlu0 %v4086_v34, %s3209_s26 }
 0x28a   : > { %v1459_v24 = vpop.permute.xlu1 %1458  ;;  %v1828_v25 = vpop.permute.xlu0 %1827 }
 0x28b   : > { %1532 = vst.msk [vmem:[#allocation3 + $0x2e] sm:$0xfc] %vm1524_vm6, %v1459_v24  ;;  %v2538_v24 = vmax.f32 %v2475_v42, %v2507_v41 }
 0x28c   : > { %1902 = vst.msk [vmem:[#allocation3 + $0x27] sm:$0x3f] %vm1897_vm13, %v1828_v25  ;;  %1749 = vrot.lane.b32.xlu1 %v4143_v53, %s3211_s6  ;;  %v2539_v25 = vmax.f32 %v2477_v21, %v2509_v22 }
 0x28d   : > { %1747 = vrot.lane.b32.xlu0 %v4146_v54, %s3211_s6 }
 0x28e   : > { %v1740_v49 = vpop.permute.xlu1 %1739  ;;  %v1461_v50 = vpop.permute.xlu0 %1460 }
 0x28f   : > { %1805 = vst.msk [vmem:[#allocation3 + $0x70] sm:$0xff] %vm1789_vm10, %v1740_v49 }
 0x290   : > { %1533 = vst.msk [vmem:[#allocation3 + $0x36] sm:$0x7f] %vm1526_vm8, %v1461_v50  ;;  %1941 = vrot.lane.b32.xlu1 %v4083_v33, %s3213_s14 }
 0x291   : > { %1939 = vrot.lane.b32.xlu0 %v4086_v34, %s3213_s14 }
 0x292   : > { %v1932_v26 = vpop.permute.xlu1 %1931  ;;  %v1742_v57 = vpop.permute.xlu0 %1741 }
 0x293   : > { %2007 = vst.msk [vmem:[#allocation3 + $0x1e] sm:$0xfc] %vm2001_vm14, %v1932_v26  ;;  %v4660_v26 = vmax.f32 %v2538_v24, %v2539_v25 }
 0x294   : > { %1806 = vst.msk [vmem:[#allocation3 + $0x78] sm:$0x1f] %vm1791_vm12, %v1742_v57  ;;  %1382 = vrot.lane.b32.xlu1 %v4143_v53, %s3208_s25 }
 0x295   : > { %1380 = vrot.lane.b32.xlu0 %v4146_v54, %s3208_s25  ;;  %2562 = vst [vmem:[%s4664_s15] sm:$0xff] %v4660_v26 }
 0x296   : > { %v1373_v58 = vpop.permute.xlu1 %1372  ;;  %v1934_v23 = vpop.permute.xlu0 %1933 }
 0x297   : > { %1436 = vst.msk [vmem:[#allocation3 + $0x7f] sm:$0xfe] %vm1418_vm5, %v1373_v58 }
 0x298   : > { %2008 = vst.msk [vmem:[#allocation3 + $0x26] sm:$0x7f] %vm2003_vm15, %v1934_v23  ;;  %1574 = vrot.lane.b32.xlu1 %v4083_v33, %s3210_s30 }
 0x299   : > { %1572 = vrot.lane.b32.xlu0 %v4086_v34, %s3210_s30 }
 0x29a   : > { %v1565_v61 = vpop.permute.xlu1 %1564  ;;  %v1375_v62 = vpop.permute.xlu0 %1374 }
 0x29b   : > { %1638 = vst.msk [vmem:[#allocation3 + $0x2d] sm:$0xf8] %vm1630_vm7, %v1565_v61 }
 0x29c   : > { %1437 = vst.msk [vmem:[#allocation3 + $0x87] sm:$0x3f] %vm1420_vm4, %v1375_v62  ;;  %1855 = vrot.lane.b32.xlu1 %v4143_v53, %s3212_s13  ;;  %v2851_v62 = vld [vmem:[%s3396_s9 + $0xe8] sm:$0xff] }
 0x29d   : > { %1853 = vrot.lane.b32.xlu0 %v4146_v54, %s3212_s13 }
 0x29e   : > { %v1846_v2 = vpop.permute.xlu1 %1845  ;;  %v1567_v4 = vpop.permute.xlu0 %1566 }
 0x29f   : > { %1911 = vst.msk [vmem:[#allocation3 + $0x6f] sm:$0xfe] %vm1895_vm11, %v1846_v2  ;;  %v2850_v2 = vld [vmem:[%s3396_s9 + $0xe0] sm:$0xff] }
 0x2a0   : > { %1639 = vst.msk [vmem:[#allocation3 + $0x35] sm:$0xff] %vm1632_vm9, %v1567_v4  ;;  %2047 = vrot.lane.b32.xlu1 %v4083_v33, %s3214_s8 }
 0x2a1   : > { %2045 = vrot.lane.b32.xlu0 %v4086_v34, %s3214_s8 }
 0x2a2   : > { %v2038_v29 = vpop.permute.xlu1 %2037  ;;  %v1848_v30 = vpop.permute.xlu0 %1847 }
 0x2a3   : > { %2113 = vst.msk [vmem:[#allocation3 + $0x1d] sm:$0xf8] %vm2107_vm1, %v2038_v29 }
 0x2a4   : > { %1912 = vst.msk [vmem:[#allocation3 + $0x77] sm:$0x3f] %vm1897_vm13, %v1848_v30  ;;  %1488 = vrot.lane.b32.xlu1 %v4143_v53, %s3209_s26 }
 0x2a5   : > { %1486 = vrot.lane.b32.xlu0 %v4146_v54, %s3209_s26 }
 0x2a6   : > { %v1479_v0 = vpop.permute.xlu1 %1478  ;;  %v2040_v35 = vpop.permute.xlu0 %2039 }
 0x2a7   : > { %1542 = vst.msk [vmem:[#allocation3 + $0x7e] sm:$0xfc] %vm1524_vm6, %v1479_v0 }
 0x2a8   : > { %2114 = vst.msk [vmem:[#allocation3 + $0x25] sm:$0xff] %vm2109_vm2, %v2040_v35  ;;  %1733 = vrot.lane.b32.xlu1 %v4095_v37, %s3211_s6 }
 0x2a9   : > { %1731 = vrot.lane.b32.xlu0 %v4098_v38, %s3211_s6 }
 0x2aa   : > { %v1724_v33 = vpop.permute.xlu1 %1723  ;;  %v1481_v34 = vpop.permute.xlu0 %1480 }
 0x2ab   : > { %1797 = vst.msk [vmem:[#allocation3 + $0x30] sm:$0xff] %vm1789_vm10, %v1724_v33 }
 0x2ac   : > { %1543 = vst.msk [vmem:[#allocation3 + $0x86] sm:$0x7f] %vm1526_vm8, %v1481_v34  ;;  %1961 = vrot.lane.b32.xlu1 %v4143_v53, %s3213_s14  ;;  %v3073_v34 = vld [vmem:[%s3396_s9 + $0xe8] sm:$0xff] }
 0x2ad   : > { %1959 = vrot.lane.b32.xlu0 %v4146_v54, %s3213_s14 }
 0x2ae   : > { %v1952_v63 = vpop.permute.xlu1 %1951  ;;  %v1726_v36 = vpop.permute.xlu0 %1725 }
 0x2af   : > { %v2139_v39 = vld [vmem:[#allocation3 + $0x20] sm:$0xff]  ;;  %v2140_v40 = vld [vmem:[#allocation3 + $0x28] sm:$0xff]  ;;  %2017 = vst.msk [vmem:[#allocation3 + $0x6e] sm:$0xfc] %vm2001_vm14, %v1952_v63 }
 0x2b0   : > { %1798 = vst.msk [vmem:[#allocation3 + $0x38] sm:$0x1f] %vm1791_vm12, %v1726_v36  ;;  %2946 = vmatprep.mubr.msk.f32.mxu0 %vm240_vm0, %v2139_v39  ;;  %1366 = vrot.lane.b32.xlu1 %v4095_v37, %s3208_s25  ;;  %v3074_v63 = vld [vmem:[%s3396_s9 + $0xe0] sm:$0xff] }
 0x2b1   : > { %1364 = vrot.lane.b32.xlu0 %v4098_v38, %s3208_s25  ;;  %2947 = vmatmul.mubr.msk.f32.gmra.mrb[4].mxu0 %vm240_vm0, %v2140_v40 }
 0x2b2   : > { %v1359_v43 = vpop.permute.xlu1 %1358  ;;  %v1954_v44 = vpop.permute.xlu0 %1953 }
 0x2b3   : > { %1429 = vst.msk [vmem:[#allocation3 + $0x47] sm:$0x3f] %vm1420_vm4, %v1359_v43 }
 0x2b4   : > { %2018 = vst.msk [vmem:[#allocation3 + $0x76] sm:$0x7f] %vm2003_vm15, %v1954_v44  ;;  %1594 = vrot.lane.b32.xlu1 %v4143_v53, %s3210_s30 }
 0x2b5   : > { %1592 = vrot.lane.b32.xlu0 %v4146_v54, %s3210_s30 }
 0x2b6   : > { %v1587_v47 = vpop.permute.xlu1 %1586  ;;  %v1585_v48 = vpop.permute.xlu0 %1584 }
 0x2b7   : > { %1649 = vst.msk [vmem:[#allocation3 + $0x85] sm:$0xff] %vm1632_vm9, %v1587_v47 }
 0x2b8   : > { %1648 = vst.msk [vmem:[#allocation3 + $0x7d] sm:$0xf8] %vm1630_vm7, %v1585_v48  ;;  %1839 = vrot.lane.b32.xlu1 %v4095_v37, %s3212_s13  ;;  %v3069_v37 = vld [vmem:[%s3396_s9 + $0x88] sm:$0xff] }
 0x2b9   : > { %1837 = vrot.lane.b32.xlu0 %v4098_v38, %s3212_s13  ;;  %v3070_v38 = vld [vmem:[%s3396_s9 + $0x80] sm:$0xff] }
 0x2ba   : > { %v1832_v51 = vpop.permute.xlu1 %1831  ;;  %v1830_v52 = vpop.permute.xlu0 %1829 }
 0x2bb   : > { %1904 = vst.msk [vmem:[#allocation3 + $0x37] sm:$0x3f] %vm1897_vm13, %v1832_v51 }
 0x2bc   : > { %1903 = vst.msk [vmem:[#allocation3 + $0x2f] sm:$0xfe] %vm1895_vm11, %v1830_v52  ;;  %2067 = vrot.lane.b32.xlu1 %v4143_v53, %s3214_s8 }
 0x2bd   : > { %2065 = vrot.lane.b32.xlu0 %v4146_v54, %s3214_s8 }
 0x2be   : > { %v2060_v1 = vpop.permute.xlu1 %2059  ;;  %v2058_v3 = vpop.permute.xlu0 %2057 }
 0x2bf   : > { %2124 = vst.msk [vmem:[#allocation3 + $0x75] sm:$0xff] %vm2109_vm2, %v2060_v1 }
 0x2c0   : > { %2123 = vst.msk [vmem:[#allocation3 + $0x6d] sm:$0xf8] %vm2107_vm1, %v2058_v3  ;;  %1472 = vrot.lane.b32.xlu1 %v3069_v37, %s3209_s26 }
 0x2c1   : > { %1470 = vrot.lane.b32.xlu0 %v3070_v38, %s3209_s26 }
 0x2c2   : > { %v1465_v53 = vpop.permute.xlu1 %1464  ;;  %v1463_v5 = vpop.permute.xlu0 %1462 }
 0x2c3   : > { %1535 = vst.msk [vmem:[#allocation3 + $0x46] sm:$0x7f] %vm1526_vm8, %v1465_v53  ;;  %v2852_v53 = vld [vmem:[%s3396_s9 + $0xf0] sm:$0xff] }
 0x2c4   : > { %1534 = vst.msk [vmem:[#allocation3 + $0x3e] sm:$0xfc] %vm1524_vm6, %v1463_v5  ;;  %1753 = vrot.lane.b32.xlu1 %v4593_v45, %s3211_s6 }
 0x2c5   : > { %1751 = vrot.lane.b32.xlu0 %v4596_v46, %s3211_s6 }
 0x2c6   : > { %v1746_v54 = vpop.permute.xlu1 %1745  ;;  %v1744_v6 = vpop.permute.xlu0 %1743  ;;  %v2150_v7 = vld [vmem:[#allocation3 + $0x78] sm:$0xff] }
 0x2c7   : > { %v2149_v56 = vld [vmem:[#allocation3 + $0x70] sm:$0xff]  ;;  %1808 = vst.msk [vmem:[#allocation3 + $0x88] sm:$0x1f] %vm1791_vm12, %v1746_v54 }
 0x2c8   : > { %1807 = vst.msk [vmem:[#allocation3 + $0x80] sm:$0xff] %vm1789_vm10, %v1744_v6  ;;  %2961 = vmatprep.mubr.msk.f32.mxu1 %vm240_vm0, %v2149_v56  ;;  %1945 = vrot.lane.b32.xlu1 %v3069_v37, %s3213_s14 }
 0x2c9   : > { %1943 = vrot.lane.b32.xlu0 %v3070_v38, %s3213_s14  ;;  %2962 = vmatmul.mubr.msk.f32.vlgmr.msra.gmra.mrb[0].mxu1 %vm240_vm0, %v2150_v7 }
 0x2ca   : > { %v1938_v55 = vpop.permute.xlu1 %1937  ;;  %v1936_v8 = vpop.permute.xlu0 %1935 }
 0x2cb   : > { %2010 = vst.msk [vmem:[#allocation3 + $0x36] sm:$0x7f] %vm2003_vm15, %v1938_v55 }
 0x2cc   : > { %2009 = vst.msk [vmem:[#allocation3 + $0x2e] sm:$0xfc] %vm2001_vm14, %v1936_v8  ;;  %1386 = vrot.lane.b32.xlu1 %v3071_v9, %s3208_s25 }
 0x2cd   : > { %1384 = vrot.lane.b32.xlu0 %v3072_v10, %s3208_s25 }
 0x2ce   : > { %v1379_v11 = vpop.permute.xlu1 %1378  ;;  %v1377_v12 = vpop.permute.xlu0 %1376 }
 0x2cf   : > { %1439 = vst.msk [vmem:[#allocation3 + $0x97] sm:$0x3f] %vm1420_vm4, %v1379_v11 }
 0x2d0   : > { %1438 = vst.msk [vmem:[#allocation3 + $0x8f] sm:$0xfe] %vm1418_vm5, %v1377_v12  ;;  %1578 = vrot.lane.b32.xlu1 %v3069_v37, %s3210_s30 }
 0x2d1   : > { %1576 = vrot.lane.b32.xlu0 %v3070_v38, %s3210_s30 }
 0x2d2   : > { %v1571_v31 = vpop.permute.xlu1 %1570  ;;  %v1569_v32 = vpop.permute.xlu0 %1568 }
 0x2d3   : > { %1641 = vst.msk [vmem:[#allocation3 + $0x45] sm:$0xff] %vm1632_vm9, %v1571_v31 }
 0x2d4   : > { %1640 = vst.msk [vmem:[#allocation3 + $0x3d] sm:$0xf8] %vm1630_vm7, %v1569_v32  ;;  %1859 = vrot.lane.b32.xlu1 %v4593_v45, %s3212_s13 }
 0x2d5   : > { %1857 = vrot.lane.b32.xlu0 %v4596_v46, %s3212_s13 }
 0x2d6   : > { %v1852_v13 = vpop.permute.xlu1 %1851  ;;  %v1850_v14 = vpop.permute.xlu0 %1849 }
 0x2d7   : > { %1914 = vst.msk [vmem:[#allocation3 + $0x87] sm:$0x3f] %vm1897_vm13, %v1852_v13 }
 0x2d8   : > { %1913 = vst.msk [vmem:[#allocation3 + $0x7f] sm:$0xfe] %vm1895_vm11, %v1850_v14  ;;  %2051 = vrot.lane.b32.xlu1 %v3069_v37, %s3214_s8 }
 0x2d9   : > { %2049 = vrot.lane.b32.xlu0 %v3070_v38, %s3214_s8 }
 0x2da   : > { %v2044_v27 = vpop.permute.xlu1 %2043 }
 0x2db   : > { %v2042_v28 = vpop.permute.xlu0 %2041  ;;  %2116 = vst.msk [vmem:[#allocation3 + $0x35] sm:$0xff] %vm2109_vm2, %v2044_v27 }
 0x2dc   : > { %2115 = vst.msk [vmem:[#allocation3 + $0x2d] sm:$0xf8] %vm2107_vm1, %v2042_v28  ;;  %1492 = vrot.lane.b32.xlu1 %v3071_v9, %s3209_s26 }
 0x2dd   : > { %1490 = vrot.lane.b32.xlu0 %v3072_v10, %s3209_s26 }
 0x2de   : > { %v1485_v60 = vpop.permute.xlu1 %1484 }
 0x2df   : > { %v1483_v17 = vpop.permute.xlu0 %1482  ;;  %1545 = vst.msk [vmem:[#allocation3 + $0x96] sm:$0x7f] %vm1526_vm8, %v1485_v60 }
 0x2e0   : > { %1544 = vst.msk [vmem:[#allocation3 + $0x8e] sm:$0xfc] %vm1524_vm6, %v1483_v17  ;;  %1737 = vrot.lane.b32.xlu1 %v4635_v15, %s3211_s6 }
 0x2e1   : > { %1735 = vrot.lane.b32.xlu0 %v4638_v16, %s3211_s6 }
 0x2e2   : > { %v1730_v59 = vpop.permute.xlu1 %1729  ;;  %v2142_v20 = vld [vmem:[#allocation3 + $0x38] sm:$0xff] }
 0x2e3   : > { %v1728_v18 = vpop.permute.xlu0 %1727  ;;  %v2141_v19 = vld [vmem:[#allocation3 + $0x30] sm:$0xff]  ;;  %1800 = vst.msk [vmem:[#allocation3 + $0x48] sm:$0x1f] %vm1791_vm12, %v1730_v59 }
 0x2e4   : > { %1799 = vst.msk [vmem:[#allocation3 + $0x40] sm:$0xff] %vm1789_vm10, %v1728_v18  ;;  %2949 = vmatprep.mubr.msk.f32.mxu0 %vm240_vm0, %v2141_v19  ;;  %1965 = vrot.lane.b32.xlu1 %v4593_v45, %s3213_s14 }
 0x2e5   : > { %1963 = vrot.lane.b32.xlu0 %v4596_v46, %s3213_s14  ;;  %2950 = vmatmul.mubr.msk.f32.gmra.mrb[6].mxu0 %vm240_vm0, %v2142_v20  ;;  %v4761_v20 = vld [vmem:[%s4992_s2] ss:$0 sm:$0xff] }
 0x2e6   : > { %v1958_v49 = vpop.permute.xlu1 %1957 }
 0x2e7   : > { %v1956_v50 = vpop.permute.xlu0 %1955  ;;  %2020 = vst.msk [vmem:[#allocation3 + $0x86] sm:$0x7f] %vm2003_vm15, %v1958_v49 }
 0x2e8   : > { %2019 = vst.msk [vmem:[#allocation3 + $0x7e] sm:$0xfc] %vm2001_vm14, %v1956_v50  ;;  %1598 = vrot.lane.b32.xlu1 %v3071_v9, %s3210_s30 }
 0x2e9   : > { %1596 = vrot.lane.b32.xlu0 %v3072_v10, %s3210_s30 }
 0x2ea   : > { %v1363_v57 = vpop.permute.xlu1 %1362 }
 0x2eb   : > { %v1361_v58 = vpop.permute.xlu0 %1360  ;;  %1431 = vst.msk [vmem:[#allocation3 + $0x57] sm:$0x3f] %vm1420_vm4, %v1363_v57 }
 0x2ec   : > { %1430 = vst.msk [vmem:[#allocation3 + $0x4f] sm:$0xfe] %vm1418_vm5, %v1361_v58  ;;  %1843 = vrot.lane.b32.xlu1 %v4635_v15, %s3212_s13 }
 0x2ed   : > { %1841 = vrot.lane.b32.xlu0 %v4638_v16, %s3212_s13 }
 0x2ee   : > { %v1591_v23 = vpop.permute.xlu1 %1590 }
 0x2ef   : > { %v1589_v61 = vpop.permute.xlu0 %1588  ;;  %1651 = vst.msk [vmem:[#allocation3 + $0x95] sm:$0xff] %vm1632_vm9, %v1591_v23 }
 0x2f0   : > { %1650 = vst.msk [vmem:[#allocation3 + $0x8d] sm:$0xf8] %vm1630_vm7, %v1589_v61  ;;  %2071 = vrot.lane.b32.xlu1 %v4593_v45, %s3214_s8 }
 0x2f1   : > { %2069 = vrot.lane.b32.xlu0 %v4596_v46, %s3214_s8  ;;  %v2853_v46 = vld [vmem:[%s3396_s9 + $0xf8] sm:$0xff] }
 0x2f2   : > { %v1836_v4 = vpop.permute.xlu1 %1835 }
 0x2f3   : > { %v1834_v29 = vpop.permute.xlu0 %1833  ;;  %1906 = vst.msk [vmem:[#allocation3 + $0x47] sm:$0x3f] %vm1897_vm13, %v1836_v4 }
 0x2f4   : > { %1905 = vst.msk [vmem:[#allocation3 + $0x3f] sm:$0xfe] %vm1895_vm11, %v1834_v29  ;;  %1757 = vrot.lane.b32.xlu1 %v2851_v62, %s3211_s6 }
 0x2f5   : > { %1755 = vrot.lane.b32.xlu0 %v2850_v2, %s3211_s6 }
 0x2f6   : > { %v2064_v30 = vpop.permute.xlu1 %2063 }
 0x2f7   : > { %v2062_v0 = vpop.permute.xlu0 %2061  ;;  %2126 = vst.msk [vmem:[#allocation3 + $0x85] sm:$0xff] %vm2109_vm2, %v2064_v30 }
 0x2f8   : > { %2125 = vst.msk [vmem:[#allocation3 + $0x7d] sm:$0xf8] %vm2107_vm1, %v2062_v0  ;;  %1949 = vrot.lane.b32.xlu1 %v4635_v15, %s3213_s14 }
 0x2f9   : > { %1947 = vrot.lane.b32.xlu0 %v4638_v16, %s3213_s14 }
 0x2fa   : > { %v1469_v35 = vpop.permute.xlu1 %1468 }
 0x2fb   : > { %v1467_v33 = vpop.permute.xlu0 %1466  ;;  %1537 = vst.msk [vmem:[#allocation3 + $0x56] sm:$0x7f] %vm1526_vm8, %v1469_v35 }
 0x2fc   : > { %1536 = vst.msk [vmem:[#allocation3 + $0x4e] sm:$0xfc] %vm1524_vm6, %v1467_v33  ;;  %1390 = vrot.lane.b32.xlu1 %v3073_v34, %s3208_s25 }
 0x2fd   : > { %1388 = vrot.lane.b32.xlu0 %v3074_v63, %s3208_s25 }
 0x2fe   : > { %v1750_v36 = vpop.permute.xlu1 %1749  ;;  %v2152_v43 = vld [vmem:[#allocation3 + $0x88] sm:$0xff] }
 0x2ff   : > { %v1748_v39 = vpop.permute.xlu0 %1747  ;;  %v2151_v40 = vld [vmem:[#allocation3 + $0x80] sm:$0xff]  ;;  %1810 = vst.msk [vmem:[#allocation3 + $0x98] sm:$0x1f] %vm1791_vm12, %v1750_v36 }
 0x300   : > { %1809 = vst.msk [vmem:[#allocation3 + $0x90] sm:$0xff] %vm1789_vm10, %v1748_v39  ;;  %2964 = vmatprep.mubr.msk.f32.mxu1 %vm240_vm0, %v2151_v40  ;;  %1863 = vrot.lane.b32.xlu1 %v2851_v62, %s3212_s13 }
 0x301   : > { %1861 = vrot.lane.b32.xlu0 %v2850_v2, %s3212_s13  ;;  %2965 = vmatmul.mubr.msk.f32.gmra.mrb[2].mxu1 %vm240_vm0, %v2152_v43 }
 0x302   : > { %v1942_v44 = vpop.permute.xlu1 %1941 }
 0x303   : > { %v1940_v47 = vpop.permute.xlu0 %1939  ;;  %2012 = vst.msk [vmem:[#allocation3 + $0x46] sm:$0x7f] %vm2003_vm15, %v1942_v44 }
 0x304   : > { %2011 = vst.msk [vmem:[#allocation3 + $0x3e] sm:$0xfc] %vm2001_vm14, %v1940_v47  ;;  %2055 = vrot.lane.b32.xlu1 %v4635_v15, %s3214_s8 }
 0x305   : > { %2053 = vrot.lane.b32.xlu0 %v4638_v16, %s3214_s8 }
 0x306   : > { %v1383_v48 = vpop.permute.xlu1 %1382 }
 0x307   : > { %v1381_v51 = vpop.permute.xlu0 %1380  ;;  %1441 = vst.msk [vmem:[#allocation3 + $0xa7] sm:$0x3f] %vm1420_vm4, %v1383_v48 }
 0x308   : > { %1440 = vst.msk [vmem:[#allocation3 + $0x9f] sm:$0xfe] %vm1418_vm5, %v1381_v51  ;;  %1496 = vrot.lane.b32.xlu1 %v3073_v34, %s3209_s26 }
 0x309   : > { %1494 = vrot.lane.b32.xlu0 %v3074_v63, %s3209_s26  ;;  %s2628_s26 = sshll.u32 %s4664_s15, 4  ;;  %s4870_s26 = int_to_ptr.vmem [resolvable:$true] %s2628_s26 }
 0x30a   : > { %v1575_v52 = vpop.permute.xlu1 %1574  ;;  %s3075_s17 = scalar_lea.vmem %s4870_s26, 1024 }
 0x30b   : > { %v1573_v1 = vpop.permute.xlu0 %1572  ;;  %1643 = vst.msk [vmem:[#allocation3 + $0x55] sm:$0xff] %vm1632_vm9, %v1575_v52  ;;  %p3076_p11 = scmp.ne.s32.totalorder %s4870_s26, %s3075_s17 }
 0x30c   : > { %1642 = vst.msk [vmem:[#allocation3 + $0x4d] sm:$0xf8] %vm1630_vm7, %v1573_v1  ;;  %1969 = vrot.lane.b32.xlu1 %v2851_v62, %s3213_s14 }
 0x30d   : > { %1967 = vrot.lane.b32.xlu0 %v2850_v2, %s3213_s14  ;;  %p3077_p12 = pnand %p3076_p11, %p3289_p5 }
 0x30e   : > { %v1856_v3 = vpop.permute.xlu1 %1855 }
 0x30f   : > { %v1854_v37 = vpop.permute.xlu0 %1853  ;;  %1916 = vst.msk [vmem:[#allocation3 + $0x97] sm:$0x3f] %vm1897_vm13, %v1856_v3  ;;  %p3078_p13 = pneg %p3077_p12 }
 0x310   : > { %1915 = vst.msk [vmem:[#allocation3 + $0x8f] sm:$0xfe] %vm1895_vm11, %v1854_v37  ;;  %1602 = vrot.lane.b32.xlu1 %v3073_v34, %s3210_s30 }
 0x311   : > { %1600 = vrot.lane.b32.xlu0 %v3074_v63, %s3210_s30  ;;  %s2889_s30 = sshll.u32 %s3270_s22, 10 }
 0x312   : > { %v2048_v38 = vpop.permute.xlu1 %2047 }
 0x313   : > { %v2046_v45 = vpop.permute.xlu0 %2045  ;;  %2118 = vst.msk [vmem:[#allocation3 + $0x45] sm:$0xff] %vm2109_vm2, %v2048_v38 }
 0x314   : > { %2117 = vst.msk [vmem:[#allocation3 + $0x3d] sm:$0xf8] %vm2107_vm1, %v2046_v45  ;;  %2075 = vrot.lane.b32.xlu1 %v2851_v62, %s3214_s8 }
 0x315   : > { %2073 = vrot.lane.b32.xlu0 %v2850_v2, %s3214_s8 }
 0x316   : > { %v1489_v5 = vpop.permute.xlu1 %1488 }
 0x317   : > { %v1487_v54 = vpop.permute.xlu0 %1486  ;;  %1547 = vst.msk [vmem:[#allocation3 + $0xa6] sm:$0x7f] %vm1526_vm8, %v1489_v5 }
 0x318   : > { %1546 = vst.msk [vmem:[#allocation3 + $0x9e] sm:$0xfc] %vm1524_vm6, %v1487_v54  ;;  %1761 = vrot.lane.b32.xlu1 %v2853_v46, %s3211_s6 }
 0x319   : > { %1759 = vrot.lane.b32.xlu0 %v2852_v53, %s3211_s6 }
 0x31a   : > { %v1734_v6 = vpop.permute.xlu1 %1733  ;;  %v2144_v55 = vld [vmem:[#allocation3 + $0x48] sm:$0xff] }
 0x31b   : > { %v1732_v56 = vpop.permute.xlu0 %1731  ;;  %v2143_v7 = vld [vmem:[#allocation3 + $0x40] sm:$0xff]  ;;  %1802 = vst.msk [vmem:[#allocation3 + $0x58] sm:$0x1f] %vm1791_vm12, %v1734_v6 }
 0x31c   : > { %1801 = vst.msk [vmem:[#allocation3 + $0x50] sm:$0xff] %vm1789_vm10, %v1732_v56  ;;  %2952 = vmatprep.mubr.msk.f32.mxu0 %vm240_vm0, %v2143_v7  ;;  %1867 = vrot.lane.b32.xlu1 %v2853_v46, %s3212_s13 }
 0x31d   : > { %1865 = vrot.lane.b32.xlu0 %v2852_v53, %s3212_s13  ;;  %2953 = vmatmul.mubr.msk.f32.gmra.mrb[8].mxu0 %vm240_vm0, %v2144_v55 }
 0x31e   : > { %v1962_v8 = vpop.permute.xlu1 %1961 }
 0x31f   : > { %v1960_v9 = vpop.permute.xlu0 %1959  ;;  %2022 = vst.msk [vmem:[#allocation3 + $0x96] sm:$0x7f] %vm2003_vm15, %v1962_v8 }
 0x320   : > { %2021 = vst.msk [vmem:[#allocation3 + $0x8e] sm:$0xfc] %vm2001_vm14, %v1960_v9  ;;  %1973 = vrot.lane.b32.xlu1 %v2853_v46, %s3213_s14 }
 0x321   : > { %1971 = vrot.lane.b32.xlu0 %v2852_v53, %s3213_s14  ;;  %s4875_s14 = scalar_lea.hbm %s4993_s3, %s2889_s30 }
 0x322   : > { %v1367_v10 = vpop.permute.xlu1 %1366 }
 0x323   : > { %v1365_v11 = vpop.permute.xlu0 %1364  ;;  %1433 = vst.msk [vmem:[#allocation3 + $0x67] sm:$0x3f] %vm1420_vm4, %v1367_v10 }
 0x324   : > { %1432 = vst.msk [vmem:[#allocation3 + $0x5f] sm:$0xfe] %vm1418_vm5, %v1365_v11  ;;  %2079 = vrot.lane.b32.xlu1 %v2853_v46, %s3214_s8 }
 0x325   : > { %2077 = vrot.lane.b32.xlu0 %v2852_v53, %s3214_s8  ;;  %s3079_s8 = sshll.u32 %s3215_s7, 4  ;;  %s3080_s8 = int_to_ptr.vmem [resolvable:$false] %s3079_s8 }
 0x326   : > { %v1595_v12 = vpop.permute.xlu1 %1594  ;;  %s3081_s12 = scalar_lea.vmem %s3080_s8, 2048  ;;  %p3082_p0 = scmp.lt.s32.totalorder %s4870_s26, %s3080_s8 }
 0x327   : > { %v1593_v31 = vpop.permute.xlu0 %1592  ;;  %1653 = vst.msk [vmem:[#allocation3 + $0xa5] sm:$0xff] %vm1632_vm9, %v1595_v12  ;;  %p3083_p1 = scmp.lt.s32.totalorder %s3081_s12, %s3075_s17 }
 0x328   : > { %1652 = vst.msk [vmem:[#allocation3 + $0x9d] sm:$0xf8] %vm1630_vm7, %v1593_v31 }
 0x329   : > { %p3084_p2 = por %p3083_p1, %p3082_p0 }
 0x32a   : > { %v1840_v32 = vpop.permute.xlu1 %1839 }
 0x32b   : > { %v1838_v13 = vpop.permute.xlu0 %1837  ;;  %1908 = vst.msk [vmem:[#allocation3 + $0x57] sm:$0x3f] %vm1897_vm13, %v1840_v32  ;;  %p3085_p3 = pnand %p3084_p2, %p3078_p13 }
 0x32c   : > { %1907 = vst.msk [vmem:[#allocation3 + $0x4f] sm:$0xfe] %vm1895_vm11, %v1838_v13 }
 0x32e   : > { %v2068_v14 = vpop.permute.xlu1 %2067 }
 0x32f   : > { %v2066_v27 = vpop.permute.xlu0 %2065  ;;  %2128 = vst.msk [vmem:[#allocation3 + $0x95] sm:$0xff] %vm2109_vm2, %v2068_v14 }
 0x330   : > { %2127 = vst.msk [vmem:[#allocation3 + $0x8d] sm:$0xf8] %vm2107_vm1, %v2066_v27 }
 0x332   : > { %v1473_v28 = vpop.permute.xlu1 %1472 }
 0x333   : > { %v1471_v15 = vpop.permute.xlu0 %1470  ;;  %1539 = vst.msk [vmem:[#allocation3 + $0x66] sm:$0x7f] %vm1526_vm8, %v1473_v28 }
 0x334   : > { %1538 = vst.msk [vmem:[#allocation3 + $0x5e] sm:$0xfc] %vm1524_vm6, %v1471_v15 }
 0x336   : > { %v1754_v16 = vpop.permute.xlu1 %1753  ;;  %v2154_v59 = vld [vmem:[#allocation3 + $0x98] sm:$0xff] }
 0x337   : > { %v1752_v60 = vpop.permute.xlu0 %1751  ;;  %v2153_v17 = vld [vmem:[#allocation3 + $0x90] sm:$0xff]  ;;  %1812 = vst.msk [vmem:[#allocation3 + $0xa8] sm:$0x1f] %vm1791_vm12, %v1754_v16 }
 0x338   : > { %1811 = vst.msk [vmem:[#allocation3 + $0xa0] sm:$0xff] %vm1789_vm10, %v1752_v60  ;;  %2967 = vmatprep.mubr.msk.f32.mxu1 %vm240_vm0, %v2153_v17 }
 0x339   : > { %2968 = vmatmul.mubr.msk.f32.gmra.mrb[4].mxu1 %vm240_vm0, %v2154_v59 }
 0x33a   : > { %v1946_v18 = vpop.permute.xlu1 %1945 }
 0x33b   : > { %v1944_v19 = vpop.permute.xlu0 %1943  ;;  %2014 = vst.msk [vmem:[#allocation3 + $0x56] sm:$0x7f] %vm2003_vm15, %v1946_v18 }
 0x33c   : > { %2013 = vst.msk [vmem:[#allocation3 + $0x4e] sm:$0xfc] %vm2001_vm14, %v1944_v19  ;;  %v2942_v42 = vpop.f32.mrb[0].mxu0 }
 0x33d   : > { %v2325_v21 = vadd.f32 %v2942_v42, %v4761_v20  ;;  %v2319_v41 = vpop.f32.mrb[1].mxu0 }
 0x33e   : > { %v2320_v22 = vadd.f32 %v4761_v20, %v2319_v41  ;;  %v1387_v24 = vpop.permute.xlu1 %1386 }
 0x33f   : > { %v1385_v25 = vpop.permute.xlu0 %1384  ;;  %2450 = vst [vmem:[#allocation2 + $0x2a] sm:$0x1f] %v2325_v21  ;;  %1443 = vst.msk [vmem:[#allocation3 + $0xb7] sm:$0x3f] %vm1420_vm4, %v1387_v24 }
 0x340   : > { %1442 = vst.msk [vmem:[#allocation3 + $0xaf] sm:$0xfe] %vm1418_vm5, %v1385_v25  ;;  %2449 = vst [vmem:[#allocation2 + $0x22] sm:$0xff] %v2320_v22 }
 0x342   : > { %v1579_v49 = vpop.permute.xlu1 %1578 }
 0x343   : > { %v1577_v50 = vpop.permute.xlu0 %1576  ;;  %1645 = vst.msk [vmem:[#allocation3 + $0x65] sm:$0xff] %vm1632_vm9, %v1579_v49 }
 0x344   : > { %1644 = vst.msk [vmem:[#allocation3 + $0x5d] sm:$0xf8] %vm1630_vm7, %v1577_v50 }
 0x346   : > { %v1860_v57 = vpop.permute.xlu1 %1859 }
 0x347   : > { %v1858_v58 = vpop.permute.xlu0 %1857  ;;  %1918 = vst.msk [vmem:[#allocation3 + $0xa7] sm:$0x3f] %vm1897_vm13, %v1860_v57  ;;  %v2479_v48 = vld [vmem:[#allocation2 + $0x20] ss:$2 sm:$0xff]  ;;  %v2511_v51 = vld [vmem:[#allocation2 + $0x21] ss:$2 sm:$0xff] }
 0x348   : > { %1917 = vst.msk [vmem:[#allocation3 + $0x9f] sm:$0xfe] %vm1895_vm11, %v1858_v58  ;;  %v2540_v38 = vmax.f32 %v2479_v48, %v2511_v51 }
 0x34a   : > { %v2052_v23 = vpop.permute.xlu1 %2051 }
 0x34b   : > { %v2050_v61 = vpop.permute.xlu0 %2049  ;;  %2120 = vst.msk [vmem:[#allocation3 + $0x55] sm:$0xff] %vm2109_vm2, %v2052_v23 }
 0x34c   : > { %2119 = vst.msk [vmem:[#allocation3 + $0x4d] sm:$0xf8] %vm2107_vm1, %v2050_v61 }
 0x34e   : > { %v1493_v62 = vpop.permute.xlu1 %1492 }
 0x34f   : > { %v1491_v2 = vpop.permute.xlu0 %1490  ;;  %1549 = vst.msk [vmem:[#allocation3 + $0xb6] sm:$0x7f] %vm1526_vm8, %v1493_v62 }
 0x350   : > { %1548 = vst.msk [vmem:[#allocation3 + $0xae] sm:$0xfc] %vm1524_vm6, %v1491_v2 }
 0x352   : > { %v1738_v4 = vpop.permute.xlu1 %1737  ;;  %v2146_v0 = vld [vmem:[#allocation3 + $0x58] sm:$0xff] }
 0x353   : > { %v1736_v29 = vpop.permute.xlu0 %1735  ;;  %v2145_v30 = vld [vmem:[#allocation3 + $0x50] sm:$0xff]  ;;  %1804 = vst.msk [vmem:[#allocation3 + $0x68] sm:$0x1f] %vm1791_vm12, %v1738_v4 }
 0x354   : > { %1803 = vst.msk [vmem:[#allocation3 + $0x60] sm:$0xff] %vm1789_vm10, %v1736_v29  ;;  %2955 = vmatprep.mubr.msk.f32.mxu0 %vm240_vm0, %v2145_v30 }
 0x355   : > { %2956 = vmatmul.mubr.msk.f32.gmra.mrb[10].mxu0 %vm240_vm0, %v2146_v0 }
 0x356   : > { %v1966_v35 = vpop.permute.xlu1 %1965 }
 0x357   : > { %v1964_v33 = vpop.permute.xlu0 %1963  ;;  %2024 = vst.msk [vmem:[#allocation3 + $0xa6] sm:$0x7f] %vm2003_vm15, %v1966_v35 }
 0x358   : > { %2023 = vst.msk [vmem:[#allocation3 + $0x9e] sm:$0xfc] %vm2001_vm14, %v1964_v33  ;;  %v2945_v34 = vpop.f32.mrb[2].mxu0 }
 0x359   : > { %v2335_v63 = vadd.f32 %v2945_v34, %v4761_v20  ;;  %v2329_v36 = vpop.f32.mrb[3].mxu0 }
 0x35a   : > { %v2330_v39 = vadd.f32 %v4761_v20, %v2329_v36  ;;  %v1599_v40 = vpop.permute.xlu1 %1598 }
 0x35b   : > { %v1597_v43 = vpop.permute.xlu0 %1596  ;;  %2452 = vst [vmem:[#allocation2 + $0x3a] sm:$0x1f] %v2335_v63  ;;  %1655 = vst.msk [vmem:[#allocation3 + $0xb5] sm:$0xff] %vm1632_vm9, %v1599_v40 }
 0x35c   : > { %1654 = vst.msk [vmem:[#allocation3 + $0xad] sm:$0xf8] %vm1630_vm7, %v1597_v43  ;;  %2451 = vst [vmem:[#allocation2 + $0x32] sm:$0xff] %v2330_v39 }
 0x35e   : > { %v1844_v44 = vpop.permute.xlu1 %1843 }
 0x35f   : > { %v1842_v47 = vpop.permute.xlu0 %1841  ;;  %1910 = vst.msk [vmem:[#allocation3 + $0x67] sm:$0x3f] %vm1897_vm13, %v1844_v44 }
 0x360   : > { %1909 = vst.msk [vmem:[#allocation3 + $0x5f] sm:$0xfe] %vm1895_vm11, %v1842_v47  ;;  %v2584_v47 = vmul.f32 %v4660_v26, %v4660_v26 }
 0x362   : > { %v2072_v52 = vpop.permute.xlu1 %2071 }
 0x363   : > { %v2070_v1 = vpop.permute.xlu0 %2069  ;;  %2130 = vst.msk [vmem:[#allocation3 + $0xa5] sm:$0xff] %vm2109_vm2, %v2072_v52  ;;  %v2481_v3 = vld [vmem:[#allocation2 + $0x30] ss:$2 sm:$0xff]  ;;  %v2513_v37 = vld [vmem:[#allocation2 + $0x31] ss:$2 sm:$0xff] }
 0x364   : > { %2129 = vst.msk [vmem:[#allocation3 + $0x9d] sm:$0xf8] %vm2107_vm1, %v2070_v1  ;;  %v2541_v45 = vmax.f32 %v2481_v3, %v2513_v37 }
 0x366   : > { %v1758_v46 = vpop.permute.xlu1 %1757  ;;  %v4791_v5 = vmax.f32 %v2540_v38, %v2541_v45 }
 0x367   : > { %v1756_v53 = vpop.permute.xlu0 %1755  ;;  %1814 = vst.msk [vmem:[#allocation3 + $0xb8] sm:$0x1f] %vm1791_vm12, %v1758_v46 }
 0x368   : > { %1813 = vst.msk [vmem:[#allocation3 + $0xb0] sm:$0xff] %vm1789_vm10, %v1756_v53  ;;  %2563 = vst [vmem:[%s4664_s15 + $0x8] sm:$0xff] %v4791_v5  ;;  %v2585_v48 = vmul.f32 %v4791_v5, %v4791_v5  ;;  %v2570_v52 = vadd.f32 %v4791_v5, %v4660_v26 }
 0x36a   : > { %v1950_v54 = vpop.permute.xlu1 %1949  ;;  %v2156_v7 = vld [vmem:[#allocation3 + $0xa8] sm:$0xff]  ;;  %v2592_v37 = vadd.f32 %v2585_v48, %v2584_v47 }
 0x36b   : > { %v1948_v6 = vpop.permute.xlu0 %1947  ;;  %v2155_v56 = vld [vmem:[#allocation3 + $0xa0] sm:$0xff]  ;;  %2016 = vst.msk [vmem:[#allocation3 + $0x66] sm:$0x7f] %vm2003_vm15, %v1950_v54 }
 0x36c   : > { %2015 = vst.msk [vmem:[#allocation3 + $0x5e] sm:$0xfc] %vm2001_vm14, %v1948_v6  ;;  %2970 = vmatprep.mubr.msk.f32.mxu1 %vm240_vm0, %v2155_v56 }
 0x36d   : > { %2971 = vmatmul.mubr.msk.f32.gmra.mrb[6].mxu1 %vm240_vm0, %v2156_v7 }
 0x36e   : > { %v1391_v55 = vpop.permute.xlu1 %1390 }
 0x36f   : > { %v1389_v8 = vpop.permute.xlu0 %1388  ;;  %1445 = vst.msk [vmem:[#allocation3 + $0xc7] sm:$0x3f] %vm1420_vm4, %v1391_v55 }
 0x370   : > { %1444 = vst.msk [vmem:[#allocation3 + $0xbf] sm:$0xfe] %vm1418_vm5, %v1389_v8 }
 0x372   : > { %v1864_v9 = vpop.permute.xlu1 %1863 }
 0x373   : > { %v1862_v10 = vpop.permute.xlu0 %1861  ;;  %1920 = vst.msk [vmem:[#allocation3 + $0xb7] sm:$0x3f] %vm1897_vm13, %v1864_v9 }
 0x374   : > { %1919 = vst.msk [vmem:[#allocation3 + $0xaf] sm:$0xfe] %vm1895_vm11, %v1862_v10 }
 0x376   : > { %v2056_v11 = vpop.permute.xlu1 %2055 }
 0x377   : > { %v2054_v12 = vpop.permute.xlu0 %2053  ;;  %2122 = vst.msk [vmem:[#allocation3 + $0x65] sm:$0xff] %vm2109_vm2, %v2056_v11 }
 0x378   : > { %2121 = vst.msk [vmem:[#allocation3 + $0x5d] sm:$0xf8] %vm2107_vm1, %v2054_v12 }
 0x37a   : > { %v1497_v31 = vpop.permute.xlu1 %1496 }
 0x37b   : > { %v1495_v32 = vpop.permute.xlu0 %1494  ;;  %1551 = vst.msk [vmem:[#allocation3 + $0xc6] sm:$0x7f] %vm1526_vm8, %v1497_v31 }
 0x37c   : > { %1550 = vst.msk [vmem:[#allocation3 + $0xbe] sm:$0xfc] %vm1524_vm6, %v1495_v32 }
 0x37e   : > { %v1970_v13 = vpop.permute.xlu1 %1969  ;;  %v2148_v28 = vld [vmem:[#allocation3 + $0x68] sm:$0xff] }
 0x37f   : > { %v1968_v14 = vpop.permute.xlu0 %1967  ;;  %v2147_v27 = vld [vmem:[#allocation3 + $0x60] sm:$0xff]  ;;  %2026 = vst.msk [vmem:[#allocation3 + $0xb6] sm:$0x7f] %vm2003_vm15, %v1970_v13 }
 0x380   : > { %2025 = vst.msk [vmem:[#allocation3 + $0xae] sm:$0xfc] %vm2001_vm14, %v1968_v14  ;;  %2958 = vmatprep.mubr.msk.f32.mxu0 %vm240_vm0, %v2147_v27 }
 0x381   : > { %2959 = vmatmul.mubr.msk.f32.gmra.mrb[12].mxu0 %vm240_vm0, %v2148_v28 }
 0x382   : > { %v1603_v15 = vpop.permute.xlu1 %1602 }
 0x383   : > { %v1601_v16 = vpop.permute.xlu0 %1600  ;;  %1657 = vst.msk [vmem:[#allocation3 + $0xc5] sm:$0xff] %vm1632_vm9, %v1603_v15 }
 0x384   : > { %1656 = vst.msk [vmem:[#allocation3 + $0xbd] sm:$0xf8] %vm1630_vm7, %v1601_v16  ;;  %v2948_v60 = vpop.f32.mrb[4].mxu0 }
 0x385   : > { %v2345_v17 = vadd.f32 %v2948_v60, %v4761_v20  ;;  %v2339_v59 = vpop.f32.mrb[5].mxu0 }
 0x386   : > { %v2340_v18 = vadd.f32 %v4761_v20, %v2339_v59  ;;  %v2076_v19 = vpop.permute.xlu1 %2075 }
 0x387   : > { %v2074_v42 = vpop.permute.xlu0 %2073  ;;  %2454 = vst [vmem:[#allocation2 + $0x4a] sm:$0x1f] %v2345_v17  ;;  %2132 = vst.msk [vmem:[#allocation3 + $0xb5] sm:$0xff] %vm2109_vm2, %v2076_v19 }
 0x388   : > { %2131 = vst.msk [vmem:[#allocation3 + $0xad] sm:$0xf8] %vm2107_vm1, %v2074_v42  ;;  %2453 = vst [vmem:[#allocation2 + $0x42] sm:$0xff] %v2340_v18 }
 0x38a   : > { %v1762_v21 = vpop.permute.xlu1 %1761 }
 0x38b   : > { %v1760_v41 = vpop.permute.xlu0 %1759  ;;  %1816 = vst.msk [vmem:[#allocation3 + $0xc8] sm:$0x1f] %vm1791_vm12, %v1762_v21 }
 0x38c   : > { %1815 = vst.msk [vmem:[#allocation3 + $0xc0] sm:$0xff] %vm1789_vm10, %v1760_v41 }
 0x38e   : > { %v1868_v22 = vpop.permute.xlu1 %1867  ;;  %v2158_v49 = vld [vmem:[#allocation3 + $0xb8] sm:$0xff] }
 0x38f   : > { %v1866_v24 = vpop.permute.xlu0 %1865  ;;  %v2157_v25 = vld [vmem:[#allocation3 + $0xb0] sm:$0xff]  ;;  %1922 = vst.msk [vmem:[#allocation3 + $0xc7] sm:$0x3f] %vm1897_vm13, %v1868_v22  ;;  %v2483_v63 = vld [vmem:[#allocation2 + $0x40] ss:$2 sm:$0xff] }
 0x390   : > { %1921 = vst.msk [vmem:[#allocation3 + $0xbf] sm:$0xfe] %vm1895_vm11, %v1866_v24  ;;  %2973 = vmatprep.mubr.msk.f32.mxu1 %vm240_vm0, %v2157_v25  ;;  %v2515_v36 = vld [vmem:[#allocation2 + $0x41] ss:$2 sm:$0xff] }
 0x391   : > { %2974 = vmatmul.mubr.msk.f32.gmra.mrb[8].mxu1 %vm240_vm0, %v2158_v49  ;;  %v2542_v43 = vmax.f32 %v2483_v63, %v2515_v36 }
 0x392   : > { %v1974_v50 = vpop.permute.xlu1 %1973 }
 0x393   : > { %v1972_v57 = vpop.permute.xlu0 %1971  ;;  %2028 = vst.msk [vmem:[#allocation3 + $0xc6] sm:$0x7f] %vm2003_vm15, %v1974_v50 }
 0x394   : > { %2027 = vst.msk [vmem:[#allocation3 + $0xbe] sm:$0xfc] %vm2001_vm14, %v1972_v57 }
 0x396   : > { %v2080_v58 = vpop.permute.xlu1 %2079 }
 0x397   : > { %v2078_v23 = vpop.permute.xlu0 %2077  ;;  %2134 = vst.msk [vmem:[#allocation3 + $0xc5] sm:$0xff] %vm2109_vm2, %v2080_v58 }
 0x398   : > { %2133 = vst.msk [vmem:[#allocation3 + $0xbd] sm:$0xf8] %vm2107_vm1, %v2078_v23 }
 0x39c   : > { %v2963_v61 = vpop.f32.mrb[0].mxu1 }
 0x39d   : > { %v2395_v62 = vadd.f32 %v2963_v61, %v4761_v20  ;;  %v2389_v2 = vpop.f32.mrb[1].mxu1 }
 0x39e   : > { %v2390_v4 = vadd.f32 %v4761_v20, %v2389_v2  ;;  %v2160_v30 = vld [vmem:[#allocation3 + $0xc8] sm:$0xff] }
 0x39f   : > { %v2159_v29 = vld [vmem:[#allocation3 + $0xc0] sm:$0xff]  ;;  %2464 = vst [vmem:[#allocation2 + $0x9a] sm:$0x1f] %v2395_v62 }
 0x3a0   : > { %2976 = vmatprep.mubr.msk.f32.mxu1 %vm240_vm0, %v2159_v29  ;;  %2463 = vst [vmem:[#allocation2 + $0x92] sm:$0xff] %v2390_v4 }
 0x3a1   : > { %2977 = vmatmul.mubr.msk.f32.gmra.mrb[10].mxu1 %vm240_vm0, %v2160_v30 }
 0x3a7   : > { %v2493_v2 = vld [vmem:[#allocation2 + $0x90] ss:$2 sm:$0xff]  ;;  %v2525_v4 = vld [vmem:[#allocation2 + $0x91] ss:$2 sm:$0xff] }
 0x3b8   : > { %v2951_v0 = vpop.f32.mrb[6].mxu0 }
 0x3b9   : > { %v2355_v35 = vadd.f32 %v2951_v0, %v4761_v20  ;;  %v2349_v33 = vpop.f32.mrb[7].mxu0 }
 0x3ba   : > { %v2350_v34 = vadd.f32 %v4761_v20, %v2349_v33 }
 0x3bb   : > { %2456 = vst [vmem:[#allocation2 + $0x5a] sm:$0x1f] %v2355_v35  ;;  %v2547_v35 = vmax.f32 %v2493_v2, %v2525_v4 }
 0x3bc   : > { %2455 = vst [vmem:[#allocation2 + $0x52] sm:$0xff] %v2350_v34 }
 0x3c3   : > { %v2485_v39 = vld [vmem:[#allocation2 + $0x50] ss:$2 sm:$0xff]  ;;  %v2517_v40 = vld [vmem:[#allocation2 + $0x51] ss:$2 sm:$0xff] }
 0x3c4   : > { %v2543_v44 = vmax.f32 %v2485_v39, %v2517_v40 }
 0x3c6   : > { %v2556_v51 = vmax.f32 %v2542_v43, %v2543_v44 }
 0x3c8   : > { %2564 = vst [vmem:[%s4664_s15 + $0x10] sm:$0xff] %v2556_v51  ;;  %v2571_v1 = vadd.f32 %v2570_v52, %v2556_v51  ;;  %v2586_v3 = vmul.f32 %v2556_v51, %v2556_v51 }
 0x3ca   : > { %v2593_v38 = vadd.f32 %v2592_v37, %v2586_v3 }
 0x3d4   : > { %v2966_v45 = vpop.f32.mrb[2].mxu1 }
 0x3d5   : > { %v2405_v46 = vadd.f32 %v2966_v45, %v4761_v20  ;;  %v2399_v53 = vpop.f32.mrb[3].mxu1 }
 0x3d6   : > { %v2400_v54 = vadd.f32 %v4761_v20, %v2399_v53  ;;  %v2537_v53 = vld [vmem:[#allocation2 + $0xf1] ss:$2 sm:$0xff] }
 0x3d7   : > { %2466 = vst [vmem:[#allocation2 + $0xaa] sm:$0x1f] %v2405_v46  ;;  %v2505_v46 = vld [vmem:[#allocation2 + $0xf0] ss:$2 sm:$0xff] }
 0x3d8   : > { %2465 = vst [vmem:[#allocation2 + $0xa2] sm:$0xff] %v2400_v54 }
 0x3df   : > { %v2495_v10 = vld [vmem:[#allocation2 + $0xa0] ss:$2 sm:$0xff]  ;;  %v2527_v11 = vld [vmem:[#allocation2 + $0xa1] ss:$2 sm:$0xff] }
 0x3e0   : > { %v2548_v32 = vmax.f32 %v2495_v10, %v2527_v11 }
 0x3f0   : > { %v2954_v6 = vpop.f32.mrb[8].mxu0 }
 0x3f1   : > { %v2365_v56 = vadd.f32 %v2954_v6, %v4761_v20  ;;  %v2359_v7 = vpop.f32.mrb[9].mxu0  ;;  %v2553_v6 = vmax.f32 %v2505_v46, %v2537_v53 }
 0x3f2   : > { %v2360_v55 = vadd.f32 %v4761_v20, %v2359_v7 }
 0x3f3   : > { %2458 = vst [vmem:[#allocation2 + $0x6a] sm:$0x1f] %v2365_v56 }
 0x3f4   : > { %2457 = vst [vmem:[#allocation2 + $0x62] sm:$0xff] %v2360_v55 }
 0x3fb   : > { %v2487_v60 = vld [vmem:[#allocation2 + $0x60] ss:$2 sm:$0xff]  ;;  %v2519_v17 = vld [vmem:[#allocation2 + $0x61] ss:$2 sm:$0xff] }
 0x3fc   : > { %v2544_v19 = vmax.f32 %v2487_v60, %v2519_v17 }
 0x40c   : > { %v2969_v26 = vpop.f32.mrb[4].mxu1 }
 0x40d   : > { %v2415_v5 = vadd.f32 %v2969_v26, %v4761_v20  ;;  %v2409_v8 = vpop.f32.mrb[5].mxu1 }
 0x40e   : > { %v2410_v9 = vadd.f32 %v4761_v20, %v2409_v8 }
 0x40f   : > { %2468 = vst [vmem:[#allocation2 + $0xba] sm:$0x1f] %v2415_v5 }
 0x410   : > { %2467 = vst [vmem:[#allocation2 + $0xb2] sm:$0xff] %v2410_v9 }
 0x417   : > { %v2497_v12 = vld [vmem:[#allocation2 + $0xb0] ss:$2 sm:$0xff]  ;;  %v2529_v31 = vld [vmem:[#allocation2 + $0xb1] ss:$2 sm:$0xff] }
 0x418   : > { %v2549_v13 = vmax.f32 %v2497_v12, %v2529_v31 }
 0x41a   : > { %v4848_v14 = vmax.f32 %v2548_v32, %v2549_v13 }
 0x41c   : > { %2567 = vst [vmem:[%s4664_s15 + $0x28] sm:$0xff] %v4848_v14 }
 0x428   : > { %v2957_v27 = vpop.f32.mrb[10].mxu0 }
 0x429   : > { %v2375_v28 = vadd.f32 %v2957_v27, %v4761_v20  ;;  %v2369_v15 = vpop.f32.mrb[11].mxu0 }
 0x42a   : > { %v2370_v16 = vadd.f32 %v4761_v20, %v2369_v15 }
 0x42b   : > { %2460 = vst [vmem:[#allocation2 + $0x7a] sm:$0x1f] %v2375_v28 }
 0x42c   : > { %2459 = vst [vmem:[#allocation2 + $0x72] sm:$0xff] %v2370_v16 }
 0x433   : > { %v2489_v59 = vld [vmem:[#allocation2 + $0x70] ss:$2 sm:$0xff]  ;;  %v2521_v18 = vld [vmem:[#allocation2 + $0x71] ss:$2 sm:$0xff] }
 0x434   : > { %v2545_v42 = vmax.f32 %v2489_v59, %v2521_v18 }
 0x436   : > { %v2557_v21 = vmax.f32 %v2544_v19, %v2545_v42 }
 0x438   : > { %2565 = vst [vmem:[%s4664_s15 + $0x18] sm:$0xff] %v2557_v21  ;;  %v2572_v41 = vadd.f32 %v2571_v1, %v2557_v21  ;;  %v2587_v22 = vmul.f32 %v2557_v21, %v2557_v21 }
 0x43a   : > { %v2594_v24 = vadd.f32 %v2593_v38, %v2587_v22 }
 0x440   : > { %v2972_v25 = vpop.f32.mrb[6].mxu1 }
 0x441   : > { %v2425_v49 = vadd.f32 %v2972_v25, %v4761_v20  ;;  %v2419_v50 = vpop.f32.mrb[7].mxu1 }
 0x442   : > { %v2420_v57 = vadd.f32 %v4761_v20, %v2419_v50 }
 0x443   : > { %2470 = vst [vmem:[#allocation2 + $0xca] sm:$0x1f] %v2425_v49 }
 0x444   : > { %2469 = vst [vmem:[#allocation2 + $0xc2] sm:$0xff] %v2420_v57 }
 0x44b   : > { %v2499_v40 = vld [vmem:[#allocation2 + $0xc0] ss:$2 sm:$0xff]  ;;  %v2531_v43 = vld [vmem:[#allocation2 + $0xc1] ss:$2 sm:$0xff] }
 0x44c   : > { %v2550_v48 = vmax.f32 %v2499_v40, %v2531_v43 }
 0x454   : > { %v2960_v58 = vpop.f32.mrb[12].mxu0 }
 0x455   : > { %v2385_v23 = vadd.f32 %v2960_v58, %v4761_v20  ;;  %v2379_v61 = vpop.f32.mrb[13].mxu0 }
 0x456   : > { %v2380_v62 = vadd.f32 %v4761_v20, %v2379_v61 }
 0x457   : > { %2462 = vst [vmem:[#allocation2 + $0x8a] sm:$0x1f] %v2385_v23 }
 0x458   : > { %2461 = vst [vmem:[#allocation2 + $0x82] sm:$0xff] %v2380_v62 }
 0x45f   : > { %v2491_v29 = vld [vmem:[#allocation2 + $0x80] ss:$2 sm:$0xff]  ;;  %v2523_v30 = vld [vmem:[#allocation2 + $0x81] ss:$2 sm:$0xff] }
 0x460   : > { %v2546_v0 = vmax.f32 %v2491_v29, %v2523_v30 }
 0x462   : > { %v2558_v33 = vmax.f32 %v2546_v0, %v2547_v35 }
 0x464   : > { %v2975_v34 = vpop.f32.mrb[8].mxu1  ;;  %2566 = vst [vmem:[%s4664_s15 + $0x20] sm:$0xff] %v2558_v33  ;;  %v2588_v45 = vmul.f32 %v2558_v33, %v2558_v33  ;;  %v2573_v54 = vadd.f32 %v2572_v41, %v2558_v33 }
 0x465   : > { %v2435_v63 = vadd.f32 %v2975_v34, %v4761_v20  ;;  %v2429_v36 = vpop.f32.mrb[9].mxu1 }
 0x466   : > { %v2430_v39 = vadd.f32 %v4761_v20, %v2429_v36  ;;  %v2595_v56 = vadd.f32 %v2594_v24, %v2588_v45  ;;  %v2574_v5 = vadd.f32 %v2573_v54, %v4848_v14 }
 0x467   : > { %2472 = vst [vmem:[#allocation2 + $0xda] sm:$0x1f] %v2435_v63 }
 0x468   : > { %2471 = vst [vmem:[#allocation2 + $0xd2] sm:$0xff] %v2430_v39 }
 0x46f   : > { %v2501_v44 = vld [vmem:[#allocation2 + $0xd0] ss:$2 sm:$0xff]  ;;  %v2533_v47 = vld [vmem:[#allocation2 + $0xd1] ss:$2 sm:$0xff] }
 0x470   : > { %v2551_v51 = vmax.f32 %v2501_v44, %v2533_v47 }
 0x472   : > { %v2560_v52 = vmax.f32 %v2550_v48, %v2551_v51 }
 0x474   : > { %v2978_v1 = vpop.f32.mrb[10].mxu1  ;;  %2568 = vst [vmem:[%s4664_s15 + $0x30] sm:$0xff] %v2560_v52  ;;  %v2590_v8 = vmul.f32 %v2560_v52, %v2560_v52  ;;  %v2575_v10 = vadd.f32 %v2574_v5, %v2560_v52 }
 0x475   : > { %v2445_v3 = vadd.f32 %v2978_v1, %v4761_v20  ;;  %v2439_v37 = vpop.f32.mrb[11].mxu1 }
 0x476   : > { %v2440_v38 = vadd.f32 %v4761_v20, %v2439_v37  ;;  %v2589_v20 = vmul.f32 %v4848_v14, %v4848_v14 }
 0x477   : > { %2474 = vst [vmem:[#allocation2 + $0xea] sm:$0x1f] %v2445_v3 }
 0x478   : > { %2473 = vst [vmem:[#allocation2 + $0xe2] sm:$0xff] %v2440_v38  ;;  %v2596_v11 = vadd.f32 %v2595_v56, %v2589_v20 }
 0x47a   : > { %v2597_v32 = vadd.f32 %v2596_v11, %v2590_v8 }
 0x47f   : > { %v2503_v7 = vld [vmem:[#allocation2 + $0xe0] ss:$2 sm:$0xff]  ;;  %v2535_v55 = vld [vmem:[#allocation2 + $0xe1] ss:$2 sm:$0xff] }
 0x480   : > { %v2552_v26 = vmax.f32 %v2503_v7, %v2535_v55 }
 0x482   : > { %v2561_v9 = vmax.f32 %v2552_v26, %v2553_v6 }
 0x484   : > { %2569 = vst [vmem:[%s4664_s15 + $0x38] sm:$0xff] %v2561_v9  ;;  %v2576_v12 = vadd.f32 %v2575_v10, %v2561_v9  ;;  %v2591_v31 = vmul.f32 %v2561_v9, %v2561_v9 }
 0x485   : > { %3088 = shalt.err (!%p3085_p3)
}
 0x486   : > { %s3089_s15 = scalar_lea.hbm %s4875_s14, 1024  ;;  %s3093_s30 = scalar_lea.hbm %s4993_s3, 2048 }
 0x487   : > { %p3090_p4 = scmp.ne.s32.totalorder %s4875_s14, %s3089_s15  ;;  %p3094_p9 = scmp.lt.u32.totalorder %s4875_s14, %s4993_s3 }
 0x488   : > { %p3095_p10 = scmp.lt.u32.totalorder %s3093_s30, %s3089_s15  ;;  %p3097_p12 = scmp.lt.u32.totalorder %s3089_s15, %s4875_s14 }
 0x489   : > { %p3091_p7 = pnand %p3090_p4, %p3289_p5 }
 0x48a   : > { %p3096_p11 = por %p3095_p10, %p3094_p9 }
 0x48b   : > { %p3092_p8 = pneg %p3091_p7 }
 0x48c   : > { %p3098_p13 = por %p3097_p12, %p3096_p11 }
 0x48e   : > { %p3099_p0 = pnand %p3098_p13, %p3092_p8 }
 0x490   : > { %3102 = shalt.err (!%p3099_p0)
}
 0x491   : > { %s3216_s17 = smov 128   ;;  %v2577_v13 = vrot.slane %v2576_v12, 4  ;;  %v2598_v14 = vadd.f32 %v2597_v32, %v2591_v31  ;;  %s2611_s7 = sand.u32 1, %s3270_s22  }
 0x492   : > { %3003 = dma.vmem_to_hbm [thread:$0]  (%p3289_p5), %s4870_s26, 1024, %s4875_s14, %s2607_s16, %s3216_s17, %s3216_s17, %s3201_s11  }
 0x493   : > { %v2578_v27 = vadd.f32 %v2577_v13, %v2576_v12  ;;  %v2599_v28 = vrot.slane %v2598_v14, 4  ;;  %s2884_s8 = sshll.u32 %s3270_s22, 4  ;;  %s227_s12 = scalar_lea.vmem [#allocation6], %s4655_s10 }
 0x494   : > { %s2644_s15 = sshll.u32 %s227_s12, 4  ;;  %s233_s9 = scalar_lea.vmem [#allocation8], %s4655_s10  ;;  %s4914_s15 = int_to_ptr.vmem [resolvable:$true] %s2644_s15 }
 0x495   : > { %v2579_v15 = vrot.slane %v2578_v27, 2  ;;  %v2600_v16 = vadd.f32 %v2599_v28, %v2598_v14  ;;  %s2657_s25 = sshll.u32 %s233_s9, 4  ;;  %s4912_s14 = scalar_lea.hbm %s4994_s4, %s2884_s8  ;;  %s4921_s25 = int_to_ptr.vmem [resolvable:$true] %s2657_s25 }
 0x496   : > { %s4919_s30 = scalar_lea.hbm %s4995_s5, %s2884_s8  ;;  %s4923_s6 = scalar_lea.sflag [#allocation7], %s2611_s7 }
 0x497   : > { %v2580_v60 = vadd.f32 %v2579_v15, %v2578_v27  ;;  %v2601_v17 = vrot.slane %v2600_v16, 2  ;;  %s3103_s13 = scalar_lea.vmem %s4914_s15, 16  ;;  %s3217_s17 = smov [#allocation6]  }
 0x498   : > { %p3104_p1 = scmp.ne.s32.totalorder %s4914_s15, %s3103_s13  ;;  %s3107_s11 = sshll.u32 %s3217_s17, 4  ;;  %s3108_s11 = int_to_ptr.vmem [resolvable:$false] %s3107_s11 }
 0x499   : > { %v2581_v59 = vrot.slane %v2580_v60, 1  ;;  %v2602_v18 = vadd.f32 %v2601_v17, %v2600_v16  ;;  %s3109_s26 = scalar_lea.vmem %s3108_s11, 32  ;;  %p3110_p4 = scmp.lt.s32.totalorder %s4914_s15, %s3108_s11 }
 0x49a   : > { %p3105_p2 = pnand %p3104_p1, %p3289_p5  ;;  %p3111_p7 = scmp.lt.s32.totalorder %s3109_s26, %s3103_s13 }
 0x49b   : > { %v2582_v19 = vadd.f32 %v2581_v59, %v2580_v60  ;;  %v2603_v42 = vrot.slane %v2602_v18, 1 }
 0x49c   : > { %p3106_p3 = pneg %p3105_p2  ;;  %p3112_p8 = por %p3111_p7, %p3110_p4 }
 0x49d   : > { %2583 = vst [vmem:[%s227_s12] sm:$0x1] %v2582_v19  ;;  %v2604_v21 = vadd.f32 %v2603_v42, %v2602_v18 }
 0x49e   : > { %p3113_p9 = pnand %p3112_p8, %p3106_p3 }
 0x4a0   : > { %3116 = shalt.err (!%p3113_p9)
}
 0x4a1   : > { %s3117_s7 = scalar_lea.hbm %s4912_s14, 16  ;;  %s3121_s22 = scalar_lea.hbm %s4994_s4, 32 }
 0x4a2   : > { %p3118_p10 = scmp.ne.s32.totalorder %s4912_s14, %s3117_s7  ;;  %p3122_p13 = scmp.lt.u32.totalorder %s4912_s14, %s4994_s4 }
 0x4a3   : > { %p3123_p0 = scmp.lt.u32.totalorder %s3121_s22, %s3117_s7  ;;  %p3125_p2 = scmp.lt.u32.totalorder %s3117_s7, %s4912_s14 }
 0x4a4   : > { %p3119_p11 = pnand %p3118_p10, %p3289_p5 }
 0x4a5   : > { %p3124_p1 = por %p3123_p0, %p3122_p13 }
 0x4a6   : > { %p3120_p12 = pneg %p3119_p11 }
 0x4a7   : > { %p3126_p3 = por %p3125_p2, %p3124_p1 }
 0x4a9   : > { %p3127_p4 = pnand %p3126_p3, %p3120_p12 }
 0x4ab   : > { %3130 = shalt.err (!%p3127_p4)
}
 0x4ac   : > { %3004 = dma.vmem_to_hbm [thread:$0]  (%p3289_p5), %s4914_s15, 16, %s4912_s14, %s4923_s6   ;;  %2605 = vst [vmem:[%s233_s9] sm:$0x1] %v2604_v21 }
 0x4ad   : > { %s3131_s13 = scalar_lea.vmem %s4921_s25, 16  ;;  %s3218_s11 = smov [#allocation8]  }
 0x4ae   : > { %p3132_p7 = scmp.ne.s32.totalorder %s4921_s25, %s3131_s13  ;;  %s3135_s26 = sshll.u32 %s3218_s11, 4  ;;  %s3136_s26 = int_to_ptr.vmem [resolvable:$false] %s3135_s26 }
 0x4af   : > { %s3137_s7 = scalar_lea.vmem %s3136_s26, 32  ;;  %p3138_p10 = scmp.lt.s32.totalorder %s4921_s25, %s3136_s26 }
 0x4b0   : > { %p3133_p8 = pnand %p3132_p7, %p3289_p5  ;;  %p3139_p11 = scmp.lt.s32.totalorder %s3137_s7, %s3131_s13 }
 0x4b2   : > { %p3134_p9 = pneg %p3133_p8  ;;  %p3140_p12 = por %p3139_p11, %p3138_p10 }
 0x4b4   : > { %p3141_p13 = pnand %p3140_p12, %p3134_p9 }
 0x4b6   : > { %3144 = shalt.err (!%p3141_p13)
}
 0x4b7   : > { %s3145_s10 = scalar_lea.hbm %s4919_s30, 16  ;;  %s3149_s14 = scalar_lea.hbm %s4995_s5, 32 }
 0x4b8   : > { %p3146_p0 = scmp.ne.s32.totalorder %s4919_s30, %s3145_s10  ;;  %p3150_p3 = scmp.lt.u32.totalorder %s4919_s30, %s4995_s5 }
 0x4b9   : > { %p3151_p4 = scmp.lt.u32.totalorder %s3149_s14, %s3145_s10  ;;  %p3153_p8 = scmp.lt.u32.totalorder %s3145_s10, %s4919_s30 }
 0x4ba   : > { %p3147_p1 = pnand %p3146_p0, %p3289_p5 }
 0x4bb   : > { %p3152_p7 = por %p3151_p4, %p3150_p3 }
 0x4bc   : > { %p3148_p2 = pneg %p3147_p1 }
 0x4bd   : > { %p3154_p9 = por %p3153_p8, %p3152_p7 }
 0x4bf   : > { %p3155_p10 = pnand %p3154_p9, %p3148_p2 }
 0x4c1   : > { %3158 = shalt.err (!%p3155_p10)
}
 0x4c2   : > { %3005 = dma.vmem_to_hbm [thread:$0]  (%p3289_p5), %s4921_s25, 16, %s4919_s30, %s4923_s6  }
 0x4c3 PF: > { %p3019_p11 = scmp.ge.s32.totalorder %s3197_s21, 2  ;;  %s2669_s22 = sand.u32 1, %s3185_s18  }
 0x4c4   : > { %s2670_s16 = scalar_lea.sflag [#allocation5], %s2669_s22 }
 0x4c5   : > { %p3010_p12 = pnand %p3019_p11, %p3293_p6 }
 0x4c7   : > { %3176 = dma.done.wait (!%p3010_p12), %s2670_s16, 1024  }
 0x4c8   : > { %3178 = vsyncadd (!%p3010_p12), %s2670_s16, 4294966272  ;;  %s2678_s17 = sand.u32 1, %s2769_s23  }
 0x4c9   : > { %s2679_s13 = scalar_lea.sflag [#allocation7], %s2678_s17 }
 0x4ca   : > { %3180 = dma.done.wait (!%p3010_p12), %s2679_s13, 32  }
 0x4cb   : > { %3182 = vsyncadd (!%p3010_p12), %s2679_s13, 4294967264  ;;  %p19_p5 = scmp.ge.s32.totalorder %s3274_s24, 4   ;;  %s4998_s18 = smov %s3189_s19 }
 0x4cc   : > { %s4999_s19 = smov %s3193_s20  ;;  %s5000_s20 = smov %s3287_s27 }
 0x4cd   : > { %s5001_s21 = smov %s3274_s24  ;;  %21 = sbr.rel (!%p19_p5) target bundleno = 5 (0x5), region = 135 }
 0x4d4   :  { %2691 = vsyncpa [#allocation5], 1 }
 0x4d5   :  { %2693 = vsyncpa [#allocation5 + $0x1], 1 }
 0x4d6   :  { %2694 = vsyncpa [#allocation7], 1 }
 0x4d7   :  { %2696 = vsyncpa [#allocation7 + $0x1], 1 }

</bundles_post_ra>
